<compile_context>
chip_gen: v5e
topology: v5e:2x2
jax: 0.10.0
libtpu: 0.0.40
codegen_flags: <defaults>
</compile_context>

<pallas_src>
import functools

import jax
import jax.numpy as jnp
from jax import lax
from jax.experimental import pallas as pl
from jax.experimental.pallas import tpu as pltpu

_VMEM = pl.BlockSpec(memory_space=pltpu.MemorySpace.VMEM)


def _round_up(v, m):
    return (v + m - 1) // m * m


# ----------------------------------------------------------------------------
# Fused kernel.
# Padded shapes: x:(T*Bp,Hp) f32, w_ih0:(Hp,Hp) bf16, w_big:(L*Hp,L*Hp) bf16,
#                b:(1,L*Hp) f32, w1:(Hp,Dp) bf16, b1:(1,Dp) f32,
#                w2:(Dp,Hp) bf16, b2:(1,Hp) f32
# Output: y:(L*Bp,Hp) f32 == h_n1 + MLP(h_n2)
# ----------------------------------------------------------------------------
def _fused_rnn_kernel(x_ref, w_ih0_ref, w_big_ref, b_ref,
                      w1_ref, b1_ref, w2_ref, b2_ref,
                      y_ref,
                      act_ref, proj_ref,
                      *, T, Bp, L):
    Hp = proj_ref.shape[-1]
    S = T + L - 1                         # wavefront steps per RNN pass

    # Hoist per-layer bias broadcasts out of the unrolled loops
    # (JAX does not CSE broadcast_in_dim).
    bias = [jnp.broadcast_to(b_ref[0:1, l * Hp:(l + 1) * Hp], (Bp, Hp))
            for l in range(L)]

    def run_pass(h0_blocks, src_is_x, write_out):
        # (1) Layer-0 input projection for every timestep: ONE big MXU matmul,
        #     off the serial critical path.
        src = x_ref[...] if src_is_x else act_ref[...]
        proj_ref[...] = jnp.dot(src.astype(jnp.bfloat16), w_ih0_ref[...],
                                preferred_element_type=jnp.float32)

        carry = list(h0_blocks)           # per-layer (Bp,Hp) bf16 hidden state
        h_fin_f32 = [None] * L            # exact f32 h[l][T-1] for the residual

        # (2) Wavefront recurrence: at step s, layer l advances to timestep
        #     t = s - l.  One (Bp,L*Hp) @ (L*Hp,L*Hp) matmul feeds every active
        #     layer; all indices are Python-static (fully unrolled, T small).
        for s in range(S):
            lhs = carry[0] if L == 1 else jnp.concatenate(carry, axis=1)
            pre = jnp.dot(lhs, w_big_ref[...],
                          preferred_element_type=jnp.float32)
            new_carry = list(carry)
            for l in range(L):
                t = s - l
                if not (0 <= t < T):
                    continue              # layer inactive at this wavefront step
                blk = pre[:, l * Hp:(l + 1) * Hp] + bias[l]
                if l == 0:
                    blk = blk + proj_ref[t * Bp:(t + 1) * Bp, :]
                h_f32 = jnp.tanh(blk)
                new_carry[l] = h_f32.astype(jnp.bfloat16)
                if t == T - 1:
                    h_fin_f32[l] = h_f32
                if write_out and l == L - 1:
                    act_ref[t * Bp:(t + 1) * Bp, :] = h_f32
            carry = new_carry
        return carry, h_fin_f32

    h_zero = [jnp.zeros((Bp, Hp), jnp.bfloat16)] * L

    # ---- pass 1: out1 -> act_ref, h_n1 --------------------------------------
    h1_bf, h1_f32 = run_pass(h_zero, src_is_x=True, write_out=True)
    # ---- pass 2: only h_n2 is needed; per-step outputs are discarded --------
    h2_bf, _ = run_pass(h1_bf, src_is_x=False, write_out=False)

    # ---- y = h_n1 + Linear(8H,H)(Linear(H,8H)(h_n2)) -------------------------
    h2 = h2_bf[0] if L == 1 else jnp.concatenate(h2_bf, axis=0)   # (L*Bp,Hp) bf16
    z = jnp.dot(h2, w1_ref[...], preferred_element_type=jnp.float32) + b1_ref[...]
    y = jnp.dot(z.astype(jnp.bfloat16), w2_ref[...],
                preferred_element_type=jnp.float32) + b2_ref[...]
    h1 = h1_f32[0] if L == 1 else jnp.concatenate(h1_f32, axis=0)
    y_ref[...] = h1 + y


# ----------------------------------------------------------------------------
# Parameter init (PyTorch-style uniform(-1/sqrt(fan), 1/sqrt(fan)), f32,
# stored in the PyTorch layout: weight (out, in), bias (out,))
# ----------------------------------------------------------------------------
def init_params(key, input_size, hidden_size, num_layers):
    H, I, L = hidden_size, input_size, num_layers
    k_rnn = 1.0 / jnp.sqrt(jnp.float32(H))
    params = {"rnn": []}
    for l in range(L):
        in_dim = I if l == 0 else H
        key, k1, k2, k3, k4 = jax.random.split(key, 5)
        params["rnn"].append(dict(
            w_ih=jax.random.uniform(k1, (H, in_dim), jnp.float32, -k_rnn, k_rnn),
            w_hh=jax.random.uniform(k2, (H, H), jnp.float32, -k_rnn, k_rnn),
            b_ih=jax.random.uniform(k3, (H,), jnp.float32, -k_rnn, k_rnn),
            b_hh=jax.random.uniform(k4, (H,), jnp.float32, -k_rnn, k_rnn)))
    key, k1, k2, k3, k4 = jax.random.split(key, 5)
    s1 = 1.0 / jnp.sqrt(jnp.float32(H))
    s2 = 1.0 / jnp.sqrt(jnp.float32(8 * H))
    params["w1"] = jax.random.uniform(k1, (8 * H, H), jnp.float32, -s1, s1)
    params["b1"] = jax.random.uniform(k2, (8 * H,), jnp.float32, -s1, s1)
    params["w2"] = jax.random.uniform(k3, (H, 8 * H), jnp.float32, -s2, s2)
    params["b2"] = jax.random.uniform(k4, (H,), jnp.float32, -s2, s2)
    return params


# ----------------------------------------------------------------------------
# Wrapper: pad/transpose/cast params, pad x, call the fused kernel, un-pad.
# ----------------------------------------------------------------------------
def _pad2(a, rows, cols):
    return jnp.zeros((rows, cols), a.dtype).at[:a.shape[0], :a.shape[1]].set(a)


def _pack_params(params, H, Hp, Dp, L):
    rnn = params["rnn"]
    # layer-0 input weight, transposed to (in, out), padded, bf16
    w_ih0 = _pad2(rnn[0]["w_ih"].T, Hp, Hp).astype(jnp.bfloat16)
    # wavefront block matrix:
    #   block (l, l)   = W_hh[l]^T   (recurrence within layer l)
    #   block (l-1, l) = W_ih[l]^T   (layer l-1 output -> layer l input)
    w_big = jnp.zeros((L * Hp, L * Hp), jnp.float32)
    b = jnp.zeros((1, L * Hp), jnp.float32)
    for l in range(L):
        w_big = w_big.at[l * Hp:l * Hp + H, l * Hp:l * Hp + H].set(rnn[l]["w_hh"].T)
        if l > 0:
            w_big = w_big.at[(l - 1) * Hp:(l - 1) * Hp + H,
                             l * Hp:l * Hp + H].set(rnn[l]["w_ih"].T)
        b = b.at[0, l * Hp:l * Hp + H].set(rnn[l]["b_ih"] + rnn[l]["b_hh"])
    w_big = w_big.astype(jnp.bfloat16)
    w1 = _pad2(params["w1"].T, Hp, Dp).astype(jnp.bfloat16)
    b1 = _pad2(params["b1"].reshape(1, -1), 1, Dp)
    w2 = _pad2(params["w2"].T, Dp, Hp).astype(jnp.bfloat16)
    b2 = _pad2(params["b2"].reshape(1, -1), 1, Hp)
    return w_ih0, w_big, b, w1, b1, w2, b2


def forward(x, params, num_layers, hidden_size):
    T, B, I = x.shape
    H, L = hidden_size, num_layers
    assert I == H, "module feeds the RNN its own output: input_size must equal hidden_size"
    Bp = _round_up(B, 8)          # sublane multiple (padded rows sliced off below)
    Hp = _round_up(H, 128)        # lane multiple
    Dp = _round_up(8 * H, 128)    # MLP intermediate, lane multiple

    packed = _pack_params(params, H, Hp, Dp, L)
    x_p = jnp.zeros((T, Bp, Hp), jnp.float32).at[:, :B, :I].set(x)
    x_p = x_p.reshape(T * Bp, Hp)

    kernel = pl.pallas_call(
        functools.partial(_fused_rnn_kernel, T=T, Bp=Bp, L=L),
        out_shape=jax.ShapeDtypeStruct((L * Bp, Hp), jnp.float32),
        in_specs=[_VMEM] * 8,
        out_specs=_VMEM,
        scratch_shapes=[
            pltpu.VMEM((T * Bp, Hp), jnp.float32),   # out1 (last layer, per step)
            pltpu.VMEM((T * Bp, Hp), jnp.float32),   # layer-0 input projection
        ],
        compiler_params=pltpu.CompilerParams(
            vmem_limit_bytes=32 * 1024 * 1024),
    )
    y = kernel(x_p, *packed)
    return y.reshape(L, Bp, Hp)[:, :B, :H]


# ----------------------------------------------------------------------------
# Pure-JAX reference with the same math (bf16 matmul operands, f32 accum).
# ----------------------------------------------------------------------------
def forward_reference(x, params, num_layers, hidden_size):
    H, L = hidden_size, num_layers
    B = x.shape[1]
    bf = lambda a: a.astype(jnp.bfloat16)

    def run_rnn(inp, h0_list):
        out, h_fin = inp, []
        for l in range(L):
            w_ih_t = params["rnn"][l]["w_ih"].T
            w_hh_t = params["rnn"][l]["w_hh"].T
            b = params["rnn"][l]["b_ih"] + params["rnn"][l]["b_hh"]

            def step(h, x_t, w_ih_t=w_ih_t, w_hh_t=w_hh_t, b=b):
                h_new = jnp.tanh(
                    jnp.dot(bf(x_t), bf(w_ih_t), preferred_element_type=jnp.float32)
                    + jnp.dot(bf(h), bf(w_hh_t), preferred_element_type=jnp.float32)
                    + b)
                return h_new, h_new

            hf, out = lax.scan(step, h0_list[l], out)
            h_fin.append(hf)
        return out, h_fin

    h0 = [jnp.zeros((B, H), jnp.float32)] * L
    out1, h_n1 = run_rnn(x, h0)
    _, h_n2 = run_rnn(out1, h_n1)
    h1 = jnp.stack(h_n1)
    h2 = jnp.stack(h_n2).reshape(L * B, H)
    z = jnp.dot(bf(h2), bf(params["w1"].T),
                preferred_element_type=jnp.float32) + params["b1"]
    y = jnp.dot(bf(z), bf(params["w2"].T),
                preferred_element_type=jnp.float32) + params["b2"]
    return h1 + y.reshape(L, B, H)


if __name__ == "__main__":
    T, B = 8, 4                  # seq_len, batch
    I = H = 32                   # input_size == hidden_size (module requirement)
    L = 2                        # num_layers

    key = jax.random.PRNGKey(0)
    key, kx = jax.random.split(key)
    x = jax.random.normal(kx, (T, B, I), jnp.float32)
    params = init_params(key, I, H, L)

    fwd = jax.jit(functools.partial(forward, num_layers=L, hidden_size=H))
    y = jax.block_until_ready(fwd(x, params))

    y_ref = forward_reference(x, params, L, H)
    assert y.shape == (L, B, H)
    assert jnp.allclose(y, y_ref, atol=2e-3, rtol=2e-3), \
        float(jnp.max(jnp.abs(y - y_ref)))

    print("KERNEL_OK")
</pallas_src>

<mosaic_0001>
module attributes {stable_mosaic.version = 11 : i64} {
  func.func @_fused_rnn_kernel(%arg0: memref<64x128xf32, #tpu.memory_space<vmem>>, %arg1: memref<128x128xbf16, #tpu.memory_space<vmem>>, %arg2: memref<256x256xbf16, #tpu.memory_space<vmem>>, %arg3: memref<1x256xf32, #tpu.memory_space<vmem>>, %arg4: memref<128x256xbf16, #tpu.memory_space<vmem>>, %arg5: memref<1x256xf32, #tpu.memory_space<vmem>>, %arg6: memref<256x128xbf16, #tpu.memory_space<vmem>>, %arg7: memref<1x128xf32, #tpu.memory_space<vmem>>, %arg8: memref<16x128xf32, #tpu.memory_space<vmem>>, %arg9: memref<64x128xf32, #tpu.memory_space<vmem>>, %arg10: memref<64x128xf32, #tpu.memory_space<vmem>>) attributes {dimension_semantics = [], scalar_prefetch = 0 : i64, scratch_operands = 2 : i64, tpu.core_type = #tpu.core_type<tc>} {
    %c0 = arith.constant 0 : index
    %c0_0 = arith.constant 0 : index
    %0 = vector.load %arg3[%c0, %c0_0] : memref<1x256xf32, #tpu.memory_space<vmem>>, vector<1x128xf32>
    %1 = vector.shape_cast %0 : vector<1x128xf32> to vector<1x128xf32>
    %2 = vector.broadcast %1 : vector<1x128xf32> to vector<8x128xf32>
    %c0_1 = arith.constant 0 : index
    %c128 = arith.constant 128 : index
    %3 = vector.load %arg3[%c0_1, %c128] : memref<1x256xf32, #tpu.memory_space<vmem>>, vector<1x128xf32>
    %4 = vector.shape_cast %3 : vector<1x128xf32> to vector<1x128xf32>
    %5 = vector.broadcast %4 : vector<1x128xf32> to vector<8x128xf32>
    %cst = arith.constant 0.000000e+00 : bf16
    %6 = vector.broadcast %cst : bf16 to vector<8x128xbf16>
    %c0_2 = arith.constant 0 : index
    %c0_3 = arith.constant 0 : index
    %7 = vector.load %arg0[%c0_2, %c0_3] : memref<64x128xf32, #tpu.memory_space<vmem>>, vector<64x128xf32>
    %8 = arith.truncf %7 : vector<64x128xf32> to vector<64x128xbf16>
    %c0_4 = arith.constant 0 : index
    %c0_5 = arith.constant 0 : index
    %9 = vector.load %arg1[%c0_4, %c0_5] : memref<128x128xbf16, #tpu.memory_space<vmem>>, vector<128x128xbf16>
    %cst_6 = arith.constant dense<0.000000e+00> : vector<64x128xf32>
    %10 = tpu.matmul %8, %9, %cst_6 {dimension_numbers = #tpu.dot_dimension_numbers<[1], [0], [0], [1], [0, 0, 1, 1], [], []>} : vector<64x128xbf16>, vector<128x128xbf16>, vector<64x128xf32> -> vector<64x128xf32>
    %c0_7 = arith.constant 0 : index
    %c0_8 = arith.constant 0 : index
    %11 = vector.load %arg10[%c0_7, %c0_8] : memref<64x128xf32, #tpu.memory_space<vmem>>, vector<64x128xf32>
    tpu.vector_store %arg10[%c0_7, %c0_8], %10 {strides = array<i32>} : memref<64x128xf32, #tpu.memory_space<vmem>>, vector<64x128xf32>,
    %12 = tpu.concatenate %6, %6 in 1 : vector<8x128xbf16>, vector<8x128xbf16> -> vector<8x256xbf16>
    %c0_9 = arith.constant 0 : index
    %c0_10 = arith.constant 0 : index
    %13 = vector.load %arg2[%c0_9, %c0_10] : memref<256x256xbf16, #tpu.memory_space<vmem>>, vector<256x256xbf16>
    %cst_11 = arith.constant dense<0.000000e+00> : vector<8x256xf32>
    %14 = tpu.matmul %12, %13, %cst_11 {dimension_numbers = #tpu.dot_dimension_numbers<[1], [0], [0], [1], [0, 0, 1, 1], [], []>} : vector<8x256xbf16>, vector<256x256xbf16>, vector<8x256xf32> -> vector<8x256xf32>
    %15 = vector.extract_strided_slice %14 {offsets = [0, 0], sizes = [8, 128], strides = [1, 1]} : vector<8x256xf32> to vector<8x128xf32>
    %16 = arith.addf %15, %2 : vector<8x128xf32>
    %c0_12 = arith.constant 0 : index
    %c0_13 = arith.constant 0 : index
    %17 = vector.load %arg10[%c0_12, %c0_13] : memref<64x128xf32, #tpu.memory_space<vmem>>, vector<8x128xf32>
    %18 = arith.addf %16, %17 : vector<8x128xf32>
    %19 = math.tanh %18 : vector<8x128xf32>
    %20 = arith.truncf %19 : vector<8x128xf32> to vector<8x128xbf16>
    %21 = tpu.concatenate %20, %6 in 1 : vector<8x128xbf16>, vector<8x128xbf16> -> vector<8x256xbf16>
    %c0_14 = arith.constant 0 : index
    %c0_15 = arith.constant 0 : index
    %22 = vector.load %arg2[%c0_14, %c0_15] : memref<256x256xbf16, #tpu.memory_space<vmem>>, vector<256x256xbf16>
    %cst_16 = arith.constant dense<0.000000e+00> : vector<8x256xf32>
    %23 = tpu.matmul %21, %22, %cst_16 {dimension_numbers = #tpu.dot_dimension_numbers<[1], [0], [0], [1], [0, 0, 1, 1], [], []>} : vector<8x256xbf16>, vector<256x256xbf16>, vector<8x256xf32> -> vector<8x256xf32>
    %24 = vector.extract_strided_slice %23 {offsets = [0, 0], sizes = [8, 128], strides = [1, 1]} : vector<8x256xf32> to vector<8x128xf32>
    %25 = arith.addf %24, %2 : vector<8x128xf32>
    %c8 = arith.constant 8 : index
    %c0_17 = arith.constant 0 : index
    %26 = vector.load %arg10[%c8, %c0_17] : memref<64x128xf32, #tpu.memory_space<vmem>>, vector<8x128xf32>
    %27 = arith.addf %25, %26 : vector<8x128xf32>
    %28 = math.tanh %27 : vector<8x128xf32>
    %29 = arith.truncf %28 : vector<8x128xf32> to vector<8x128xbf16>
    %30 = vector.extract_strided_slice %23 {offsets = [0, 128], sizes = [8, 128], strides = [1, 1]} : vector<8x256xf32> to vector<8x128xf32>
    %31 = arith.addf %30, %5 : vector<8x128xf32>
    %32 = math.tanh %31 : vector<8x128xf32>
    %33 = arith.truncf %32 : vector<8x128xf32> to vector<8x128xbf16>
    %c0_18 = arith.constant 0 : index
    %c0_19 = arith.constant 0 : index
    %34 = vector.load %arg9[%c0_18, %c0_19] : memref<64x128xf32, #tpu.memory_space<vmem>>, vector<8x128xf32>
    tpu.vector_store %arg9[%c0_18, %c0_19], %32 {strides = array<i32>} : memref<64x128xf32, #tpu.memory_space<vmem>>, vector<8x128xf32>,
    %35 = tpu.concatenate %29, %33 in 1 : vector<8x128xbf16>, vector<8x128xbf16> -> vector<8x256xbf16>
    %c0_20 = arith.constant 0 : index
    %c0_21 = arith.constant 0 : index
    %36 = vector.load %arg2[%c0_20, %c0_21] : memref<256x256xbf16, #tpu.memory_space<vmem>>, vector<256x256xbf16>
    %cst_22 = arith.constant dense<0.000000e+00> : vector<8x256xf32>
    %37 = tpu.matmul %35, %36, %cst_22 {dimension_numbers = #tpu.dot_dimension_numbers<[1], [0], [0], [1], [0, 0, 1, 1], [], []>} : vector<8x256xbf16>, vector<256x256xbf16>, vector<8x256xf32> -> vector<8x256xf32>
    %38 = vector.extract_strided_slice %37 {offsets = [0, 0], sizes = [8, 128], strides = [1, 1]} : vector<8x256xf32> to vector<8x128xf32>
    %39 = arith.addf %38, %2 : vector<8x128xf32>
    %c16 = arith.constant 16 : index
    %c0_23 = arith.constant 0 : index
    %40 = vector.load %arg10[%c16, %c0_23] : memref<64x128xf32, #tpu.memory_space<vmem>>, vector<8x128xf32>
    %41 = arith.addf %39, %40 : vector<8x128xf32>
    %42 = math.tanh %41 : vector<8x128xf32>
    %43 = arith.truncf %42 : vector<8x128xf32> to vector<8x128xbf16>
    %44 = vector.extract_strided_slice %37 {offsets = [0, 128], sizes = [8, 128], strides = [1, 1]} : vector<8x256xf32> to vector<8x128xf32>
    %45 = arith.addf %44, %5 : vector<8x128xf32>
    %46 = math.tanh %45 : vector<8x128xf32>
    %47 = arith.truncf %46 : vector<8x128xf32> to vector<8x128xbf16>
    %c8_24 = arith.constant 8 : index
    %c0_25 = arith.constant 0 : index
    %48 = vector.load %arg9[%c8_24, %c0_25] : memref<64x128xf32, #tpu.memory_space<vmem>>, vector<8x128xf32>
    tpu.vector_store %arg9[%c8_24, %c0_25], %46 {strides = array<i32>} : memref<64x128xf32, #tpu.memory_space<vmem>>, vector<8x128xf32>,
    %49 = tpu.concatenate %43, %47 in 1 : vector<8x128xbf16>, vector<8x128xbf16> -> vector<8x256xbf16>
    %c0_26 = arith.constant 0 : index
    %c0_27 = arith.constant 0 : index
    %50 = vector.load %arg2[%c0_26, %c0_27] : memref<256x256xbf16, #tpu.memory_space<vmem>>, vector<256x256xbf16>
    %cst_28 = arith.constant dense<0.000000e+00> : vector<8x256xf32>
    %51 = tpu.matmul %49, %50, %cst_28 {dimension_numbers = #tpu.dot_dimension_numbers<[1], [0], [0], [1], [0, 0, 1, 1], [], []>} : vector<8x256xbf16>, vector<256x256xbf16>, vector<8x256xf32> -> vector<8x256xf32>
    %52 = vector.extract_strided_slice %51 {offsets = [0, 0], sizes = [8, 128], strides = [1, 1]} : vector<8x256xf32> to vector<8x128xf32>
    %53 = arith.addf %52, %2 : vector<8x128xf32>
    %c24 = arith.constant 24 : index
    %c0_29 = arith.constant 0 : index
    %54 = vector.load %arg10[%c24, %c0_29] : memref<64x128xf32, #tpu.memory_space<vmem>>, vector<8x128xf32>
    %55 = arith.addf %53, %54 : vector<8x128xf32>
    %56 = math.tanh %55 : vector<8x128xf32>
    %57 = arith.truncf %56 : vector<8x128xf32> to vector<8x128xbf16>
    %58 = vector.extract_strided_slice %51 {offsets = [0, 128], sizes = [8, 128], strides = [1, 1]} : vector<8x256xf32> to vector<8x128xf32>
    %59 = arith.addf %58, %5 : vector<8x128xf32>
    %60 = math.tanh %59 : vector<8x128xf32>
    %61 = arith.truncf %60 : vector<8x128xf32> to vector<8x128xbf16>
    %c16_30 = arith.constant 16 : index
    %c0_31 = arith.constant 0 : index
    %62 = vector.load %arg9[%c16_30, %c0_31] : memref<64x128xf32, #tpu.memory_space<vmem>>, vector<8x128xf32>
    tpu.vector_store %arg9[%c16_30, %c0_31], %60 {strides = array<i32>} : memref<64x128xf32, #tpu.memory_space<vmem>>, vector<8x128xf32>,
    %63 = tpu.concatenate %57, %61 in 1 : vector<8x128xbf16>, vector<8x128xbf16> -> vector<8x256xbf16>
    %c0_32 = arith.constant 0 : index
    %c0_33 = arith.constant 0 : index
    %64 = vector.load %arg2[%c0_32, %c0_33] : memref<256x256xbf16, #tpu.memory_space<vmem>>, vector<256x256xbf16>
    %cst_34 = arith.constant dense<0.000000e+00> : vector<8x256xf32>
    %65 = tpu.matmul %63, %64, %cst_34 {dimension_numbers = #tpu.dot_dimension_numbers<[1], [0], [0], [1], [0, 0, 1, 1], [], []>} : vector<8x256xbf16>, vector<256x256xbf16>, vector<8x256xf32> -> vector<8x256xf32>
    %66 = vector.extract_strided_slice %65 {offsets = [0, 0], sizes = [8, 128], strides = [1, 1]} : vector<8x256xf32> to vector<8x128xf32>
    %67 = arith.addf %66, %2 : vector<8x128xf32>
    %c32 = arith.constant 32 : index
    %c0_35 = arith.constant 0 : index
    %68 = vector.load %arg10[%c32, %c0_35] : memref<64x128xf32, #tpu.memory_space<vmem>>, vector<8x128xf32>
    %69 = arith.addf %67, %68 : vector<8x128xf32>
    %70 = math.tanh %69 : vector<8x128xf32>
    %71 = arith.truncf %70 : vector<8x128xf32> to vector<8x128xbf16>
    %72 = vector.extract_strided_slice %65 {offsets = [0, 128], sizes = [8, 128], strides = [1, 1]} : vector<8x256xf32> to vector<8x128xf32>
    %73 = arith.addf %72, %5 : vector<8x128xf32>
    %74 = math.tanh %73 : vector<8x128xf32>
    %75 = arith.truncf %74 : vector<8x128xf32> to vector<8x128xbf16>
    %c24_36 = arith.constant 24 : index
    %c0_37 = arith.constant 0 : index
    %76 = vector.load %arg9[%c24_36, %c0_37] : memref<64x128xf32, #tpu.memory_space<vmem>>, vector<8x128xf32>
    tpu.vector_store %arg9[%c24_36, %c0_37], %74 {strides = array<i32>} : memref<64x128xf32, #tpu.memory_space<vmem>>, vector<8x128xf32>,
    %77 = tpu.concatenate %71, %75 in 1 : vector<8x128xbf16>, vector<8x128xbf16> -> vector<8x256xbf16>
    %c0_38 = arith.constant 0 : index
    %c0_39 = arith.constant 0 : index
    %78 = vector.load %arg2[%c0_38, %c0_39] : memref<256x256xbf16, #tpu.memory_space<vmem>>, vector<256x256xbf16>
    %cst_40 = arith.constant dense<0.000000e+00> : vector<8x256xf32>
    %79 = tpu.matmul %77, %78, %cst_40 {dimension_numbers = #tpu.dot_dimension_numbers<[1], [0], [0], [1], [0, 0, 1, 1], [], []>} : vector<8x256xbf16>, vector<256x256xbf16>, vector<8x256xf32> -> vector<8x256xf32>
    %80 = vector.extract_strided_slice %79 {offsets = [0, 0], sizes = [8, 128], strides = [1, 1]} : vector<8x256xf32> to vector<8x128xf32>
    %81 = arith.addf %80, %2 : vector<8x128xf32>
    %c40 = arith.constant 40 : index
    %c0_41 = arith.constant 0 : index
    %82 = vector.load %arg10[%c40, %c0_41] : memref<64x128xf32, #tpu.memory_space<vmem>>, vector<8x128xf32>
    %83 = arith.addf %81, %82 : vector<8x128xf32>
    %84 = math.tanh %83 : vector<8x128xf32>
    %85 = arith.truncf %84 : vector<8x128xf32> to vector<8x128xbf16>
    %86 = vector.extract_strided_slice %79 {offsets = [0, 128], sizes = [8, 128], strides = [1, 1]} : vector<8x256xf32> to vector<8x128xf32>
    %87 = arith.addf %86, %5 : vector<8x128xf32>
    %88 = math.tanh %87 : vector<8x128xf32>
    %89 = arith.truncf %88 : vector<8x128xf32> to vector<8x128xbf16>
    %c32_42 = arith.constant 32 : index
    %c0_43 = arith.constant 0 : index
    %90 = vector.load %arg9[%c32_42, %c0_43] : memref<64x128xf32, #tpu.memory_space<vmem>>, vector<8x128xf32>
    tpu.vector_store %arg9[%c32_42, %c0_43], %88 {strides = array<i32>} : memref<64x128xf32, #tpu.memory_space<vmem>>, vector<8x128xf32>,
    %91 = tpu.concatenate %85, %89 in 1 : vector<8x128xbf16>, vector<8x128xbf16> -> vector<8x256xbf16>
    %c0_44 = arith.constant 0 : index
    %c0_45 = arith.constant 0 : index
    %92 = vector.load %arg2[%c0_44, %c0_45] : memref<256x256xbf16, #tpu.memory_space<vmem>>, vector<256x256xbf16>
    %cst_46 = arith.constant dense<0.000000e+00> : vector<8x256xf32>
    %93 = tpu.matmul %91, %92, %cst_46 {dimension_numbers = #tpu.dot_dimension_numbers<[1], [0], [0], [1], [0, 0, 1, 1], [], []>} : vector<8x256xbf16>, vector<256x256xbf16>, vector<8x256xf32> -> vector<8x256xf32>
    %94 = vector.extract_strided_slice %93 {offsets = [0, 0], sizes = [8, 128], strides = [1, 1]} : vector<8x256xf32> to vector<8x128xf32>
    %95 = arith.addf %94, %2 : vector<8x128xf32>
    %c48 = arith.constant 48 : index
    %c0_47 = arith.constant 0 : index
    %96 = vector.load %arg10[%c48, %c0_47] : memref<64x128xf32, #tpu.memory_space<vmem>>, vector<8x128xf32>
    %97 = arith.addf %95, %96 : vector<8x128xf32>
    %98 = math.tanh %97 : vector<8x128xf32>
    %99 = arith.truncf %98 : vector<8x128xf32> to vector<8x128xbf16>
    %100 = vector.extract_strided_slice %93 {offsets = [0, 128], sizes = [8, 128], strides = [1, 1]} : vector<8x256xf32> to vector<8x128xf32>
    %101 = arith.addf %100, %5 : vector<8x128xf32>
    %102 = math.tanh %101 : vector<8x128xf32>
    %103 = arith.truncf %102 : vector<8x128xf32> to vector<8x128xbf16>
    %c40_48 = arith.constant 40 : index
    %c0_49 = arith.constant 0 : index
    %104 = vector.load %arg9[%c40_48, %c0_49] : memref<64x128xf32, #tpu.memory_space<vmem>>, vector<8x128xf32>
    tpu.vector_store %arg9[%c40_48, %c0_49], %102 {strides = array<i32>} : memref<64x128xf32, #tpu.memory_space<vmem>>, vector<8x128xf32>,
    %105 = tpu.concatenate %99, %103 in 1 : vector<8x128xbf16>, vector<8x128xbf16> -> vector<8x256xbf16>
    %c0_50 = arith.constant 0 : index
    %c0_51 = arith.constant 0 : index
    %106 = vector.load %arg2[%c0_50, %c0_51] : memref<256x256xbf16, #tpu.memory_space<vmem>>, vector<256x256xbf16>
    %cst_52 = arith.constant dense<0.000000e+00> : vector<8x256xf32>
    %107 = tpu.matmul %105, %106, %cst_52 {dimension_numbers = #tpu.dot_dimension_numbers<[1], [0], [0], [1], [0, 0, 1, 1], [], []>} : vector<8x256xbf16>, vector<256x256xbf16>, vector<8x256xf32> -> vector<8x256xf32>
    %108 = vector.extract_strided_slice %107 {offsets = [0, 0], sizes = [8, 128], strides = [1, 1]} : vector<8x256xf32> to vector<8x128xf32>
    %109 = arith.addf %108, %2 : vector<8x128xf32>
    %c56 = arith.constant 56 : index
    %c0_53 = arith.constant 0 : index
    %110 = vector.load %arg10[%c56, %c0_53] : memref<64x128xf32, #tpu.memory_space<vmem>>, vector<8x128xf32>
    %111 = arith.addf %109, %110 : vector<8x128xf32>
    %112 = math.tanh %111 : vector<8x128xf32>
    %113 = arith.truncf %112 : vector<8x128xf32> to vector<8x128xbf16>
    %114 = vector.extract_strided_slice %107 {offsets = [0, 128], sizes = [8, 128], strides = [1, 1]} : vector<8x256xf32> to vector<8x128xf32>
    %115 = arith.addf %114, %5 : vector<8x128xf32>
    %116 = math.tanh %115 : vector<8x128xf32>
    %117 = arith.truncf %116 : vector<8x128xf32> to vector<8x128xbf16>
    %c48_54 = arith.constant 48 : index
    %c0_55 = arith.constant 0 : index
    %118 = vector.load %arg9[%c48_54, %c0_55] : memref<64x128xf32, #tpu.memory_space<vmem>>, vector<8x128xf32>
    tpu.vector_store %arg9[%c48_54, %c0_55], %116 {strides = array<i32>} : memref<64x128xf32, #tpu.memory_space<vmem>>, vector<8x128xf32>,
    %119 = tpu.concatenate %113, %117 in 1 : vector<8x128xbf16>, vector<8x128xbf16> -> vector<8x256xbf16>
    %c0_56 = arith.constant 0 : index
    %c0_57 = arith.constant 0 : index
    %120 = vector.load %arg2[%c0_56, %c0_57] : memref<256x256xbf16, #tpu.memory_space<vmem>>, vector<256x256xbf16>
    %cst_58 = arith.constant dense<0.000000e+00> : vector<8x256xf32>
    %121 = tpu.matmul %119, %120, %cst_58 {dimension_numbers = #tpu.dot_dimension_numbers<[1], [0], [0], [1], [0, 0, 1, 1], [], []>} : vector<8x256xbf16>, vector<256x256xbf16>, vector<8x256xf32> -> vector<8x256xf32>
    %122 = vector.extract_strided_slice %121 {offsets = [0, 128], sizes = [8, 128], strides = [1, 1]} : vector<8x256xf32> to vector<8x128xf32>
    %123 = arith.addf %122, %5 : vector<8x128xf32>
    %124 = math.tanh %123 : vector<8x128xf32>
    %125 = arith.truncf %124 : vector<8x128xf32> to vector<8x128xbf16>
    %c56_59 = arith.constant 56 : index
    %c0_60 = arith.constant 0 : index
    %126 = vector.load %arg9[%c56_59, %c0_60] : memref<64x128xf32, #tpu.memory_space<vmem>>, vector<8x128xf32>
    tpu.vector_store %arg9[%c56_59, %c0_60], %124 {strides = array<i32>} : memref<64x128xf32, #tpu.memory_space<vmem>>, vector<8x128xf32>,
    %c0_61 = arith.constant 0 : index
    %c0_62 = arith.constant 0 : index
    %127 = vector.load %arg9[%c0_61, %c0_62] : memref<64x128xf32, #tpu.memory_space<vmem>>, vector<64x128xf32>
    %128 = arith.truncf %127 : vector<64x128xf32> to vector<64x128xbf16>
    %c0_63 = arith.constant 0 : index
    %c0_64 = arith.constant 0 : index
    %129 = vector.load %arg1[%c0_63, %c0_64] : memref<128x128xbf16, #tpu.memory_space<vmem>>, vector<128x128xbf16>
    %cst_65 = arith.constant dense<0.000000e+00> : vector<64x128xf32>
    %130 = tpu.matmul %128, %129, %cst_65 {dimension_numbers = #tpu.dot_dimension_numbers<[1], [0], [0], [1], [0, 0, 1, 1], [], []>} : vector<64x128xbf16>, vector<128x128xbf16>, vector<64x128xf32> -> vector<64x128xf32>
    %c0_66 = arith.constant 0 : index
    %c0_67 = arith.constant 0 : index
    %131 = vector.load %arg10[%c0_66, %c0_67] : memref<64x128xf32, #tpu.memory_space<vmem>>, vector<64x128xf32>
    tpu.vector_store %arg10[%c0_66, %c0_67], %130 {strides = array<i32>} : memref<64x128xf32, #tpu.memory_space<vmem>>, vector<64x128xf32>,
    %132 = tpu.concatenate %113, %125 in 1 : vector<8x128xbf16>, vector<8x128xbf16> -> vector<8x256xbf16>
    %c0_68 = arith.constant 0 : index
    %c0_69 = arith.constant 0 : index
    %133 = vector.load %arg2[%c0_68, %c0_69] : memref<256x256xbf16, #tpu.memory_space<vmem>>, vector<256x256xbf16>
    %cst_70 = arith.constant dense<0.000000e+00> : vector<8x256xf32>
    %134 = tpu.matmul %132, %133, %cst_70 {dimension_numbers = #tpu.dot_dimension_numbers<[1], [0], [0], [1], [0, 0, 1, 1], [], []>} : vector<8x256xbf16>, vector<256x256xbf16>, vector<8x256xf32> -> vector<8x256xf32>
    %135 = vector.extract_strided_slice %134 {offsets = [0, 0], sizes = [8, 128], strides = [1, 1]} : vector<8x256xf32> to vector<8x128xf32>
    %136 = arith.addf %135, %2 : vector<8x128xf32>
    %c0_71 = arith.constant 0 : index
    %c0_72 = arith.constant 0 : index
    %137 = vector.load %arg10[%c0_71, %c0_72] : memref<64x128xf32, #tpu.memory_space<vmem>>, vector<8x128xf32>
    %138 = arith.addf %136, %137 : vector<8x128xf32>
    %139 = math.tanh %138 : vector<8x128xf32>
    %140 = arith.truncf %139 : vector<8x128xf32> to vector<8x128xbf16>
    %141 = tpu.concatenate %140, %125 in 1 : vector<8x128xbf16>, vector<8x128xbf16> -> vector<8x256xbf16>
    %c0_73 = arith.constant 0 : index
    %c0_74 = arith.constant 0 : index
    %142 = vector.load %arg2[%c0_73, %c0_74] : memref<256x256xbf16, #tpu.memory_space<vmem>>, vector<256x256xbf16>
    %cst_75 = arith.constant dense<0.000000e+00> : vector<8x256xf32>
    %143 = tpu.matmul %141, %142, %cst_75 {dimension_numbers = #tpu.dot_dimension_numbers<[1], [0], [0], [1], [0, 0, 1, 1], [], []>} : vector<8x256xbf16>, vector<256x256xbf16>, vector<8x256xf32> -> vector<8x256xf32>
    %144 = vector.extract_strided_slice %143 {offsets = [0, 0], sizes = [8, 128], strides = [1, 1]} : vector<8x256xf32> to vector<8x128xf32>
    %145 = arith.addf %144, %2 : vector<8x128xf32>
    %c8_76 = arith.constant 8 : index
    %c0_77 = arith.constant 0 : index
    %146 = vector.load %arg10[%c8_76, %c0_77] : memref<64x128xf32, #tpu.memory_space<vmem>>, vector<8x128xf32>
    %147 = arith.addf %145, %146 : vector<8x128xf32>
    %148 = math.tanh %147 : vector<8x128xf32>
    %149 = arith.truncf %148 : vector<8x128xf32> to vector<8x128xbf16>
    %150 = vector.extract_strided_slice %143 {offsets = [0, 128], sizes = [8, 128], strides = [1, 1]} : vector<8x256xf32> to vector<8x128xf32>
    %151 = arith.addf %150, %5 : vector<8x128xf32>
    %152 = math.tanh %151 : vector<8x128xf32>
    %153 = arith.truncf %152 : vector<8x128xf32> to vector<8x128xbf16>
    %154 = tpu.concatenate %149, %153 in 1 : vector<8x128xbf16>, vector<8x128xbf16> -> vector<8x256xbf16>
    %c0_78 = arith.constant 0 : index
    %c0_79 = arith.constant 0 : index
    %155 = vector.load %arg2[%c0_78, %c0_79] : memref<256x256xbf16, #tpu.memory_space<vmem>>, vector<256x256xbf16>
    %cst_80 = arith.constant dense<0.000000e+00> : vector<8x256xf32>
    %156 = tpu.matmul %154, %155, %cst_80 {dimension_numbers = #tpu.dot_dimension_numbers<[1], [0], [0], [1], [0, 0, 1, 1], [], []>} : vector<8x256xbf16>, vector<256x256xbf16>, vector<8x256xf32> -> vector<8x256xf32>
    %157 = vector.extract_strided_slice %156 {offsets = [0, 0], sizes = [8, 128], strides = [1, 1]} : vector<8x256xf32> to vector<8x128xf32>
    %158 = arith.addf %157, %2 : vector<8x128xf32>
    %c16_81 = arith.constant 16 : index
    %c0_82 = arith.constant 0 : index
    %159 = vector.load %arg10[%c16_81, %c0_82] : memref<64x128xf32, #tpu.memory_space<vmem>>, vector<8x128xf32>
    %160 = arith.addf %158, %159 : vector<8x128xf32>
    %161 = math.tanh %160 : vector<8x128xf32>
    %162 = arith.truncf %161 : vector<8x128xf32> to vector<8x128xbf16>
    %163 = vector.extract_strided_slice %156 {offsets = [0, 128], sizes = [8, 128], strides = [1, 1]} : vector<8x256xf32> to vector<8x128xf32>
    %164 = arith.addf %163, %5 : vector<8x128xf32>
    %165 = math.tanh %164 : vector<8x128xf32>
    %166 = arith.truncf %165 : vector<8x128xf32> to vector<8x128xbf16>
    %167 = tpu.concatenate %162, %166 in 1 : vector<8x128xbf16>, vector<8x128xbf16> -> vector<8x256xbf16>
    %c0_83 = arith.constant 0 : index
    %c0_84 = arith.constant 0 : index
    %168 = vector.load %arg2[%c0_83, %c0_84] : memref<256x256xbf16, #tpu.memory_space<vmem>>, vector<256x256xbf16>
    %cst_85 = arith.constant dense<0.000000e+00> : vector<8x256xf32>
    %169 = tpu.matmul %167, %168, %cst_85 {dimension_numbers = #tpu.dot_dimension_numbers<[1], [0], [0], [1], [0, 0, 1, 1], [], []>} : vector<8x256xbf16>, vector<256x256xbf16>, vector<8x256xf32> -> vector<8x256xf32>
    %170 = vector.extract_strided_slice %169 {offsets = [0, 0], sizes = [8, 128], strides = [1, 1]} : vector<8x256xf32> to vector<8x128xf32>
    %171 = arith.addf %170, %2 : vector<8x128xf32>
    %c24_86 = arith.constant 24 : index
    %c0_87 = arith.constant 0 : index
    %172 = vector.load %arg10[%c24_86, %c0_87] : memref<64x128xf32, #tpu.memory_space<vmem>>, vector<8x128xf32>
    %173 = arith.addf %171, %172 : vector<8x128xf32>
    %174 = math.tanh %173 : vector<8x128xf32>
    %175 = arith.truncf %174 : vector<8x128xf32> to vector<8x128xbf16>
    %176 = vector.extract_strided_slice %169 {offsets = [0, 128], sizes = [8, 128], strides = [1, 1]} : vector<8x256xf32> to vector<8x128xf32>
    %177 = arith.addf %176, %5 : vector<8x128xf32>
    %178 = math.tanh %177 : vector<8x128xf32>
    %179 = arith.truncf %178 : vector<8x128xf32> to vector<8x128xbf16>
    %180 = tpu.concatenate %175, %179 in 1 : vector<8x128xbf16>, vector<8x128xbf16> -> vector<8x256xbf16>
    %c0_88 = arith.constant 0 : index
    %c0_89 = arith.constant 0 : index
    %181 = vector.load %arg2[%c0_88, %c0_89] : memref<256x256xbf16, #tpu.memory_space<vmem>>, vector<256x256xbf16>
    %cst_90 = arith.constant dense<0.000000e+00> : vector<8x256xf32>
    %182 = tpu.matmul %180, %181, %cst_90 {dimension_numbers = #tpu.dot_dimension_numbers<[1], [0], [0], [1], [0, 0, 1, 1], [], []>} : vector<8x256xbf16>, vector<256x256xbf16>, vector<8x256xf32> -> vector<8x256xf32>
    %183 = vector.extract_strided_slice %182 {offsets = [0, 0], sizes = [8, 128], strides = [1, 1]} : vector<8x256xf32> to vector<8x128xf32>
    %184 = arith.addf %183, %2 : vector<8x128xf32>
    %c32_91 = arith.constant 32 : index
    %c0_92 = arith.constant 0 : index
    %185 = vector.load %arg10[%c32_91, %c0_92] : memref<64x128xf32, #tpu.memory_space<vmem>>, vector<8x128xf32>
    %186 = arith.addf %184, %185 : vector<8x128xf32>
    %187 = math.tanh %186 : vector<8x128xf32>
    %188 = arith.truncf %187 : vector<8x128xf32> to vector<8x128xbf16>
    %189 = vector.extract_strided_slice %182 {offsets = [0, 128], sizes = [8, 128], strides = [1, 1]} : vector<8x256xf32> to vector<8x128xf32>
    %190 = arith.addf %189, %5 : vector<8x128xf32>
    %191 = math.tanh %190 : vector<8x128xf32>
    %192 = arith.truncf %191 : vector<8x128xf32> to vector<8x128xbf16>
    %193 = tpu.concatenate %188, %192 in 1 : vector<8x128xbf16>, vector<8x128xbf16> -> vector<8x256xbf16>
    %c0_93 = arith.constant 0 : index
    %c0_94 = arith.constant 0 : index
    %194 = vector.load %arg2[%c0_93, %c0_94] : memref<256x256xbf16, #tpu.memory_space<vmem>>, vector<256x256xbf16>
    %cst_95 = arith.constant dense<0.000000e+00> : vector<8x256xf32>
    %195 = tpu.matmul %193, %194, %cst_95 {dimension_numbers = #tpu.dot_dimension_numbers<[1], [0], [0], [1], [0, 0, 1, 1], [], []>} : vector<8x256xbf16>, vector<256x256xbf16>, vector<8x256xf32> -> vector<8x256xf32>
    %196 = vector.extract_strided_slice %195 {offsets = [0, 0], sizes = [8, 128], strides = [1, 1]} : vector<8x256xf32> to vector<8x128xf32>
    %197 = arith.addf %196, %2 : vector<8x128xf32>
    %c40_96 = arith.constant 40 : index
    %c0_97 = arith.constant 0 : index
    %198 = vector.load %arg10[%c40_96, %c0_97] : memref<64x128xf32, #tpu.memory_space<vmem>>, vector<8x128xf32>
    %199 = arith.addf %197, %198 : vector<8x128xf32>
    %200 = math.tanh %199 : vector<8x128xf32>
    %201 = arith.truncf %200 : vector<8x128xf32> to vector<8x128xbf16>
    %202 = vector.extract_strided_slice %195 {offsets = [0, 128], sizes = [8, 128], strides = [1, 1]} : vector<8x256xf32> to vector<8x128xf32>
    %203 = arith.addf %202, %5 : vector<8x128xf32>
    %204 = math.tanh %203 : vector<8x128xf32>
    %205 = arith.truncf %204 : vector<8x128xf32> to vector<8x128xbf16>
    %206 = tpu.concatenate %201, %205 in 1 : vector<8x128xbf16>, vector<8x128xbf16> -> vector<8x256xbf16>
    %c0_98 = arith.constant 0 : index
    %c0_99 = arith.constant 0 : index
    %207 = vector.load %arg2[%c0_98, %c0_99] : memref<256x256xbf16, #tpu.memory_space<vmem>>, vector<256x256xbf16>
    %cst_100 = arith.constant dense<0.000000e+00> : vector<8x256xf32>
    %208 = tpu.matmul %206, %207, %cst_100 {dimension_numbers = #tpu.dot_dimension_numbers<[1], [0], [0], [1], [0, 0, 1, 1], [], []>} : vector<8x256xbf16>, vector<256x256xbf16>, vector<8x256xf32> -> vector<8x256xf32>
    %209 = vector.extract_strided_slice %208 {offsets = [0, 0], sizes = [8, 128], strides = [1, 1]} : vector<8x256xf32> to vector<8x128xf32>
    %210 = arith.addf %209, %2 : vector<8x128xf32>
    %c48_101 = arith.constant 48 : index
    %c0_102 = arith.constant 0 : index
    %211 = vector.load %arg10[%c48_101, %c0_102] : memref<64x128xf32, #tpu.memory_space<vmem>>, vector<8x128xf32>
    %212 = arith.addf %210, %211 : vector<8x128xf32>
    %213 = math.tanh %212 : vector<8x128xf32>
    %214 = arith.truncf %213 : vector<8x128xf32> to vector<8x128xbf16>
    %215 = vector.extract_strided_slice %208 {offsets = [0, 128], sizes = [8, 128], strides = [1, 1]} : vector<8x256xf32> to vector<8x128xf32>
    %216 = arith.addf %215, %5 : vector<8x128xf32>
    %217 = math.tanh %216 : vector<8x128xf32>
    %218 = arith.truncf %217 : vector<8x128xf32> to vector<8x128xbf16>
    %219 = tpu.concatenate %214, %218 in 1 : vector<8x128xbf16>, vector<8x128xbf16> -> vector<8x256xbf16>
    %c0_103 = arith.constant 0 : index
    %c0_104 = arith.constant 0 : index
    %220 = vector.load %arg2[%c0_103, %c0_104] : memref<256x256xbf16, #tpu.memory_space<vmem>>, vector<256x256xbf16>
    %cst_105 = arith.constant dense<0.000000e+00> : vector<8x256xf32>
    %221 = tpu.matmul %219, %220, %cst_105 {dimension_numbers = #tpu.dot_dimension_numbers<[1], [0], [0], [1], [0, 0, 1, 1], [], []>} : vector<8x256xbf16>, vector<256x256xbf16>, vector<8x256xf32> -> vector<8x256xf32>
    %222 = vector.extract_strided_slice %221 {offsets = [0, 0], sizes = [8, 128], strides = [1, 1]} : vector<8x256xf32> to vector<8x128xf32>
    %223 = arith.addf %222, %2 : vector<8x128xf32>
    %c56_106 = arith.constant 56 : index
    %c0_107 = arith.constant 0 : index
    %224 = vector.load %arg10[%c56_106, %c0_107] : memref<64x128xf32, #tpu.memory_space<vmem>>, vector<8x128xf32>
    %225 = arith.addf %223, %224 : vector<8x128xf32>
    %226 = math.tanh %225 : vector<8x128xf32>
    %227 = arith.truncf %226 : vector<8x128xf32> to vector<8x128xbf16>
    %228 = vector.extract_strided_slice %221 {offsets = [0, 128], sizes = [8, 128], strides = [1, 1]} : vector<8x256xf32> to vector<8x128xf32>
    %229 = arith.addf %228, %5 : vector<8x128xf32>
    %230 = math.tanh %229 : vector<8x128xf32>
    %231 = arith.truncf %230 : vector<8x128xf32> to vector<8x128xbf16>
    %232 = tpu.concatenate %227, %231 in 1 : vector<8x128xbf16>, vector<8x128xbf16> -> vector<8x256xbf16>
    %c0_108 = arith.constant 0 : index
    %c0_109 = arith.constant 0 : index
    %233 = vector.load %arg2[%c0_108, %c0_109] : memref<256x256xbf16, #tpu.memory_space<vmem>>, vector<256x256xbf16>
    %cst_110 = arith.constant dense<0.000000e+00> : vector<8x256xf32>
    %234 = tpu.matmul %232, %233, %cst_110 {dimension_numbers = #tpu.dot_dimension_numbers<[1], [0], [0], [1], [0, 0, 1, 1], [], []>} : vector<8x256xbf16>, vector<256x256xbf16>, vector<8x256xf32> -> vector<8x256xf32>
    %235 = vector.extract_strided_slice %234 {offsets = [0, 128], sizes = [8, 128], strides = [1, 1]} : vector<8x256xf32> to vector<8x128xf32>
    %236 = arith.addf %235, %5 : vector<8x128xf32>
    %237 = math.tanh %236 : vector<8x128xf32>
    %238 = arith.truncf %237 : vector<8x128xf32> to vector<8x128xbf16>
    %239 = tpu.concatenate %227, %238 in 0 : vector<8x128xbf16>, vector<8x128xbf16> -> vector<16x128xbf16>
    %c0_111 = arith.constant 0 : index
    %c0_112 = arith.constant 0 : index
    %240 = vector.load %arg4[%c0_111, %c0_112] : memref<128x256xbf16, #tpu.memory_space<vmem>>, vector<128x256xbf16>
    %cst_113 = arith.constant dense<0.000000e+00> : vector<16x256xf32>
    %241 = tpu.matmul %239, %240, %cst_113 {dimension_numbers = #tpu.dot_dimension_numbers<[1], [0], [0], [1], [0, 0, 1, 1], [], []>} : vector<16x128xbf16>, vector<128x256xbf16>, vector<16x256xf32> -> vector<16x256xf32>
    %c0_114 = arith.constant 0 : index
    %c0_115 = arith.constant 0 : index
    %242 = vector.load %arg5[%c0_114, %c0_115] : memref<1x256xf32, #tpu.memory_space<vmem>>, vector<1x256xf32>
    %243 = vector.broadcast %242 : vector<1x256xf32> to vector<16x256xf32>
    %244 = arith.addf %241, %243 : vector<16x256xf32>
    %245 = arith.truncf %244 : vector<16x256xf32> to vector<16x256xbf16>
    %c0_116 = arith.constant 0 : index
    %c0_117 = arith.constant 0 : index
    %246 = vector.load %arg6[%c0_116, %c0_117] : memref<256x128xbf16, #tpu.memory_space<vmem>>, vector<256x128xbf16>
    %cst_118 = arith.constant dense<0.000000e+00> : vector<16x128xf32>
    %247 = tpu.matmul %245, %246, %cst_118 {dimension_numbers = #tpu.dot_dimension_numbers<[1], [0], [0], [1], [0, 0, 1, 1], [], []>} : vector<16x256xbf16>, vector<256x128xbf16>, vector<16x128xf32> -> vector<16x128xf32>
    %c0_119 = arith.constant 0 : index
    %c0_120 = arith.constant 0 : index
    %248 = vector.load %arg7[%c0_119, %c0_120] : memref<1x128xf32, #tpu.memory_space<vmem>>, vector<1x128xf32>
    %249 = vector.broadcast %248 : vector<1x128xf32> to vector<16x128xf32>
    %250 = arith.addf %247, %249 : vector<16x128xf32>
    %251 = tpu.concatenate %112, %124 in 0 : vector<8x128xf32>, vector<8x128xf32> -> vector<16x128xf32>
    %252 = arith.addf %251, %250 : vector<16x128xf32>
    %c0_121 = arith.constant 0 : index
    %c0_122 = arith.constant 0 : index
    %253 = vector.load %arg8[%c0_121, %c0_122] : memref<16x128xf32, #tpu.memory_space<vmem>>, vector<16x128xf32>
    tpu.vector_store %arg8[%c0_121, %c0_122], %252 {strides = array<i32>} : memref<16x128xf32, #tpu.memory_space<vmem>>, vector<16x128xf32>,
    return
  }
}

</mosaic_0001>

<bundles_post_ra>
// kernel: forward.1
= control target key start
LH: loop header
LB: loop body
LE: loop exit
PB: predicated region body
PF: predicated region fallthrough
CT: control target
= control target key end

     0   :  { %vm2899_vm0 = vcmask 1043456   ;;  %s7277_s2 = inlined_call_operand.vmem [shape: bf16[256,256], index: 2, kind: input, shape index: {}]   ;;  %s7278_s1 = inlined_call_operand.vmem [shape: bf16[128,128], index: 1, kind: input, shape index: {}]   ;;  %s7279_s0 = inlined_call_operand.vmem [shape: f32[64,128], index: 0, kind: input, shape index: {}]   ;;  %s7280_s3 = inlined_call_operand.vmem [shape: f32[1,256], index: 3, kind: input, shape index: {}]   ;;  %s7281_s4 = inlined_call_operand.vmem [shape: bf16[128,256], index: 4, kind: input, shape index: {}]   ;;  %s7282_s6 = inlined_call_operand.vmem [shape: bf16[256,128], index: 6, kind: input, shape index: {}]   ;;  %s7283_s7 = inlined_call_operand.vmem [shape: f32[1,128], index: 7, kind: input, shape index: {}]   ;;  %s7284_s5 = inlined_call_operand.vmem [shape: f32[1,256], index: 5, kind: input, shape index: {}]   ;;  %s7285_s8 = inlined_call_operand.vmem [shape: f32[16,128], index: 8, kind: output, shape index: {}]  }
   0x1   :  { %v3266_v0 = vld [vmem:[%s7277_s2 + $0x70] sm:$0xf]  ;;  %v4507_v1 = vld [vmem:[%s7277_s2 + $0x74] sm:$0xf0]  ;;  %v3262_v6 = vld [vmem:[%s7277_s2 + $0x60] sm:$0xf] }
   0x2   :  { %v3298_v2 = vld [vmem:[%s7277_s2 + $0xf0] sm:$0xf]  ;;  %v3267_v3 = vor.u32 %v4507_v1, %v3266_v0  ;;  %v4523_v4 = vld [vmem:[%s7277_s2 + $0xf4] sm:$0xf0]  ;;  %v4505_v8 = vld [vmem:[%s7277_s2 + $0x64] sm:$0xf0] }
   0x3   :  { %v4491_v5 = vld [vmem:[%s7278_s1 + $0x38] sm:$0xff]  ;;  %v4940_v7 = vor.u32 %v4523_v4, %v3298_v2  ;;  %v3294_v9 = vld [vmem:[%s7277_s2 + $0xe0] sm:$0xf]  ;;  %v4521_v10 = vld [vmem:[%s7277_s2 + $0xe4] sm:$0xf0]  ;;  %v3263_v11 = vor.u32 %v4505_v8, %v3262_v6  ;;  %v4876_v1 = vmov 0  }
   0x4   :  { %279 = vmatpush.bf16.msra.mxu1 %v3267_v3  ;;  %114 = vmatpush.bf16.msra.mxu0 %v4491_v5  ;;  %v4490_v12 = vld [vmem:[%s7278_s1 + $0x30] sm:$0xff]  ;;  %v4955_v13 = vor.u32 %v4521_v10, %v3294_v9  ;;  %v4503_v15 = vld [vmem:[%s7277_s2 + $0x54] sm:$0xf0]  ;;  %v4489_v19 = vld [vmem:[%s7278_s1 + $0x28] sm:$0xff] }
   0x5   :  { %292 = vmatpush.bf16.msra.mxu2 %v4940_v7  ;;  %v3258_v14 = vld [vmem:[%s7277_s2 + $0x50] sm:$0xf]  ;;  %374 = vmatpush.bf16.msra.mxu3 %v3267_v3  ;;  %v4519_v17 = vld [vmem:[%s7277_s2 + $0xd4] sm:$0xf0]  ;;  %v3254_v21 = vld [vmem:[%s7277_s2 + $0x40] sm:$0xf] }
   0x6   :  { %v3290_v16 = vld [vmem:[%s7277_s2 + $0xd0] sm:$0xf]  ;;  %v3259_v18 = vor.u32 %v4503_v15, %v3258_v14  ;;  %v4501_v22 = vld [vmem:[%s7277_s2 + $0x44] sm:$0xf0]  ;;  %v3286_v23 = vld [vmem:[%s7277_s2 + $0xc0] sm:$0xf] }
   0x7   :  { %v4973_v20 = vor.u32 %v4519_v17, %v3290_v16  ;;  %v4517_v24 = vld [vmem:[%s7277_s2 + $0xc4] sm:$0xf0]  ;;  %v3255_v25 = vor.u32 %v4501_v22, %v3254_v21  ;;  %v4488_v26 = vld [vmem:[%s7278_s1 + $0x20] sm:$0xff]  ;;  %v3250_v28 = vld [vmem:[%s7277_s2 + $0x30] sm:$0xf] }
   0x8   :  { %280 = vmatpush.bf16.msra.mxu1 %v3263_v11  ;;  %115 = vmatpush.bf16.msra.mxu0 %v4490_v12  ;;  %v4991_v27 = vor.u32 %v4517_v24, %v3286_v23  ;;  %v4499_v29 = vld [vmem:[%s7277_s2 + $0x34] sm:$0xf0]  ;;  %v3282_v30 = vld [vmem:[%s7277_s2 + $0xb0] sm:$0xf]  ;;  %v3246_v35 = vld [vmem:[%s7277_s2 + $0x20] sm:$0xf] }
   0x9   :  { %293 = vmatpush.bf16.msra.mxu2 %v4955_v13  ;;  %375 = vmatpush.bf16.msra.mxu3 %v3263_v11  ;;  %v4515_v31 = vld [vmem:[%s7277_s2 + $0xb4] sm:$0xf0]  ;;  %v3251_v32 = vor.u32 %v4499_v29, %v3250_v28  ;;  %v4497_v36 = vld [vmem:[%s7277_s2 + $0x24] sm:$0xf0]  ;;  %v3278_v37 = vld [vmem:[%s7277_s2 + $0xa0] sm:$0xf] }
   0xa   :  { %v4487_v33 = vld [vmem:[%s7278_s1 + $0x18] sm:$0xff]  ;;  %v5009_v34 = vor.u32 %v4515_v31, %v3282_v30  ;;  %v4513_v38 = vld [vmem:[%s7277_s2 + $0xa4] sm:$0xf0]  ;;  %v3247_v39 = vor.u32 %v4497_v36, %v3246_v35  ;;  %v4486_v40 = vld [vmem:[%s7278_s1 + $0x10] sm:$0xff] }
   0xb   :  { %v3279_v41 = vor.u32 %v4513_v38, %v3278_v37  ;;  %v3242_v42 = vld [vmem:[%s7277_s2 + $0x10] sm:$0xf]  ;;  %v4495_v43 = vld [vmem:[%s7277_s2 + $0x14] sm:$0xf0]  ;;  %v4485_v47 = vld [vmem:[%s7278_s1 + $0x8] sm:$0xff] }
   0xc   :  { %281 = vmatpush.bf16.msra.mxu1 %v3259_v18  ;;  %116 = vmatpush.bf16.msra.mxu0 %v4489_v19  ;;  %v3274_v44 = vld [vmem:[%s7277_s2 + $0x90] sm:$0xf]  ;;  %v4511_v45 = vld [vmem:[%s7277_s2 + $0x94] sm:$0xf0]  ;;  %v3243_v46 = vor.u32 %v4495_v43, %v3242_v42  ;;  %v3238_v49 = vld [vmem:[%s7277_s2] sm:$0xf] }
   0xd   :  { %294 = vmatpush.bf16.msra.mxu2 %v4973_v20  ;;  %376 = vmatpush.bf16.msra.mxu3 %v3259_v18  ;;  %v3275_v48 = vor.u32 %v4511_v45, %v3274_v44  ;;  %v4493_v50 = vld [vmem:[%s7277_s2 + $0x4] sm:$0xf0]  ;;  %v3270_v51 = vld [vmem:[%s7277_s2 + $0x80] sm:$0xf]  ;;  %v4506_v53 = vld [vmem:[%s7277_s2 + $0x74] sm:$0xf] }
   0xe   :  { %v4509_v52 = vld [vmem:[%s7277_s2 + $0x84] sm:$0xf0]  ;;  %v3328_v54 = vld [vmem:[%s7277_s2 + $0x78] sm:$0xf0]  ;;  %v3239_v55 = vor.u32 %v4493_v50, %v3238_v49  ;;  %v4484_v56 = vld [vmem:[%s7278_s1] sm:$0xff] }
   0xf   :  { %v38_v57 = vld [vmem:[%s7279_s0] sm:$0xff]  ;;  %v39_v58 = vld [vmem:[%s7279_s0 + $0x8] sm:$0xff]  ;;  %v3271_v59 = vor.u32 %v4509_v52, %v3270_v51  ;;  %v3331_v60 = vor.u32 %v4506_v53, %v3328_v54  ;;  %v4502_v2 = vld [vmem:[%s7277_s2 + $0x54] sm:$0xf] }
  0x10   :  { %282 = vmatpush.bf16.msra.mxu1 %v3255_v25  ;;  %117 = vmatpush.bf16.msra.mxu0 %v4488_v26  ;;  %v46_v61 = vpack.c.bf16 %v39_v58, %v38_v57  ;;  %v4504_v62 = vld [vmem:[%s7277_s2 + $0x64] sm:$0xf]  ;;  %v3324_v63 = vld [vmem:[%s7277_s2 + $0x68] sm:$0xf0]  ;;  %v3320_v3 = vld [vmem:[%s7277_s2 + $0x58] sm:$0xf0] }
  0x11   :  { %295 = vmatpush.bf16.msra.mxu2 %v4991_v27  ;;  %377 = vmatpush.bf16.msra.mxu3 %v3255_v25  ;;  %v3327_v0 = vor.u32 %v4504_v62, %v3324_v63  ;;  %v3323_v4 = vor.u32 %v4502_v2, %v3320_v3  ;;  %v4500_v5 = vld [vmem:[%s7277_s2 + $0x44] sm:$0xf]  ;;  %v3316_v6 = vld [vmem:[%s7277_s2 + $0x48] sm:$0xf0]  ;;  %v4498_v8 = vld [vmem:[%s7277_s2 + $0x34] sm:$0xf] }
  0x12   :  { %v3312_v9 = vld [vmem:[%s7277_s2 + $0x38] sm:$0xf0]  ;;  %v4522_v10 = vld [vmem:[%s7277_s2 + $0xf4] sm:$0xf]  ;;  %v4496_v14 = vld [vmem:[%s7277_s2 + $0x24] sm:$0xf] }
  0x13   :  { %v3315_v11 = vor.u32 %v4498_v8, %v3312_v9  ;;  %v3360_v12 = vld [vmem:[%s7277_s2 + $0xf8] sm:$0xf0]  ;;  %v3308_v15 = vld [vmem:[%s7277_s2 + $0x28] sm:$0xf0]  ;;  %v4520_v16 = vld [vmem:[%s7277_s2 + $0xe4] sm:$0xf] }
  0x14   :  { %283 = vmatpush.bf16.msra.mxu1 %v3251_v32  ;;  %118 = vmatpush.bf16.msra.mxu0 %v4487_v33  ;;  %v3311_v17 = vor.u32 %v4496_v14, %v3308_v15  ;;  %v3356_v18 = vld [vmem:[%s7277_s2 + $0xe8] sm:$0xf0]  ;;  %v3304_v21 = vld [vmem:[%s7277_s2 + $0x18] sm:$0xf0]  ;;  %v4518_v22 = vld [vmem:[%s7277_s2 + $0xd4] sm:$0xf] }
  0x15   :  { %296 = vmatpush.bf16.msra.mxu2 %v5009_v34  ;;  %378 = vmatpush.bf16.msra.mxu3 %v3251_v32  ;;  %v3359_v19 = vor.u32 %v4520_v16, %v3356_v18  ;;  %v3352_v24 = vld [vmem:[%s7277_s2 + $0xd8] sm:$0xf0]  ;;  %v4492_v26 = vld [vmem:[%s7277_s2 + $0x4] sm:$0xf]  ;;  %v3348_v30 = vld [vmem:[%s7277_s2 + $0xc8] sm:$0xf0] }
  0x16   :  { %v3355_v25 = vor.u32 %v4518_v22, %v3352_v24  ;;  %v4516_v28 = vld [vmem:[%s7277_s2 + $0xc4] sm:$0xf]  ;;  %v4514_v32 = vld [vmem:[%s7277_s2 + $0xb4] sm:$0xf]  ;;  %v3344_v33 = vld [vmem:[%s7277_s2 + $0xb8] sm:$0xf0] }
  0x17   :  { %v3351_v31 = vor.u32 %v4516_v28, %v3348_v30  ;;  %v4512_v35 = vld [vmem:[%s7277_s2 + $0xa4] sm:$0xf]  ;;  %v3340_v36 = vld [vmem:[%s7277_s2 + $0xa8] sm:$0xf0]  ;;  %v4510_v38 = vld [vmem:[%s7277_s2 + $0x94] sm:$0xf] }
  0x18   :  { %284 = vmatpush.bf16.msra.mxu1 %v3247_v39  ;;  %119 = vmatpush.bf16.msra.mxu0 %v4486_v40  ;;  %v3343_v37 = vor.u32 %v4512_v35, %v3340_v36  ;;  %v3332_v42 = vld [vmem:[%s7277_s2 + $0x88] sm:$0xf0]  ;;  %v5170_v45 = vld [vmem:[%s7280_s3] ss:$0 sm:$0xff]  ;;  %v3422_v49 = vld [vmem:[%s7277_s2 + $0x70] sm:$0xf] }
  0x19   :  { %297 = vmatpush.bf16.msra.mxu2 %v3279_v41  ;;  %379 = vmatpush.bf16.msra.mxu3 %v3247_v39  ;;  %v3336_v39 = vld [vmem:[%s7277_s2 + $0x98] sm:$0xf0]  ;;  %v4539_v53 = vld [vmem:[%s7277_s2 + $0x74] sm:$0xf0]  ;;  %v3414_v54 = vld [vmem:[%s7277_s2 + $0x60] sm:$0xf] }
  0x1a   :  { %v3339_v40 = vor.u32 %v4510_v38, %v3336_v39  ;;  %v4538_v57 = vld [vmem:[%s7277_s2 + $0x74] sm:$0xf]  ;;  %v4536_v63 = vld [vmem:[%s7277_s2 + $0x64] sm:$0xf]  ;;  %v3406_v3 = vld [vmem:[%s7277_s2 + $0x50] sm:$0xf] }
  0x1b   :  { %v3408_v8 = vld [vmem:[%s7277_s2 + $0x58] sm:$0xf0]  ;;  %v4555_v9 = vld [vmem:[%s7277_s2 + $0xf4] sm:$0xf0]  ;;  %v4533_v15 = vld [vmem:[%s7277_s2 + $0x44] sm:$0xf0] }
  0x1c   :  { %285 = vmatpush.bf16.msra.mxu1 %v3243_v46  ;;  %120 = vmatpush.bf16.msra.mxu0 %v4485_v47  ;;  %v40_v47 = vld [vmem:[%s7279_s0 + $0x10] sm:$0xff]  ;;  %v4532_v18 = vld [vmem:[%s7277_s2 + $0x44] sm:$0xf]  ;;  %v3392_v35 = vld [vmem:[%s7277_s2 + $0x38] sm:$0xf0] }
  0x1d   :  { %298 = vmatpush.bf16.msra.mxu2 %v3275_v48  ;;  %380 = vmatpush.bf16.msra.mxu3 %v3243_v46  ;;  %v4554_v16 = vld [vmem:[%s7277_s2 + $0xf4] sm:$0xf]  ;;  %v4553_v38 = vld [vmem:[%s7277_s2 + $0xe4] sm:$0xf0]  ;;  %v4552_v39 = vld [vmem:[%s7277_s2 + $0xe4] sm:$0xf] }
  0x1e   :  { %v44_v28 = vld [vmem:[%s7279_s0 + $0x30] sm:$0xff] }
  0x20   :  { %286 = vmatpush.bf16.msra.mxu1 %v3239_v55  ;;  %121 = vmatpush.bf16.msra.mxu0 %v4484_v56  ;;  %v3423_v56 = vor.u32 %v4539_v53, %v3422_v49 }
  0x21   :  { %299 = vmatpush.bf16.msra.mxu2 %v3271_v59  ;;  %381 = vmatpush.bf16.msra.mxu3 %v3239_v55  ;;  %v4537_v55 = vld [vmem:[%s7277_s2 + $0x64] sm:$0xf0] }
  0x23   :  { %287 = vmatmul.bf16.vlgmr.msra.gmra.mxu1 %v4876_v1  ;;  %122 = vmatmul.bf16.vlgmr.msra.gmra.mxu0 %v46_v61  ;;  %v3415_v61 = vor.u32 %v4537_v55, %v3414_v54  ;;  %v3472_v54 = vld [vmem:[%s7277_s2 + $0xd8] sm:$0xf0] }
  0x24   :  { %387 = vmatpush.bf16.msrb.mxu1 %v4940_v7  ;;  %300 = vmatmul.bf16.vlgmr.msra.gmra.mxu2 %v4876_v1  ;;  %v3319_v7 = vor.u32 %v4500_v5, %v3316_v6  ;;  %v3486_v6 = vld [vmem:[%s7277_s2 + $0xf0] sm:$0xf] }
  0x25   :  { %400 = vmatpush.bf16.msrb.mxu2 %v3331_v60  ;;  %627 = vmatpush.bf16.msrb.mxu0 %v3423_v56  ;;  %v3374_v56 = vld [vmem:[%s7277_s2 + $0x10] sm:$0xf] }
  0x28   :  { %388 = vmatpush.bf16.msrb.mxu1 %v4955_v13  ;;  %v3363_v13 = vor.u32 %v4522_v10, %v3360_v12  ;;  %v3487_v12 = vor.u32 %v4555_v9, %v3486_v6  ;;  %v4525_v6 = vld [vmem:[%s7277_s2 + $0x4] sm:$0xf0]  ;;  %v4524_v9 = vld [vmem:[%s7277_s2 + $0x4] sm:$0xf] }
  0x29   :  { %401 = vmatpush.bf16.msrb.mxu2 %v3327_v0  ;;  %v3416_v0 = vld [vmem:[%s7277_s2 + $0x68] sm:$0xf0]  ;;  %628 = vmatpush.bf16.msrb.mxu0 %v3415_v61 }
  0x2a   :  { %413 = vmatpush.bf16.msrb.mxu3 %v3363_v13  ;;  %v3419_v5 = vor.u32 %v4536_v63, %v3416_v0  ;;  %v3398_v13 = vld [vmem:[%s7277_s2 + $0x40] sm:$0xf]  ;;  %v4549_v63 = vld [vmem:[%s7277_s2 + $0xc4] sm:$0xf0]  ;;  %v4548_v0 = vld [vmem:[%s7277_s2 + $0xc4] sm:$0xf] }
  0x2c   :  { %389 = vmatpush.bf16.msrb.mxu1 %v4973_v20  ;;  %v4494_v20 = vld [vmem:[%s7277_s2 + $0x14] sm:$0xf] }
  0x2d   :  { %402 = vmatpush.bf16.msrb.mxu2 %v3323_v4  ;;  %v3307_v23 = vor.u32 %v4494_v20, %v3304_v21  ;;  %v4535_v4 = vld [vmem:[%s7277_s2 + $0x54] sm:$0xf0]  ;;  %v42_v20 = vld [vmem:[%s7279_s0 + $0x20] sm:$0xff]  ;;  %v43_v21 = vld [vmem:[%s7279_s0 + $0x28] sm:$0xff] }
  0x2e   :  { %414 = vmatpush.bf16.msrb.mxu3 %v3359_v19  ;;  %v3400_v19 = vld [vmem:[%s7277_s2 + $0x48] sm:$0xf0] }
  0x30   :  { %390 = vmatpush.bf16.msrb.mxu1 %v4991_v27  ;;  %v3300_v27 = vld [vmem:[%s7277_s2 + $0x8] sm:$0xf0] }
  0x31   :  { %403 = vmatpush.bf16.msrb.mxu2 %v3319_v7  ;;  %v3303_v29 = vor.u32 %v4492_v26, %v3300_v27  ;;  %v4534_v7 = vld [vmem:[%s7277_s2 + $0x54] sm:$0xf]  ;;  %v3403_v26 = vor.u32 %v4532_v18, %v3400_v19  ;;  %v48_v27 = vpack.c.bf16 %v43_v21, %v42_v20  ;;  %v3446_v18 = vld [vmem:[%s7277_s2 + $0xa0] sm:$0xf]  ;;  %v4545_v19 = vld [vmem:[%s7277_s2 + $0xa4] sm:$0xf0] }
  0x32   :  { %415 = vmatpush.bf16.msrb.mxu3 %v3355_v25  ;;  %v3411_v14 = vor.u32 %v4534_v7, %v3408_v8  ;;  %v4544_v20 = vld [vmem:[%s7277_s2 + $0xa4] sm:$0xf]  ;;  %v3447_v21 = vor.u32 %v4545_v19, %v3446_v18  ;;  %v3536_v18 = vld [vmem:[%s7277_s2 + $0x58] sm:$0xf0] }
  0x34   :  { %391 = vmatpush.bf16.msrb.mxu1 %v5009_v34  ;;  %v3347_v34 = vor.u32 %v4514_v32, %v3344_v33  ;;  %v4531_v32 = vld [vmem:[%s7277_s2 + $0x34] sm:$0xf0]  ;;  %v4530_v33 = vld [vmem:[%s7277_s2 + $0x34] sm:$0xf] }
  0x35   :  { %404 = vmatpush.bf16.msrb.mxu2 %v3315_v11  ;;  %v3407_v11 = vor.u32 %v4535_v4, %v3406_v3  ;;  %v3464_v4 = vld [vmem:[%s7277_s2 + $0xc8] sm:$0xf0] }
  0x36   :  { %416 = vmatpush.bf16.msrb.mxu3 %v3351_v31  ;;  %v3390_v31 = vld [vmem:[%s7277_s2 + $0x30] sm:$0xf]  ;;  %v3467_v7 = vor.u32 %v4548_v0, %v3464_v4  ;;  %v4568_v4 = vld [vmem:[%s7277_s2 + $0x64] sm:$0xf] }
  0x37   :  { %629 = vmatpush.bf16.msrb.mxu0 %v3407_v11  ;;  %v3454_v11 = vld [vmem:[%s7277_s2 + $0xb0] sm:$0xf] }
  0x38   :  { %392 = vmatpush.bf16.msrb.mxu1 %v3279_v41  ;;  %v4508_v41 = vld [vmem:[%s7277_s2 + $0x84] sm:$0xf]  ;;  %v3614_v0 = vld [vmem:[%s7277_s2 + $0xf0] sm:$0xf] }
  0x39   :  { %405 = vmatpush.bf16.msrb.mxu2 %v3311_v17  ;;  %v3335_v44 = vor.u32 %v4508_v41, %v3332_v42  ;;  %v3488_v17 = vld [vmem:[%s7277_s2 + $0xf8] sm:$0xf0]  ;;  %v3480_v41 = vld [vmem:[%s7277_s2 + $0xe8] sm:$0xf0] }
  0x3a   :  { %417 = vmatpush.bf16.msrb.mxu3 %v3347_v34  ;;  %v3491_v24 = vor.u32 %v4554_v16, %v3488_v17  ;;  %v3391_v34 = vor.u32 %v4531_v32, %v3390_v31  ;;  %v3483_v42 = vor.u32 %v4552_v39, %v3480_v41  ;;  %v4541_v31 = vld [vmem:[%s7277_s2 + $0x84] sm:$0xf0]  ;;  %v4540_v32 = vld [vmem:[%s7277_s2 + $0x84] sm:$0xf] }
  0x3c   :  { %393 = vmatpush.bf16.msrb.mxu1 %v3275_v48  ;;  %v41_v48 = vld [vmem:[%s7279_s0 + $0x18] sm:$0xff] }
  0x3d   :  { %406 = vmatpush.bf16.msrb.mxu2 %v3307_v23  ;;  %v47_v52 = vpack.c.bf16 %v41_v48, %v40_v47  ;;  %v3399_v23 = vor.u32 %v4533_v15, %v3398_v13  ;;  %v3384_v48 = vld [vmem:[%s7277_s2 + $0x28] sm:$0xf0]  ;;  %v4547_v13 = vld [vmem:[%s7277_s2 + $0xb4] sm:$0xf0]  ;;  %v3456_v15 = vld [vmem:[%s7277_s2 + $0xb8] sm:$0xf0] }
  0x3e   :  { %418 = vmatpush.bf16.msrb.mxu3 %v3343_v37  ;;  %v3478_v37 = vld [vmem:[%s7277_s2 + $0xe0] sm:$0xf]  ;;  %v3455_v16 = vor.u32 %v4547_v13, %v3454_v11  ;;  %v4567_v13 = vld [vmem:[%s7277_s2 + $0x54] sm:$0xf0] }
  0x3f   :  { %127 = vmatmul.bf16.gmra.mxu0 %v47_v52  ;;  %v4550_v52 = vld [vmem:[%s7277_s2 + $0xd4] sm:$0xf] }
  0x40   :  { %394 = vmatpush.bf16.msrb.mxu1 %v3271_v59  ;;  %v3424_v59 = vld [vmem:[%s7277_s2 + $0x78] sm:$0xf0]  ;;  %630 = vmatpush.bf16.msrb.mxu0 %v3399_v23  ;;  %v3475_v55 = vor.u32 %v4550_v52, %v3472_v54  ;;  %v5403_v52 = vld [vmem:[%s7280_s3 + $0x1] ss:$0 sm:$0xff] }
  0x41   :  { %407 = vmatpush.bf16.msrb.mxu2 %v3303_v29  ;;  %v3427_v62 = vor.u32 %v4538_v57, %v3424_v59  ;;  %v45_v29 = vld [vmem:[%s7279_s0 + $0x38] sm:$0xff] }
  0x42   :  { %419 = vmatpush.bf16.msrb.mxu3 %v3339_v40  ;;  %v49_v30 = vpack.c.bf16 %v45_v29, %v44_v28  ;;  %v3479_v40 = vor.u32 %v4553_v38, %v3478_v37  ;;  %v4527_v57 = vld [vmem:[%s7277_s2 + $0x14] sm:$0xf0]  ;;  %v3440_v28 = vld [vmem:[%s7277_s2 + $0x98] sm:$0xf0] }
  0x43   :  { %395 = vmatmul.bf16.vlgmr.msrb.gmra.mxu1 %v4876_v1  ;;  %v3375_v59 = vor.u32 %v4527_v57, %v3374_v56 }
  0x44   :  { %640 = vmatpush.bf16.msra.mxu1 %v3487_v12  ;;  %631 = vmatpush.bf16.msrb.mxu0 %v3391_v34  ;;  %v3432_v34 = vld [vmem:[%s7277_s2 + $0x88] sm:$0xf0] }
  0x45   :  { %653 = vmatpush.bf16.msra.mxu2 %v3427_v62  ;;  %v3462_v62 = vld [vmem:[%s7277_s2 + $0xc0] sm:$0xf] }
  0x46   :  { %420 = vmatpush.bf16.msrb.mxu3 %v3335_v44  ;;  %v4529_v44 = vld [vmem:[%s7277_s2 + $0x24] sm:$0xf0]  ;;  %v3463_v3 = vor.u32 %v4549_v63, %v3462_v62  ;;  %v3542_v62 = vld [vmem:[%s7277_s2 + $0x60] sm:$0xf] }
  0x47   :  { %v4569_v63 = vld [vmem:[%s7277_s2 + $0x64] sm:$0xf0] }
  0x48   :  { %641 = vmatpush.bf16.msra.mxu1 %v3479_v40 }
  0x49   :  { %654 = vmatpush.bf16.msra.mxu2 %v3419_v5  ;;  %v3366_v5 = vld [vmem:[%s7277_s2] sm:$0xf] }
  0x4a   :  { %v3367_v8 = vor.u32 %v4525_v6, %v3366_v5  ;;  %v3544_v5 = vld [vmem:[%s7277_s2 + $0x68] sm:$0xf0] }
  0x4d   :  { %655 = vmatpush.bf16.msra.mxu2 %v3411_v14  ;;  %v4546_v14 = vld [vmem:[%s7277_s2 + $0xb4] sm:$0xf] }
  0x4e   :  { %v3459_v17 = vor.u32 %v4546_v14, %v3456_v15  ;;  %v3606_v14 = vld [vmem:[%s7277_s2 + $0xe0] sm:$0xf] }
  0x4f   :  { %132 = vmatmul.bf16.gmra.mxu0 %v48_v27 }
  0x51   :  { %656 = vmatpush.bf16.msra.mxu2 %v3403_v26  ;;  %v4542_v26 = vld [vmem:[%s7277_s2 + $0x94] sm:$0xf] }
  0x52   :  { %v3443_v29 = vor.u32 %v4542_v26, %v3440_v28  ;;  %v3598_v26 = vld [vmem:[%s7277_s2 + $0xd0] sm:$0xf]  ;;  %v4583_v28 = vld [vmem:[%s7277_s2 + $0xd4] sm:$0xf0] }
  0x5f   :  { %137 = vmatmul.bf16.gmra.mxu0 %v49_v30  ;;  %v3430_v30 = vld [vmem:[%s7277_s2 + $0x80] sm:$0xf] }
  0xa0   :  { %v288_v43 = vpop.f32.mrf.mxu1  ;;  %v123_v60 = vpop.f32.mrf.mxu0 }
  0xa7   :  { %v301_v46 = vpop.f32.mrf.mxu2 }
  0xa8   :  { %v302_v50 = vadd.f32 %v301_v46, %v288_v43  ;;  %v290_v51 = vpop.f32.mrf.mxu1  ;;  %v3382_v43 = vld [vmem:[%s7277_s2 + $0x20] sm:$0xf]  ;;  %v4528_v46 = vld [vmem:[%s7277_s2 + $0x24] sm:$0xf]  ;;  %v125_v40 = vpop.f32.mrf.mxu0 }
  0xa9   :  { %v3383_v47 = vor.u32 %v4529_v44, %v3382_v43  ;;  %v3387_v49 = vor.u32 %v4528_v46, %v3384_v48  ;;  %v4551_v51 = vld [vmem:[%s7277_s2 + $0xd4] sm:$0xf0]  ;;  %v4570_v44 = vld [vmem:[%s7277_s2 + $0x74] sm:$0xf] }
  0xaa   :  { %v305_v58 = vadd.f32 %v5170_v45, %v302_v50  ;;  %v3470_v50 = vld [vmem:[%s7277_s2 + $0xd0] sm:$0xf]  ;;  %v4571_v43 = vld [vmem:[%s7277_s2 + $0x74] sm:$0xf0] }
  0xab   :  { %632 = vmatpush.bf16.msrb.mxu0 %v3383_v47  ;;  %v3471_v53 = vor.u32 %v4551_v51, %v3470_v50 }
  0xac   :  { %v307_v2 = vadd.f32 %v305_v58, %v123_v60  ;;  %v4526_v58 = vld [vmem:[%s7277_s2 + $0x14] sm:$0xf]  ;;  %v3376_v60 = vld [vmem:[%s7277_s2 + $0x18] sm:$0xf0] }
  0xad   :  { %642 = vmatpush.bf16.msra.mxu1 %v3471_v53  ;;  %v3379_v61 = vor.u32 %v4526_v58, %v3376_v60 }
  0xae   :  { %4808 = vtanh.f32 %v307_v2 }
  0xaf   :  { %v303_v10 = vpop.f32.mrf.mxu2  ;;  %633 = vmatpush.bf16.msrb.mxu0 %v3375_v59 }
  0xb0   :  { %v3368_v10 = vld [vmem:[%s7277_s2 + $0x8] sm:$0xf0] }
  0xb1   :  { %643 = vmatpush.bf16.msra.mxu1 %v3463_v3  ;;  %v3371_v12 = vor.u32 %v4524_v9, %v3368_v10  ;;  %v4587_v3 = vld [vmem:[%s7277_s2 + $0xf4] sm:$0xf0]  ;;  %v4586_v9 = vld [vmem:[%s7277_s2 + $0xf4] sm:$0xf]  ;;  %v3616_v10 = vld [vmem:[%s7277_s2 + $0xf8] sm:$0xf0] }
  0xb2   :  { %v3619_v11 = vor.u32 %v4586_v9, %v3616_v10  ;;  %v4558_v9 = vld [vmem:[%s7277_s2 + $0x14] sm:$0xf]  ;;  %v3504_v10 = vld [vmem:[%s7277_s2 + $0x18] sm:$0xf0] }
  0xb3   :  { %634 = vmatpush.bf16.msrb.mxu0 %v3367_v8  ;;  %v3547_v8 = vor.u32 %v4568_v4, %v3544_v5  ;;  %v4559_v4 = vld [vmem:[%s7277_s2 + $0x14] sm:$0xf0]  ;;  %v3574_v5 = vld [vmem:[%s7277_s2 + $0xa0] sm:$0xf] }
  0xb4   :  { %v4809_v22 = vpop.eup %4808 }
  0xb5   :  { %v309_v25 = vpack.c.bf16 %v4809_v22, %v4809_v22  ;;  %644 = vmatpush.bf16.msra.mxu1 %v3455_v16  ;;  %v3448_v22 = vld [vmem:[%s7277_s2 + $0xa8] sm:$0xf0]  ;;  %v4585_v16 = vld [vmem:[%s7277_s2 + $0xe4] sm:$0xf0] }
  0xb6   :  { %v3451_v23 = vor.u32 %v4544_v20, %v3448_v22  ;;  %v3607_v19 = vor.u32 %v4585_v16, %v3606_v14  ;;  %v3608_v22 = vld [vmem:[%s7277_s2 + $0xe8] sm:$0xf0]  ;;  %v4576_v14 = vld [vmem:[%s7277_s2 + $0xa4] sm:$0xf] }
  0xb7   :  { %382 = vmatmul.bf16.vlgmr.msra.gmra.mxu3 %v309_v25  ;;  %408 = vmatmul.bf16.vlgmr.msrb.gmra.mxu2 %v309_v25  ;;  %v4543_v25 = vld [vmem:[%s7277_s2 + $0x94] sm:$0xf0] }
  0xb8   :  { %666 = vmatpush.bf16.msra.mxu3 %v3491_v24  ;;  %v3438_v24 = vld [vmem:[%s7277_s2 + $0x90] sm:$0xf] }
  0xb9   :  { %645 = vmatpush.bf16.msra.mxu1 %v3447_v21  ;;  %v3439_v27 = vor.u32 %v4543_v25, %v3438_v24  ;;  %v4584_v21 = vld [vmem:[%s7277_s2 + $0xe4] sm:$0xf]  ;;  %v3526_v24 = vld [vmem:[%s7277_s2 + $0x40] sm:$0xf]  ;;  %v4565_v25 = vld [vmem:[%s7277_s2 + $0x44] sm:$0xf0] }
  0xbc   :  { %667 = vmatpush.bf16.msra.mxu3 %v3483_v42  ;;  %v3550_v42 = vld [vmem:[%s7277_s2 + $0x70] sm:$0xf]  ;;  %v5410_v59 = vpop.f32.mrf.mxu0 }
  0xbd   :  { %646 = vmatpush.bf16.msra.mxu1 %v3439_v27  ;;  %v3551_v46 = vor.u32 %v4571_v43, %v3550_v42  ;;  %v3527_v27 = vor.u32 %v4565_v25, %v3526_v24  ;;  %v4562_v42 = vld [vmem:[%s7277_s2 + $0x34] sm:$0xf]  ;;  %v3520_v43 = vld [vmem:[%s7277_s2 + $0x38] sm:$0xf0] }
  0xbf   :  { %880 = vmatpush.bf16.msra.mxu0 %v3551_v46  ;;  %v3523_v46 = vor.u32 %v4562_v42, %v3520_v43  ;;  %v3670_v42 = vld [vmem:[%s7277_s2 + $0x60] sm:$0xf]  ;;  %v4601_v43 = vld [vmem:[%s7277_s2 + $0x64] sm:$0xf0] }
  0xc0   :  { %v5264_v36 = vpop.f32.mrf.mxu1  ;;  %668 = vmatpush.bf16.msra.mxu3 %v3475_v55 }
  0xc4   :  { %669 = vmatpush.bf16.msra.mxu3 %v3467_v7  ;;  %v5412_v60 = vpop.f32.mrf.mxu0  ;;  %v3615_v7 = vor.u32 %v4587_v3, %v3614_v0  ;;  %v3584_v0 = vld [vmem:[%s7277_s2 + $0xb8] sm:$0xf0]  ;;  %v3502_v3 = vld [vmem:[%s7277_s2 + $0x10] sm:$0xf] }
  0xc7   :  { %421 = vmatmul.bf16.vlgmr.msrb.gmra.mxu3 %v4876_v1  ;;  %v3395_v1 = vor.u32 %v4530_v33, %v3392_v35  ;;  %v3431_v33 = vor.u32 %v4541_v31, %v3430_v30  ;;  %v3435_v35 = vor.u32 %v4540_v32, %v3432_v34  ;;  %v3528_v30 = vld [vmem:[%s7277_s2 + $0x48] sm:$0xf0]  ;;  %v3599_v31 = vor.u32 %v4583_v28, %v3598_v26  ;;  %v3600_v34 = vld [vmem:[%s7277_s2 + $0xd8] sm:$0xf0]  ;;  %v4574_v26 = vld [vmem:[%s7277_s2 + $0x94] sm:$0xf] }
  0xc8   :  { %v398_v2 = vpop.f32.mrf.mxu1  ;;  %670 = vmatpush.bf16.msra.mxu3 %v3459_v17  ;;  %v4566_v17 = vld [vmem:[%s7277_s2 + $0x54] sm:$0xf] }
  0xc9   :  { %657 = vmatpush.bf16.msra.mxu2 %v3395_v1  ;;  %647 = vmatpush.bf16.msra.mxu1 %v3431_v33  ;;  %v3543_v2 = vor.u32 %v4569_v63, %v3542_v62  ;;  %v3539_v20 = vor.u32 %v4566_v17, %v3536_v18  ;;  %v4582_v33 = vld [vmem:[%s7277_s2 + $0xd4] sm:$0xf]  ;;  %v3494_v17 = vld [vmem:[%s7277_s2] sm:$0xf]  ;;  %v4557_v18 = vld [vmem:[%s7277_s2 + $0x4] sm:$0xf0] }
  0xca   :  { %v4578_v63 = vld [vmem:[%s7277_s2 + $0xb4] sm:$0xf] }
  0xcb   :  { %881 = vmatpush.bf16.msra.mxu0 %v3543_v2  ;;  %v3587_v2 = vor.u32 %v4578_v63, %v3584_v0  ;;  %v3734_v63 = vld [vmem:[%s7277_s2 + $0xe0] sm:$0xf]  ;;  %v4617_v0 = vld [vmem:[%s7277_s2 + $0xe4] sm:$0xf0] }
  0xcc   :  { %671 = vmatpush.bf16.msra.mxu3 %v3451_v23  ;;  %v3611_v23 = vor.u32 %v4584_v21, %v3608_v22  ;;  %v4575_v21 = vld [vmem:[%s7277_s2 + $0x94] sm:$0xf0]  ;;  %v4556_v22 = vld [vmem:[%s7277_s2 + $0x4] sm:$0xf] }
  0xcd   :  { %658 = vmatpush.bf16.msra.mxu2 %v3387_v49  ;;  %893 = vmatpush.bf16.msrb.mxu1 %v3615_v7  ;;  %v3503_v7 = vor.u32 %v4559_v4, %v3502_v3  ;;  %v3664_v3 = vld [vmem:[%s7277_s2 + $0x58] sm:$0xf0] }
  0xd0   :  { %672 = vmatpush.bf16.msra.mxu3 %v3443_v29  ;;  %v4564_v29 = vld [vmem:[%s7277_s2 + $0x44] sm:$0xf] }
  0xd1   :  { %659 = vmatpush.bf16.msra.mxu2 %v3379_v61  ;;  %v5414_v61 = vpop.f32.mrf.mxu0  ;;  %894 = vmatpush.bf16.msrb.mxu1 %v3607_v19  ;;  %v3531_v32 = vor.u32 %v4564_v29, %v3528_v30  ;;  %v3566_v19 = vld [vmem:[%s7277_s2 + $0x90] sm:$0xf]  ;;  %v3558_v29 = vld [vmem:[%s7277_s2 + $0x80] sm:$0xf]  ;;  %v4573_v30 = vld [vmem:[%s7277_s2 + $0x84] sm:$0xf0] }
  0xd2   :  { %v3567_v24 = vor.u32 %v4575_v21, %v3566_v19 }
  0xd4   :  { %673 = vmatpush.bf16.msra.mxu3 %v3435_v35  ;;  %v3603_v35 = vor.u32 %v4582_v33, %v3600_v34  ;;  %v3560_v33 = vld [vmem:[%s7277_s2 + $0x88] sm:$0xf0] }
  0xd5   :  { %660 = vmatpush.bf16.msra.mxu2 %v3371_v12  ;;  %v3534_v12 = vld [vmem:[%s7277_s2 + $0x50] sm:$0xf]  ;;  %895 = vmatpush.bf16.msrb.mxu1 %v3599_v31  ;;  %v4572_v31 = vld [vmem:[%s7277_s2 + $0x84] sm:$0xf] }
  0xd6   :  { %v3535_v15 = vor.u32 %v4567_v13, %v3534_v12  ;;  %v3507_v13 = vor.u32 %v4558_v9, %v3504_v10  ;;  %v3563_v34 = vor.u32 %v4572_v31, %v3560_v33  ;;  %v4596_v31 = vld [vmem:[%s7277_s2 + $0x44] sm:$0xf] }
  0xd8   :  { %919 = vmatpush.bf16.msrb.mxu3 %v3619_v11  ;;  %882 = vmatpush.bf16.msra.mxu0 %v3535_v15  ;;  %v3576_v15 = vld [vmem:[%s7277_s2 + $0xa8] sm:$0xf0] }
  0xd9   :  { %v5434_v6 = vpop.f32.mrf.mxu0  ;;  %v3579_v16 = vor.u32 %v4576_v14, %v3576_v15 }
  0xdc   :  { %920 = vmatpush.bf16.msrb.mxu3 %v3611_v23  ;;  %883 = vmatpush.bf16.msra.mxu0 %v3527_v27  ;;  %v3496_v23 = vld [vmem:[%s7277_s2 + $0x8] sm:$0xf0]  ;;  %v3568_v27 = vld [vmem:[%s7277_s2 + $0x98] sm:$0xf0] }
  0xdd   :  { %v3499_v25 = vor.u32 %v4556_v22, %v3496_v23  ;;  %v3571_v28 = vor.u32 %v4574_v26, %v3568_v27  ;;  %v4597_v27 = vld [vmem:[%s7277_s2 + $0x44] sm:$0xf0] }
  0xe0   :  { %921 = vmatpush.bf16.msrb.mxu3 %v3603_v35 }
 0x13a   :  { %v383_v1 = vpop.f32.mrf.mxu3  ;;  %v409_v37 = vpop.f32.mrf.mxu2 }
 0x13b   :  { %v397_v38 = vadd.f32 %v5264_v36, %v383_v1  ;;  %v3552_v36 = vld [vmem:[%s7277_s2 + $0x78] sm:$0xf0]  ;;  %v5490_v1 = vpop.f32.mrf.mxu0 }
 0x13c   :  { %v3555_v49 = vor.u32 %v4570_v44, %v3552_v36  ;;  %v4580_v36 = vld [vmem:[%s7277_s2 + $0xc4] sm:$0xf] }
 0x13d   :  { %v426_v39 = vadd.f32 %v5170_v45, %v397_v38  ;;  %v4563_v38 = vld [vmem:[%s7277_s2 + $0x34] sm:$0xf0] }
 0x13e   :  { %906 = vmatpush.bf16.msrb.mxu2 %v3555_v49  ;;  %v3510_v49 = vld [vmem:[%s7277_s2 + $0x20] sm:$0xf] }
 0x13f   :  { %v428_v41 = vadd.f32 %v426_v39, %v125_v40  ;;  %v3590_v39 = vld [vmem:[%s7277_s2 + $0xc0] sm:$0xf] }
 0x141   :  { %4810 = vtanh.f32 %v428_v41  ;;  %v4581_v41 = vld [vmem:[%s7277_s2 + $0xc4] sm:$0xf0] }
 0x142   :  { %v385_v47 = vpop.f32.mrf.mxu3  ;;  %v411_v48 = vpop.f32.mrf.mxu2  ;;  %907 = vmatpush.bf16.msrb.mxu2 %v3547_v8  ;;  %v3591_v44 = vor.u32 %v4581_v41, %v3590_v39  ;;  %v4577_v8 = vld [vmem:[%s7277_s2 + $0xa4] sm:$0xf0]  ;;  %v4602_v39 = vld [vmem:[%s7277_s2 + $0x74] sm:$0xf]  ;;  %v3680_v41 = vld [vmem:[%s7277_s2 + $0x78] sm:$0xf0] }
 0x143   :  { %v3592_v47 = vld [vmem:[%s7277_s2 + $0xc8] sm:$0xf0]  ;;  %v5558_v11 = vpop.f32.mrf.mxu0  ;;  %v3575_v12 = vor.u32 %v4577_v8, %v3574_v5  ;;  %v3735_v5 = vor.u32 %v4617_v0, %v3734_v63 }
 0x144   :  { %v3595_v48 = vor.u32 %v4580_v36, %v3592_v47  ;;  %896 = vmatpush.bf16.msrb.mxu1 %v3591_v44  ;;  %v3683_v44 = vor.u32 %v4602_v39, %v3680_v41  ;;  %v4619_v36 = vld [vmem:[%s7277_s2 + $0xf4] sm:$0xf0]  ;;  %v4600_v47 = vld [vmem:[%s7277_s2 + $0x64] sm:$0xf]  ;;  %v3736_v8 = vld [vmem:[%s7277_s2 + $0xe8] sm:$0xf0] }
 0x145   :  { %v3646_v39 = vld [vmem:[%s7277_s2 + $0x30] sm:$0xf]  ;;  %v3718_v41 = vld [vmem:[%s7277_s2 + $0xc0] sm:$0xf] }
 0x146   :  { %908 = vmatpush.bf16.msrb.mxu2 %v3539_v20  ;;  %922 = vmatpush.bf16.msrb.mxu3 %v3595_v48  ;;  %v3495_v20 = vor.u32 %v4557_v18, %v3494_v17  ;;  %v3671_v48 = vor.u32 %v4601_v43, %v3670_v42  ;;  %v4613_v43 = vld [vmem:[%s7277_s2 + $0xc4] sm:$0xf0] }
 0x147   :  { %v4811_v50 = vpop.eup %4810 }
 0x148   :  { %v430_v51 = vpack.c.bf16 %v4811_v50, %v4811_v50  ;;  %v4561_v50 = vld [vmem:[%s7277_s2 + $0x24] sm:$0xf0] }
 0x14a   :  { %v422_v53 = vpop.f32.mrf.mxu3  ;;  %635 = vmatmul.bf16.vlgmr.msrb.gmra.mxu0 %v430_v51  ;;  %661 = vmatmul.bf16.vlgmr.msra.gmra.mxu2 %v430_v51  ;;  %v3582_v51 = vld [vmem:[%s7277_s2 + $0xb0] sm:$0xf] }
 0x14b   :  { %v423_v54 = vadd.f32 %v422_v53, %v409_v37  ;;  %909 = vmatpush.bf16.msrb.mxu2 %v3531_v32  ;;  %v3518_v37 = vld [vmem:[%s7277_s2 + $0x30] sm:$0xf]  ;;  %v3511_v53 = vor.u32 %v4561_v50, %v3510_v49  ;;  %923 = vmatpush.bf16.msrb.mxu3 %v3587_v2  ;;  %v3559_v32 = vor.u32 %v4573_v30, %v3558_v29  ;;  %v3672_v50 = vld [vmem:[%s7277_s2 + $0x68] sm:$0xf0]  ;;  %v4598_v2 = vld [vmem:[%s7277_s2 + $0x54] sm:$0xf] }
 0x14c   :  { %v3519_v40 = vor.u32 %v4563_v38, %v3518_v37  ;;  %v3678_v37 = vld [vmem:[%s7277_s2 + $0x70] sm:$0xf]  ;;  %v4603_v38 = vld [vmem:[%s7277_s2 + $0x74] sm:$0xf0] }
 0x14d   :  { %v431_v55 = vadd.f32 %v5403_v52, %v423_v54  ;;  %v4579_v54 = vld [vmem:[%s7277_s2 + $0xb4] sm:$0xf0] }
 0x14e   :  { %884 = vmatpush.bf16.msra.mxu0 %v3519_v40  ;;  %v3679_v40 = vor.u32 %v4603_v38, %v3678_v37  ;;  %v4615_v30 = vld [vmem:[%s7277_s2 + $0xd4] sm:$0xf0]  ;;  %v3728_v37 = vld [vmem:[%s7277_s2 + $0xd8] sm:$0xf0] }
 0x14f   :  { %4812 = vtanh.f32 %v431_v55  ;;  %910 = vmatpush.bf16.msrb.mxu2 %v3523_v46  ;;  %v4560_v55 = vld [vmem:[%s7277_s2 + $0x24] sm:$0xf]  ;;  %924 = vmatpush.bf16.msrb.mxu3 %v3579_v16  ;;  %v3742_v46 = vld [vmem:[%s7277_s2 + $0xf0] sm:$0xf] }
 0x150   :  { %v3743_v49 = vor.u32 %v4619_v36, %v3742_v46  ;;  %v3648_v46 = vld [vmem:[%s7277_s2 + $0x38] sm:$0xf0]  ;;  %v3719_v36 = vor.u32 %v4613_v43, %v3718_v41  ;;  %v3798_v43 = vld [vmem:[%s7277_s2 + $0x60] sm:$0xf] }
 0x152   :  { %v424_v56 = vpop.f32.mrf.mxu3  ;;  %885 = vmatpush.bf16.msra.mxu0 %v3511_v53  ;;  %v3744_v53 = vld [vmem:[%s7277_s2 + $0xf8] sm:$0xf0] }
 0x153   :  { %v3512_v56 = vld [vmem:[%s7277_s2 + $0x28] sm:$0xf0]  ;;  %925 = vmatpush.bf16.msrb.mxu3 %v3571_v28  ;;  %v3726_v28 = vld [vmem:[%s7277_s2 + $0xd0] sm:$0xf] }
 0x154   :  { %v3515_v62 = vor.u32 %v4560_v55, %v3512_v56  ;;  %v3675_v55 = vor.u32 %v4600_v47, %v3672_v50  ;;  %v3727_v33 = vor.u32 %v4615_v30, %v3726_v28  ;;  %v4606_v28 = vld [vmem:[%s7277_s2 + $0x94] sm:$0xf] }
 0x155   :  { %v5406_v57 = vpop.eup %4812 }
 0x156   :  { %v433_v58 = vpack.c.bf16 %v5406_v57, %v5406_v57  ;;  %911 = vmatpush.bf16.msrb.mxu2 %v3515_v62  ;;  %886 = vmatpush.bf16.msra.mxu0 %v3503_v7  ;;  %v4599_v62 = vld [vmem:[%s7277_s2 + $0x54] sm:$0xf0]  ;;  %v4616_v7 = vld [vmem:[%s7277_s2 + $0xe4] sm:$0xf] }
 0x157   :  { %926 = vmatpush.bf16.msrb.mxu3 %v3563_v34  ;;  %v3739_v10 = vor.u32 %v4616_v7, %v3736_v8  ;;  %v4591_v7 = vld [vmem:[%s7277_s2 + $0x14] sm:$0xf0]  ;;  %v3702_v8 = vld [vmem:[%s7277_s2 + $0xa0] sm:$0xf] }
 0x158   :  { %648 = vmatmul.bf16.vlgmr.msra.gmra.mxu1 %v433_v58  ;;  %674 = vmatmul.bf16.vlgmr.msra.gmra.mxu3 %v433_v58  ;;  %v3583_v58 = vor.u32 %v4579_v54, %v3582_v51  ;;  %v4618_v51 = vld [vmem:[%s7277_s2 + $0xf4] sm:$0xf] }
 0x159   :  { %v3747_v56 = vor.u32 %v4618_v51, %v3744_v53  ;;  %v3638_v51 = vld [vmem:[%s7277_s2 + $0x20] sm:$0xf]  ;;  %v4593_v53 = vld [vmem:[%s7277_s2 + $0x24] sm:$0xf0] }
 0x15a   :  { %897 = vmatpush.bf16.msrb.mxu1 %v3583_v58  ;;  %912 = vmatpush.bf16.msrb.mxu2 %v3507_v13  ;;  %v3662_v58 = vld [vmem:[%s7277_s2 + $0x50] sm:$0xf] }
 0x15b   :  { %887 = vmatpush.bf16.msra.mxu0 %v3495_v20  ;;  %1172 = vmatpush.bf16.msra.mxu3 %v3747_v56  ;;  %v3663_v9 = vor.u32 %v4599_v62, %v3662_v58  ;;  %v4611_v56 = vld [vmem:[%s7277_s2 + $0xb4] sm:$0xf0]  ;;  %v4592_v58 = vld [vmem:[%s7277_s2 + $0x24] sm:$0xf]  ;;  %v3640_v62 = vld [vmem:[%s7277_s2 + $0x28] sm:$0xf0] }
 0x15c   :  { %v3643_v0 = vor.u32 %v4592_v58, %v3640_v62  ;;  %v3790_v58 = vld [vmem:[%s7277_s2 + $0x50] sm:$0xf]  ;;  %v4631_v62 = vld [vmem:[%s7277_s2 + $0x54] sm:$0xf0] }
 0x15e   :  { %898 = vmatpush.bf16.msrb.mxu1 %v3575_v12  ;;  %913 = vmatpush.bf16.msrb.mxu2 %v3499_v25  ;;  %v3667_v12 = vor.u32 %v4598_v2, %v3664_v3  ;;  %v4610_v2 = vld [vmem:[%s7277_s2 + $0xb4] sm:$0xf]  ;;  %v3712_v3 = vld [vmem:[%s7277_s2 + $0xb8] sm:$0xf0] }
 0x15f   :  { %1133 = vmatpush.bf16.msrb.mxu0 %v3679_v40  ;;  %1173 = vmatpush.bf16.msra.mxu3 %v3739_v10  ;;  %v4595_v40 = vld [vmem:[%s7277_s2 + $0x34] sm:$0xf0]  ;;  %v4609_v10 = vld [vmem:[%s7277_s2 + $0xa4] sm:$0xf0] }
 0x160   :  { %v3647_v42 = vor.u32 %v4595_v40, %v3646_v39  ;;  %v4635_v39 = vld [vmem:[%s7277_s2 + $0x74] sm:$0xf0]  ;;  %v4634_v40 = vld [vmem:[%s7277_s2 + $0x74] sm:$0xf] }
 0x162   :  { %899 = vmatpush.bf16.msrb.mxu1 %v3567_v24  ;;  %1159 = vmatpush.bf16.msra.mxu2 %v3683_v44  ;;  %v4594_v44 = vld [vmem:[%s7277_s2 + $0x34] sm:$0xf] }
 0x163   :  { %1134 = vmatpush.bf16.msrb.mxu0 %v3671_v48  ;;  %v3651_v47 = vor.u32 %v4594_v44, %v3648_v46  ;;  %v4612_v48 = vld [vmem:[%s7277_s2 + $0xc4] sm:$0xf]  ;;  %v4633_v44 = vld [vmem:[%s7277_s2 + $0x64] sm:$0xf0] }
 0x166   :  { %900 = vmatpush.bf16.msrb.mxu1 %v3559_v32  ;;  %1160 = vmatpush.bf16.msra.mxu2 %v3675_v55  ;;  %v3656_v32 = vld [vmem:[%s7277_s2 + $0x48] sm:$0xf0]  ;;  %v3639_v55 = vor.u32 %v4593_v53, %v3638_v51  ;;  %v4650_v53 = vld [vmem:[%s7277_s2 + $0xf4] sm:$0xf] }
 0x167   :  { %1135 = vmatpush.bf16.msrb.mxu0 %v3663_v9  ;;  %v3659_v34 = vor.u32 %v4596_v31, %v3656_v32  ;;  %v3686_v31 = vld [vmem:[%s7277_s2 + $0x80] sm:$0xf]  ;;  %v4605_v32 = vld [vmem:[%s7277_s2 + $0x84] sm:$0xf0]  ;;  %v3800_v51 = vld [vmem:[%s7277_s2 + $0x68] sm:$0xf0] }
 0x16a   :  { %1146 = vmatpush.bf16.msra.mxu1 %v3743_v49  ;;  %1161 = vmatpush.bf16.msra.mxu2 %v3667_v12  ;;  %v3720_v49 = vld [vmem:[%s7277_s2 + $0xc8] sm:$0xf0]  ;;  %v4590_v12 = vld [vmem:[%s7277_s2 + $0x14] sm:$0xf] }
 0x16b   :  { %v3723_v50 = vor.u32 %v4612_v48, %v3720_v49  ;;  %v4632_v48 = vld [vmem:[%s7277_s2 + $0x64] sm:$0xf]  ;;  %v3799_v49 = vor.u32 %v4633_v44, %v3798_v43  ;;  %v4645_v44 = vld [vmem:[%s7277_s2 + $0xc4] sm:$0xf0] }
 0x16e   :  { %1147 = vmatpush.bf16.msra.mxu1 %v3735_v5  ;;  %1162 = vmatpush.bf16.msra.mxu2 %v3659_v34  ;;  %v3630_v5 = vld [vmem:[%s7277_s2 + $0x10] sm:$0xf]  ;;  %v3687_v34 = vor.u32 %v4605_v32, %v3686_v31  ;;  %v4647_v31 = vld [vmem:[%s7277_s2 + $0xd4] sm:$0xf0]  ;;  %v4628_v32 = vld [vmem:[%s7277_s2 + $0x44] sm:$0xf] }
 0x16f   :  { %v3631_v9 = vor.u32 %v4591_v7, %v3630_v5  ;;  %v4648_v5 = vld [vmem:[%s7277_s2 + $0xe4] sm:$0xf]  ;;  %v3864_v7 = vld [vmem:[%s7277_s2 + $0xe8] sm:$0xf0] }
 0x172   :  { %1148 = vmatpush.bf16.msra.mxu1 %v3727_v33  ;;  %1163 = vmatpush.bf16.msra.mxu2 %v3651_v47  ;;  %v4604_v33 = vld [vmem:[%s7277_s2 + $0x84] sm:$0xf]  ;;  %v4651_v47 = vld [vmem:[%s7277_s2 + $0xf4] sm:$0xf0] }
 0x176   :  { %1149 = vmatpush.bf16.msra.mxu1 %v3719_v36  ;;  %1164 = vmatpush.bf16.msra.mxu2 %v3643_v0  ;;  %v3870_v36 = vld [vmem:[%s7277_s2 + $0xf0] sm:$0xf]  ;;  %v4649_v0 = vld [vmem:[%s7277_s2 + $0xe4] sm:$0xf0] }
 0x1c7   :  { %v636_v35 = vpop.f32.mrf.mxu0 }
 0x1cd   :  { %v662_v54 = vpop.f32.mrf.mxu2 }
 0x1cf   :  { %v638_v4 = vpop.f32.mrf.mxu0 }
 0x1d0   :  { %v3715_v4 = vor.u32 %v4610_v2, %v3712_v3  ;;  %v4630_v2 = vld [vmem:[%s7277_s2 + $0x54] sm:$0xf]  ;;  %v3792_v3 = vld [vmem:[%s7277_s2 + $0x58] sm:$0xf0] }
 0x1d5   :  { %v649_v13 = vpop.f32.mrf.mxu1  ;;  %v664_v14 = vpop.f32.mrf.mxu2 }
 0x1d6   :  { %v650_v15 = vadd.f32 %v649_v13, %v636_v35  ;;  %v4614_v35 = vld [vmem:[%s7277_s2 + $0xd4] sm:$0xf]  ;;  %v3632_v13 = vld [vmem:[%s7277_s2 + $0x18] sm:$0xf0]  ;;  %v3703_v14 = vor.u32 %v4609_v10, %v3702_v8  ;;  %v3791_v8 = vor.u32 %v4631_v62, %v3790_v58  ;;  %v4643_v58 = vld [vmem:[%s7277_s2 + $0xb4] sm:$0xf0] }
 0x1d7   :  { %v3731_v38 = vor.u32 %v4614_v35, %v3728_v37  ;;  %v3688_v35 = vld [vmem:[%s7277_s2 + $0x88] sm:$0xf0]  ;;  %v4624_v62 = vld [vmem:[%s7277_s2 + $0x24] sm:$0xf] }
 0x1d8   :  { %v679_v16 = vadd.f32 %v5170_v45, %v650_v15  ;;  %v3635_v15 = vor.u32 %v4590_v12, %v3632_v13  ;;  %v3691_v37 = vor.u32 %v4604_v33, %v3688_v35  ;;  %v3795_v12 = vor.u32 %v4630_v2, %v3792_v3  ;;  %v3784_v33 = vld [vmem:[%s7277_s2 + $0x48] sm:$0xf0]  ;;  %v4642_v3 = vld [vmem:[%s7277_s2 + $0xb4] sm:$0xf] }
 0x1d9   :  { %1174 = vmatpush.bf16.msra.mxu3 %v3731_v38  ;;  %v3806_v38 = vld [vmem:[%s7277_s2 + $0x70] sm:$0xf]  ;;  %v3787_v35 = vor.u32 %v4628_v32, %v3784_v33  ;;  %v4637_v32 = vld [vmem:[%s7277_s2 + $0x84] sm:$0xf0]  ;;  %v4636_v33 = vld [vmem:[%s7277_s2 + $0x84] sm:$0xf] }
 0x1da   :  { %v681_v17 = vadd.f32 %v679_v16, %v5410_v59  ;;  %v3654_v59 = vld [vmem:[%s7277_s2 + $0x40] sm:$0xf]  ;;  %v4608_v16 = vld [vmem:[%s7277_s2 + $0xa4] sm:$0xf]  ;;  %1165 = vmatpush.bf16.msra.mxu2 %v3635_v15  ;;  %v3807_v41 = vor.u32 %v4635_v39, %v3806_v38  ;;  %v3856_v38 = vld [vmem:[%s7277_s2 + $0xd8] sm:$0xf0] }
 0x1db   :  { %v675_v18 = vpop.f32.mrf.mxu3  ;;  %v3655_v29 = vor.u32 %v4597_v27, %v3654_v59 }
 0x1dc   :  { %4814 = vtanh.f32 %v681_v17  ;;  %v676_v19 = vadd.f32 %v675_v18, %v662_v54  ;;  %v3710_v54 = vld [vmem:[%s7277_s2 + $0xb0] sm:$0xf]  ;;  %v3704_v17 = vld [vmem:[%s7277_s2 + $0xa8] sm:$0xf0] }
 0x1dd   :  { %v651_v20 = vpop.f32.mrf.mxu1  ;;  %1136 = vmatpush.bf16.msrb.mxu0 %v3655_v29  ;;  %1175 = vmatpush.bf16.msra.mxu3 %v3723_v50  ;;  %v3711_v63 = vor.u32 %v4611_v56, %v3710_v54  ;;  %v3707_v18 = vor.u32 %v4608_v16, %v3704_v17  ;;  %v3696_v29 = vld [vmem:[%s7277_s2 + $0x98] sm:$0xf0]  ;;  %v3871_v50 = vor.u32 %v4651_v47, %v3870_v36 }
 0x1de   :  { %v684_v21 = vadd.f32 %v5403_v52, %v676_v19  ;;  %v3622_v19 = vld [vmem:[%s7277_s2] sm:$0xf]  ;;  %v4589_v20 = vld [vmem:[%s7277_s2 + $0x4] sm:$0xf0]  ;;  %v3699_v30 = vor.u32 %v4606_v28, %v3696_v29  ;;  %v3872_v54 = vld [vmem:[%s7277_s2 + $0xf8] sm:$0xf0] }
 0x1df   :  { %1150 = vmatpush.bf16.msra.mxu1 %v3711_v63  ;;  %v3875_v56 = vor.u32 %v4650_v53, %v3872_v54  ;;  %v3862_v63 = vld [vmem:[%s7277_s2 + $0xe0] sm:$0xf]  ;;  %v4629_v28 = vld [vmem:[%s7277_s2 + $0x44] sm:$0xf0]  ;;  %v3854_v29 = vld [vmem:[%s7277_s2 + $0xd0] sm:$0xf] }
 0x1e0   :  { %4816 = vtanh.f32 %v684_v21  ;;  %v3694_v21 = vld [vmem:[%s7277_s2 + $0x90] sm:$0xf]  ;;  %v3776_v36 = vld [vmem:[%s7277_s2 + $0x38] sm:$0xf0]  ;;  %v3766_v53 = vld [vmem:[%s7277_s2 + $0x20] sm:$0xf] }
 0x1e1   :  { %1137 = vmatpush.bf16.msrb.mxu0 %v3647_v42  ;;  %1176 = vmatpush.bf16.msra.mxu3 %v3715_v4  ;;  %v3808_v42 = vld [vmem:[%s7277_s2 + $0x78] sm:$0xf0]  ;;  %v3863_v4 = vor.u32 %v4649_v0, %v3862_v63  ;;  %v4625_v54 = vld [vmem:[%s7277_s2 + $0x24] sm:$0xf0]  ;;  %v3768_v63 = vld [vmem:[%s7277_s2 + $0x28] sm:$0xf0] }
 0x1e2   :  { %v4815_v22 = vpop.eup %4814  ;;  %v3811_v46 = vor.u32 %v4634_v40, %v3808_v42  ;;  %v3774_v40 = vld [vmem:[%s7277_s2 + $0x30] sm:$0xf]  ;;  %v3846_v42 = vld [vmem:[%s7277_s2 + $0xc0] sm:$0xf]  ;;  %v3771_v2 = vor.u32 %v4624_v62, %v3768_v63  ;;  %v4663_v62 = vld [vmem:[%s7277_s2 + $0x54] sm:$0xf0] }
 0x1e3   :  { %v683_v23 = vpack.c.bf16 %v4815_v22, %v4815_v22  ;;  %v677_v24 = vpop.f32.mrf.mxu3  ;;  %1151 = vmatpush.bf16.msra.mxu1 %v3703_v14  ;;  %v3623_v22 = vor.u32 %v4589_v20, %v3622_v19  ;;  %v3847_v47 = vor.u32 %v4645_v44, %v3846_v42  ;;  %v3936_v42 = vld [vmem:[%s7277_s2 + $0x78] sm:$0xf0]  ;;  %v4665_v44 = vld [vmem:[%s7277_s2 + $0x64] sm:$0xf0]  ;;  %v3990_v63 = vld [vmem:[%s7277_s2 + $0xe0] sm:$0xf] }
 0x1e4   :  { %v4588_v24 = vld [vmem:[%s7277_s2 + $0x4] sm:$0xf] }
 0x1e5   :  { %888 = vmatmul.bf16.vlgmr.msra.gmra.mxu0 %v683_v23  ;;  %914 = vmatmul.bf16.vlgmr.msrb.gmra.mxu2 %v683_v23  ;;  %v4607_v23 = vld [vmem:[%s7277_s2 + $0x94] sm:$0xf0] }
 0x1e6   :  { %v5665_v25 = vpop.eup %4816  ;;  %1138 = vmatpush.bf16.msrb.mxu0 %v3639_v55  ;;  %1177 = vmatpush.bf16.msra.mxu3 %v3707_v18  ;;  %v3695_v59 = vor.u32 %v4607_v23, %v3694_v21  ;;  %v3803_v55 = vor.u32 %v4632_v48, %v3800_v51 }
 0x1e7   :  { %v686_v26 = vpack.c.bf16 %v5665_v25, %v5665_v25 }
 0x1e8   :  { %1152 = vmatpush.bf16.msra.mxu1 %v3695_v59 }
 0x1e9   :  { %901 = vmatmul.bf16.vlgmr.msrb.gmra.mxu1 %v686_v26  ;;  %927 = vmatmul.bf16.vlgmr.msrb.gmra.mxu3 %v686_v26  ;;  %v3624_v26 = vld [vmem:[%s7277_s2 + $0x8] sm:$0xf0] }
 0x1ea   :  { %1139 = vmatpush.bf16.msrb.mxu0 %v3631_v9  ;;  %v3627_v27 = vor.u32 %v4588_v24, %v3624_v26  ;;  %1178 = vmatpush.bf16.msra.mxu3 %v3699_v30  ;;  %v3867_v9 = vor.u32 %v4648_v5, %v3864_v7  ;;  %v3758_v7 = vld [vmem:[%s7277_s2 + $0x10] sm:$0xf] }
 0x1ec   :  { %1166 = vmatpush.bf16.msra.mxu2 %v3627_v27  ;;  %1153 = vmatpush.bf16.msra.mxu1 %v3687_v34  ;;  %v3855_v34 = vor.u32 %v4647_v31, %v3854_v29  ;;  %v3824_v29 = vld [vmem:[%s7277_s2 + $0x98] sm:$0xf0]  ;;  %v3814_v31 = vld [vmem:[%s7277_s2 + $0x80] sm:$0xf] }
 0x1ee   :  { %1140 = vmatpush.bf16.msrb.mxu0 %v3623_v22  ;;  %1179 = vmatpush.bf16.msra.mxu3 %v3691_v37  ;;  %v4646_v37 = vld [vmem:[%s7277_s2 + $0xd4] sm:$0xf] }
 0x1ef   :  { %v3859_v39 = vor.u32 %v4646_v37, %v3856_v38  ;;  %v3934_v38 = vld [vmem:[%s7277_s2 + $0x70] sm:$0xf] }
 0x1f0   :  { %1412 = vmatpush.bf16.msrb.mxu2 %v3811_v46  ;;  %1399 = vmatpush.bf16.msrb.mxu1 %v3871_v50  ;;  %v4626_v46 = vld [vmem:[%s7277_s2 + $0x34] sm:$0xf]  ;;  %v3848_v50 = vld [vmem:[%s7277_s2 + $0xc8] sm:$0xf0] }
 0x1f1   :  { %v3779_v48 = vor.u32 %v4626_v46, %v3776_v36  ;;  %v3998_v36 = vld [vmem:[%s7277_s2 + $0xf0] sm:$0xf] }
 0x1f2   :  { %1386 = vmatpush.bf16.msra.mxu0 %v3807_v41  ;;  %1425 = vmatpush.bf16.msrb.mxu3 %v3875_v56  ;;  %v4627_v41 = vld [vmem:[%s7277_s2 + $0x34] sm:$0xf0]  ;;  %v3767_v56 = vor.u32 %v4625_v54, %v3766_v53  ;;  %v4682_v53 = vld [vmem:[%s7277_s2 + $0xf4] sm:$0xf]  ;;  %v4000_v54 = vld [vmem:[%s7277_s2 + $0xf8] sm:$0xf0] }
 0x1f3   :  { %v3775_v43 = vor.u32 %v4627_v41, %v3774_v40  ;;  %v4666_v40 = vld [vmem:[%s7277_s2 + $0x74] sm:$0xf] }
 0x1f4   :  { %1413 = vmatpush.bf16.msrb.mxu2 %v3803_v55  ;;  %1400 = vmatpush.bf16.msrb.mxu1 %v3863_v4  ;;  %v3838_v55 = vld [vmem:[%s7277_s2 + $0xb0] sm:$0xf]  ;;  %v3840_v4 = vld [vmem:[%s7277_s2 + $0xb8] sm:$0xf0]  ;;  %v3939_v46 = vor.u32 %v4666_v40, %v3936_v42  ;;  %v3974_v42 = vld [vmem:[%s7277_s2 + $0xc0] sm:$0xf] }
 0x1f5   :  { %v3839_v0 = vor.u32 %v4643_v58, %v3838_v55  ;;  %v3843_v5 = vor.u32 %v4642_v3, %v3840_v4  ;;  %v3918_v58 = vld [vmem:[%s7277_s2 + $0x50] sm:$0xf]  ;;  %v3920_v3 = vld [vmem:[%s7277_s2 + $0x58] sm:$0xf0] }
 0x1f6   :  { %1387 = vmatpush.bf16.msra.mxu0 %v3799_v49  ;;  %1426 = vmatpush.bf16.msrb.mxu3 %v3867_v9  ;;  %v4644_v49 = vld [vmem:[%s7277_s2 + $0xc4] sm:$0xf]  ;;  %v3830_v9 = vld [vmem:[%s7277_s2 + $0xa0] sm:$0xf]  ;;  %v3902_v40 = vld [vmem:[%s7277_s2 + $0x30] sm:$0xf] }
 0x1f7   :  { %v3851_v51 = vor.u32 %v4644_v49, %v3848_v50 }
 0x1f8   :  { %1414 = vmatpush.bf16.msrb.mxu2 %v3795_v12  ;;  %1401 = vmatpush.bf16.msrb.mxu1 %v3855_v34  ;;  %v4641_v12 = vld [vmem:[%s7277_s2 + $0xa4] sm:$0xf0]  ;;  %v3815_v34 = vor.u32 %v4637_v32, %v3814_v31  ;;  %v4679_v31 = vld [vmem:[%s7277_s2 + $0xd4] sm:$0xf0]  ;;  %v4660_v32 = vld [vmem:[%s7277_s2 + $0x44] sm:$0xf] }
 0x1fa   :  { %1388 = vmatpush.bf16.msra.mxu0 %v3791_v8  ;;  %1427 = vmatpush.bf16.msrb.mxu3 %v3859_v39  ;;  %v4623_v8 = vld [vmem:[%s7277_s2 + $0x14] sm:$0xf0] }
 0x1fb   :  { %v4667_v39 = vld [vmem:[%s7277_s2 + $0x74] sm:$0xf0] }
 0x1fc   :  { %1415 = vmatpush.bf16.msrb.mxu2 %v3787_v35  ;;  %1402 = vmatpush.bf16.msrb.mxu1 %v3847_v47  ;;  %v3816_v35 = vld [vmem:[%s7277_s2 + $0x88] sm:$0xf0]  ;;  %v3935_v41 = vor.u32 %v4667_v39, %v3934_v38  ;;  %v4683_v47 = vld [vmem:[%s7277_s2 + $0xf4] sm:$0xf0]  ;;  %v3984_v38 = vld [vmem:[%s7277_s2 + $0xd8] sm:$0xf0] }
 0x1fd   :  { %v3819_v37 = vor.u32 %v4636_v33, %v3816_v35  ;;  %v3999_v50 = vor.u32 %v4683_v47, %v3998_v36  ;;  %v3912_v33 = vld [vmem:[%s7277_s2 + $0x48] sm:$0xf0]  ;;  %v3904_v36 = vld [vmem:[%s7277_s2 + $0x38] sm:$0xf0] }
 0x1fe   :  { %1428 = vmatpush.bf16.msrb.mxu3 %v3851_v51  ;;  %v3928_v51 = vld [vmem:[%s7277_s2 + $0x68] sm:$0xf0]  ;;  %v3915_v35 = vor.u32 %v4660_v32, %v3912_v33  ;;  %v4669_v32 = vld [vmem:[%s7277_s2 + $0x84] sm:$0xf0]  ;;  %v4668_v33 = vld [vmem:[%s7277_s2 + $0x84] sm:$0xf] }
 0x200   :  { %1416 = vmatpush.bf16.msrb.mxu2 %v3779_v48  ;;  %1403 = vmatpush.bf16.msrb.mxu1 %v3839_v0  ;;  %v4664_v48 = vld [vmem:[%s7277_s2 + $0x64] sm:$0xf]  ;;  %v4681_v0 = vld [vmem:[%s7277_s2 + $0xe4] sm:$0xf0] }
 0x201   :  { %v3931_v55 = vor.u32 %v4664_v48, %v3928_v51  ;;  %v3991_v4 = vor.u32 %v4681_v0, %v3990_v63  ;;  %v3896_v63 = vld [vmem:[%s7277_s2 + $0x28] sm:$0xf0] }
 0x202   :  { %1429 = vmatpush.bf16.msrb.mxu3 %v3843_v5  ;;  %v4680_v5 = vld [vmem:[%s7277_s2 + $0xe4] sm:$0xf] }
 0x204   :  { %1417 = vmatpush.bf16.msrb.mxu2 %v3771_v2  ;;  %v4662_v2 = vld [vmem:[%s7277_s2 + $0x54] sm:$0xf] }
 0x262   :  { %v889_v10 = vpop.f32.mrf.mxu0 }
 0x266   :  { %v902_v13 = vpop.f32.mrf.mxu1 }
 0x267   :  { %v903_v14 = vadd.f32 %v902_v13, %v889_v10  ;;  %v3759_v10 = vor.u32 %v4623_v8, %v3758_v7  ;;  %v4622_v13 = vld [vmem:[%s7277_s2 + $0x14] sm:$0xf]  ;;  %v3992_v7 = vld [vmem:[%s7277_s2 + $0xe8] sm:$0xf0]  ;;  %v3919_v8 = vor.u32 %v4663_v62, %v3918_v58  ;;  %v4675_v58 = vld [vmem:[%s7277_s2 + $0xb4] sm:$0xf0] }
 0x268   :  { %v915_v15 = vpop.f32.mrf.mxu2  ;;  %v4656_v62 = vld [vmem:[%s7277_s2 + $0x24] sm:$0xf] }
 0x269   :  { %v932_v16 = vadd.f32 %v5170_v45, %v903_v14  ;;  %v3760_v14 = vld [vmem:[%s7277_s2 + $0x18] sm:$0xf0] }
 0x26a   :  { %v891_v17 = vpop.f32.mrf.mxu0 }
 0x26b   :  { %v934_v18 = vadd.f32 %v932_v16, %v5412_v60  ;;  %v3782_v60 = vld [vmem:[%s7277_s2 + $0x40] sm:$0xf]  ;;  %v3763_v16 = vor.u32 %v4622_v13, %v3760_v14  ;;  %v4640_v17 = vld [vmem:[%s7277_s2 + $0xa4] sm:$0xf] }
 0x26c   :  { %v928_v19 = vpop.f32.mrf.mxu3  ;;  %v3783_v30 = vor.u32 %v4629_v28, %v3782_v60  ;;  %v4638_v28 = vld [vmem:[%s7277_s2 + $0x94] sm:$0xf] }
 0x26d   :  { %4818 = vtanh.f32 %v934_v18  ;;  %v929_v20 = vadd.f32 %v928_v19, %v915_v15  ;;  %v3831_v15 = vor.u32 %v4641_v12, %v3830_v9  ;;  %v3832_v18 = vld [vmem:[%s7277_s2 + $0xa8] sm:$0xf0]  ;;  %1418 = vmatpush.bf16.msrb.mxu2 %v3763_v16  ;;  %v3995_v9 = vor.u32 %v4680_v5, %v3992_v7  ;;  %v6063_v16 = vld [vmem:[%s7280_s3] ss:$0 sm:$0xff]  ;;  %v3886_v7 = vld [vmem:[%s7277_s2 + $0x10] sm:$0xf] }
 0x26e   :  { %v904_v21 = vpop.f32.mrf.mxu1  ;;  %1389 = vmatpush.bf16.msra.mxu0 %v3783_v30  ;;  %v3835_v19 = vor.u32 %v4640_v17, %v3832_v18  ;;  %v3827_v30 = vor.u32 %v4638_v28, %v3824_v29  ;;  %v3923_v12 = vor.u32 %v4662_v2, %v3920_v3  ;;  %v3982_v29 = vld [vmem:[%s7277_s2 + $0xd0] sm:$0xf]  ;;  %v3899_v2 = vor.u32 %v4656_v62, %v3896_v63  ;;  %v4674_v3 = vld [vmem:[%s7277_s2 + $0xb4] sm:$0xf] }
 0x26f   :  { %v937_v22 = vadd.f32 %v5403_v52, %v929_v20  ;;  %1404 = vmatpush.bf16.msrb.mxu1 %v3831_v15  ;;  %v3750_v20 = vld [vmem:[%s7277_s2] sm:$0xf]  ;;  %v4621_v21 = vld [vmem:[%s7277_s2 + $0x4] sm:$0xf0] }
 0x270   :  { %v917_v23 = vpop.f32.mrf.mxu2  ;;  %1430 = vmatpush.bf16.msrb.mxu3 %v3835_v19 }
 0x271   :  { %4820 = vtanh.f32 %v937_v22  ;;  %v3822_v22 = vld [vmem:[%s7277_s2 + $0x90] sm:$0xf]  ;;  %v3751_v23 = vor.u32 %v4621_v21, %v3750_v20 }
 0x272   :  { %1390 = vmatpush.bf16.msra.mxu0 %v3775_v43  ;;  %v3926_v43 = vld [vmem:[%s7277_s2 + $0x60] sm:$0xf] }
 0x273   :  { %v4819_v24 = vpop.eup %4818  ;;  %v3927_v49 = vor.u32 %v4665_v44, %v3926_v43  ;;  %v4677_v44 = vld [vmem:[%s7277_s2 + $0xc4] sm:$0xf0] }
 0x274   :  { %v936_v26 = vpack.c.bf16 %v4819_v24, %v4819_v24  ;;  %v930_v59 = vpop.f32.mrf.mxu3  ;;  %v4639_v24 = vld [vmem:[%s7277_s2 + $0x94] sm:$0xf0]  ;;  %1431 = vmatpush.bf16.msrb.mxu3 %v3827_v30  ;;  %v3975_v47 = vor.u32 %v4677_v44, %v3974_v42  ;;  %v4056_v42 = vld [vmem:[%s7277_s2 + $0x68] sm:$0xf0] }
 0x275   :  { %v3752_v59 = vld [vmem:[%s7277_s2 + $0x8] sm:$0xf0] }
 0x276   :  { %1141 = vmatmul.bf16.vlgmr.msrb.gmra.mxu0 %v936_v26  ;;  %1167 = vmatmul.bf16.vlgmr.msra.gmra.mxu2 %v936_v26  ;;  %v4620_v26 = vld [vmem:[%s7277_s2 + $0x4] sm:$0xf] }
 0x277   :  { %v5864_v27 = vpop.eup %4820  ;;  %1391 = vmatpush.bf16.msra.mxu0 %v3767_v56  ;;  %v3755_v60 = vor.u32 %v4620_v26, %v3752_v59  ;;  %v4003_v56 = vor.u32 %v4682_v53, %v4000_v54  ;;  %v3894_v53 = vld [vmem:[%s7277_s2 + $0x20] sm:$0xf]  ;;  %v4657_v54 = vld [vmem:[%s7277_s2 + $0x24] sm:$0xf0] }
 0x278   :  { %v939_v45 = vpack.c.bf16 %v5864_v27, %v5864_v27  ;;  %1432 = vmatpush.bf16.msrb.mxu3 %v3819_v37  ;;  %v4678_v37 = vld [vmem:[%s7277_s2 + $0xd4] sm:$0xf] }
 0x279   :  { %1419 = vmatpush.bf16.msrb.mxu2 %v3755_v60  ;;  %v3987_v39 = vor.u32 %v4678_v37, %v3984_v38  ;;  %v4698_v38 = vld [vmem:[%s7277_s2 + $0x74] sm:$0xf] }
 0x27a   :  { %1154 = vmatmul.bf16.vlgmr.msra.gmra.mxu1 %v939_v45  ;;  %1180 = vmatmul.bf16.vlgmr.msra.gmra.mxu3 %v939_v45  ;;  %v3823_v45 = vor.u32 %v4639_v24, %v3822_v22 }
 0x27b   :  { %1392 = vmatpush.bf16.msra.mxu0 %v3759_v10 }
 0x27c   :  { %1405 = vmatpush.bf16.msrb.mxu1 %v3823_v45  ;;  %1678 = vmatpush.bf16.msra.mxu3 %v4003_v56  ;;  %v3895_v56 = vor.u32 %v4657_v54, %v3894_v53  ;;  %v4715_v53 = vld [vmem:[%s7277_s2 + $0xf4] sm:$0xf0]  ;;  %v4714_v54 = vld [vmem:[%s7277_s2 + $0xf4] sm:$0xf] }
 0x27d   :  { %1665 = vmatpush.bf16.msra.mxu2 %v3939_v46  ;;  %v4658_v46 = vld [vmem:[%s7277_s2 + $0x34] sm:$0xf] }
 0x27e   :  { %v3907_v48 = vor.u32 %v4658_v46, %v3904_v36  ;;  %v4694_v46 = vld [vmem:[%s7277_s2 + $0x54] sm:$0xf]  ;;  %v4048_v36 = vld [vmem:[%s7277_s2 + $0x58] sm:$0xf0] }
 0x27f   :  { %1393 = vmatpush.bf16.msra.mxu0 %v3751_v23 }
 0x280   :  { %1406 = vmatpush.bf16.msrb.mxu1 %v3815_v34  ;;  %1679 = vmatpush.bf16.msra.mxu3 %v3995_v9  ;;  %v3983_v34 = vor.u32 %v4679_v31, %v3982_v29  ;;  %v3958_v9 = vld [vmem:[%s7277_s2 + $0xa0] sm:$0xf]  ;;  %v3952_v29 = vld [vmem:[%s7277_s2 + $0x98] sm:$0xf0] }
 0x281   :  { %1666 = vmatpush.bf16.msra.mxu2 %v3931_v55  ;;  %v3966_v55 = vld [vmem:[%s7277_s2 + $0xb0] sm:$0xf]  ;;  %v3942_v31 = vld [vmem:[%s7277_s2 + $0x80] sm:$0xf] }
 0x282   :  { %v3967_v0 = vor.u32 %v4675_v58, %v3966_v55  ;;  %v4128_v55 = vld [vmem:[%s7277_s2 + $0xf8] sm:$0xf0] }
 0x283   :  { %1639 = vmatpush.bf16.msrb.mxu0 %v3935_v41  ;;  %v4659_v41 = vld [vmem:[%s7277_s2 + $0x34] sm:$0xf0]  ;;  %v4131_v63 = vor.u32 %v4714_v54, %v4128_v55  ;;  %v4030_v54 = vld [vmem:[%s7277_s2 + $0x30] sm:$0xf] }
 0x284   :  { %1652 = vmatpush.bf16.msra.mxu1 %v3999_v50  ;;  %1680 = vmatpush.bf16.msra.mxu3 %v3987_v39  ;;  %v3903_v43 = vor.u32 %v4659_v41, %v3902_v40  ;;  %v3976_v50 = vld [vmem:[%s7277_s2 + $0xc8] sm:$0xf0]  ;;  %v4064_v39 = vld [vmem:[%s7277_s2 + $0x78] sm:$0xf0]  ;;  %v4696_v40 = vld [vmem:[%s7277_s2 + $0x64] sm:$0xf] }
 0x285   :  { %1667 = vmatpush.bf16.msra.mxu2 %v3923_v12  ;;  %v4673_v12 = vld [vmem:[%s7277_s2 + $0xa4] sm:$0xf0]  ;;  %v4067_v41 = vor.u32 %v4698_v38, %v4064_v39  ;;  %v4059_v44 = vor.u32 %v4696_v40, %v4056_v42  ;;  %v4686_v38 = vld [vmem:[%s7277_s2 + $0x14] sm:$0xf]  ;;  %v4016_v39 = vld [vmem:[%s7277_s2 + $0x18] sm:$0xf0] }
 0x286   :  { %v4019_v40 = vor.u32 %v4686_v38, %v4016_v39  ;;  %v4693_v42 = vld [vmem:[%s7277_s2 + $0x44] sm:$0xf0]  ;;  %v4691_v55 = vld [vmem:[%s7277_s2 + $0x34] sm:$0xf0]  ;;  %v4070_v38 = vld [vmem:[%s7277_s2 + $0x80] sm:$0xf] }
 0x287   :  { %1640 = vmatpush.bf16.msrb.mxu0 %v3927_v49  ;;  %v4676_v49 = vld [vmem:[%s7277_s2 + $0xc4] sm:$0xf]  ;;  %v4701_v39 = vld [vmem:[%s7277_s2 + $0x84] sm:$0xf0] }
 0x288   :  { %1653 = vmatpush.bf16.msra.mxu1 %v3991_v4  ;;  %v3979_v51 = vor.u32 %v4676_v49, %v3976_v50  ;;  %v3968_v4 = vld [vmem:[%s7277_s2 + $0xb8] sm:$0xf0]  ;;  %v4054_v49 = vld [vmem:[%s7277_s2 + $0x60] sm:$0xf]  ;;  %v4697_v50 = vld [vmem:[%s7277_s2 + $0x64] sm:$0xf0] }
 0x289   :  { %1668 = vmatpush.bf16.msra.mxu2 %v3915_v35  ;;  %v3971_v5 = vor.u32 %v4674_v3, %v3968_v4  ;;  %v3944_v35 = vld [vmem:[%s7277_s2 + $0x88] sm:$0xf0]  ;;  %v4055_v58 = vor.u32 %v4697_v50, %v4054_v49  ;;  %v4695_v3 = vld [vmem:[%s7277_s2 + $0x54] sm:$0xf0]  ;;  %v4118_v4 = vld [vmem:[%s7277_s2 + $0xe0] sm:$0xf] }
 0x28a   :  { %1681 = vmatpush.bf16.msra.mxu3 %v3979_v51  ;;  %v3947_v37 = vor.u32 %v4668_v33, %v3944_v35  ;;  %v4126_v51 = vld [vmem:[%s7277_s2 + $0xf0] sm:$0xf]  ;;  %v4684_v50 = vld [vmem:[%s7277_s2 + $0x4] sm:$0xf] }
 0x28b   :  { %1641 = vmatpush.bf16.msrb.mxu0 %v3919_v8  ;;  %v4655_v8 = vld [vmem:[%s7277_s2 + $0x14] sm:$0xf0]  ;;  %v4127_v62 = vor.u32 %v4715_v53, %v4126_v51  ;;  %v4008_v51 = vld [vmem:[%s7277_s2 + $0x8] sm:$0xf0] }
 0x28c   :  { %1654 = vmatpush.bf16.msra.mxu1 %v3983_v34  ;;  %v3943_v34 = vor.u32 %v4669_v32, %v3942_v31  ;;  %v4011_v53 = vor.u32 %v4684_v50, %v4008_v51 }
 0x28d   :  { %1669 = vmatpush.bf16.msra.mxu2 %v3907_v48 }
 0x28e   :  { %1682 = vmatpush.bf16.msra.mxu3 %v3971_v5  ;;  %v4713_v5 = vld [vmem:[%s7277_s2 + $0xe4] sm:$0xf0] }
 0x290   :  { %1655 = vmatpush.bf16.msra.mxu1 %v3975_v47  ;;  %v4699_v47 = vld [vmem:[%s7277_s2 + $0x74] sm:$0xf0] }
 0x291   :  { %1670 = vmatpush.bf16.msra.mxu2 %v3899_v2  ;;  %v4051_v2 = vor.u32 %v4694_v46, %v4048_v36  ;;  %v4711_v46 = vld [vmem:[%s7277_s2 + $0xd4] sm:$0xf0]  ;;  %v4710_v36 = vld [vmem:[%s7277_s2 + $0xd4] sm:$0xf] }
 0x294   :  { %1656 = vmatpush.bf16.msra.mxu1 %v3967_v0  ;;  %v4046_v0 = vld [vmem:[%s7277_s2 + $0x50] sm:$0xf] }
 0x2f3   :  { %v1142_v10 = vpop.f32.mrf.mxu0 }
 0x2f7   :  { %v1155_v13 = vpop.f32.mrf.mxu1 }
 0x2f8   :  { %v1156_v14 = vadd.f32 %v1155_v13, %v1142_v10  ;;  %v3887_v10 = vor.u32 %v4655_v8, %v3886_v7  ;;  %v4654_v13 = vld [vmem:[%s7277_s2 + $0x14] sm:$0xf]  ;;  %v4040_v8 = vld [vmem:[%s7277_s2 + $0x48] sm:$0xf0] }
 0x2f9   :  { %v1168_v15 = vpop.f32.mrf.mxu2 }
 0x2fa   :  { %v1185_v17 = vadd.f32 %v6063_v16, %v1156_v14  ;;  %v3888_v14 = vld [vmem:[%s7277_s2 + $0x18] sm:$0xf0] }
 0x2fb   :  { %v1144_v18 = vpop.f32.mrf.mxu0 }
 0x2fc   :  { %v1187_v19 = vadd.f32 %v1185_v17, %v5414_v61  ;;  %v3910_v61 = vld [vmem:[%s7277_s2 + $0x40] sm:$0xf]  ;;  %v3891_v17 = vor.u32 %v4654_v13, %v3888_v14  ;;  %v4672_v18 = vld [vmem:[%s7277_s2 + $0xa4] sm:$0xf]  ;;  %v4047_v14 = vor.u32 %v4695_v3, %v4046_v0  ;;  %v4104_v0 = vld [vmem:[%s7277_s2 + $0xc8] sm:$0xf0] }
 0x2fd   :  { %v1181_v20 = vpop.f32.mrf.mxu3 }
 0x2fe   :  { %4822 = vtanh.f32 %v1187_v19  ;;  %v1182_v21 = vadd.f32 %v1181_v20, %v1168_v15  ;;  %v3959_v15 = vor.u32 %v4673_v12, %v3958_v9  ;;  %v3960_v19 = vld [vmem:[%s7277_s2 + $0xa8] sm:$0xf0]  ;;  %1671 = vmatpush.bf16.msra.mxu2 %v3891_v17  ;;  %v4119_v9 = vor.u32 %v4713_v5, %v4118_v4  ;;  %v4739_v4 = vld [vmem:[%s7278_s1 + $0x38] sm:$0xff]  ;;  %v4022_v5 = vld [vmem:[%s7277_s2 + $0x20] sm:$0xf] }
 0x2ff   :  { %v1157_v22 = vpop.f32.mrf.mxu1  ;;  %v3963_v20 = vor.u32 %v4672_v18, %v3960_v19  ;;  %v4120_v12 = vld [vmem:[%s7277_s2 + $0xe8] sm:$0xf0]  ;;  %v4690_v18 = vld [vmem:[%s7277_s2 + $0x34] sm:$0xf]  ;;  %v4032_v19 = vld [vmem:[%s7277_s2 + $0x38] sm:$0xf0] }
 0x300   :  { %v1190_v23 = vadd.f32 %v5403_v52, %v1182_v21  ;;  %v4661_v52 = vld [vmem:[%s7277_s2 + $0x44] sm:$0xf0]  ;;  %1657 = vmatpush.bf16.msra.mxu1 %v3959_v15  ;;  %v3878_v21 = vld [vmem:[%s7277_s2] sm:$0xf] }
 0x301   :  { %v1170_v24 = vpop.f32.mrf.mxu2  ;;  %v3911_v30 = vor.u32 %v4661_v52, %v3910_v61  ;;  %v4653_v22 = vld [vmem:[%s7277_s2 + $0x4] sm:$0xf0]  ;;  %1683 = vmatpush.bf16.msra.mxu3 %v3963_v20  ;;  %v4670_v52 = vld [vmem:[%s7277_s2 + $0x94] sm:$0xf] }
 0x302   :  { %4824 = vtanh.f32 %v1190_v23  ;;  %v3950_v23 = vld [vmem:[%s7277_s2 + $0x90] sm:$0xf]  ;;  %v3879_v24 = vor.u32 %v4653_v22, %v3878_v21 }
 0x303   :  { %1642 = vmatpush.bf16.msrb.mxu0 %v3911_v30  ;;  %v3955_v30 = vor.u32 %v4670_v52, %v3952_v29 }
 0x304   :  { %v4823_v26 = vpop.eup %4822 }
 0x305   :  { %v1189_v59 = vpack.c.bf16 %v4823_v26, %v4823_v26  ;;  %v1183_v45 = vpop.f32.mrf.mxu3  ;;  %v4671_v26 = vld [vmem:[%s7277_s2 + $0x94] sm:$0xf0]  ;;  %1684 = vmatpush.bf16.msra.mxu3 %v3955_v30  ;;  %v6287_v30 = vld [vmem:[%s7280_s3 + $0x1] ss:$0 sm:$0xff] }
 0x306   :  { %v3880_v45 = vld [vmem:[%s7277_s2 + $0x8] sm:$0xf0] }
 0x307   :  { %1394 = vmatmul.bf16.vlgmr.msra.gmra.mxu0 %v1189_v59  ;;  %1420 = vmatmul.bf16.vlgmr.msrb.gmra.mxu2 %v1189_v59  ;;  %v4652_v59 = vld [vmem:[%s7277_s2 + $0x4] sm:$0xf] }
 0x308   :  { %v6068_v60 = vpop.eup %4824  ;;  %1643 = vmatpush.bf16.msrb.mxu0 %v3903_v43  ;;  %v3883_v61 = vor.u32 %v4652_v59, %v3880_v45  ;;  %v4062_v43 = vld [vmem:[%s7277_s2 + $0x70] sm:$0xf]  ;;  %v4024_v59 = vld [vmem:[%s7277_s2 + $0x28] sm:$0xf0] }
 0x309   :  { %v1192_v28 = vpack.c.bf16 %v6068_v60, %v6068_v60  ;;  %1685 = vmatpush.bf16.msra.mxu3 %v3947_v37  ;;  %v4063_v48 = vor.u32 %v4699_v47, %v4062_v43  ;;  %v4110_v43 = vld [vmem:[%s7277_s2 + $0xd0] sm:$0xf]  ;;  %v4112_v47 = vld [vmem:[%s7277_s2 + $0xd8] sm:$0xf0] }
 0x30a   :  { %1672 = vmatpush.bf16.msra.mxu2 %v3883_v61  ;;  %v4115_v49 = vor.u32 %v4710_v36, %v4112_v47  ;;  %v4733_v36 = vld [vmem:[%s7278_s1 + $0x8] sm:$0xff]  ;;  %v4732_v47 = vld [vmem:[%s7278_s1] sm:$0xff] }
 0x30b   :  { %1407 = vmatmul.bf16.vlgmr.msrb.gmra.mxu1 %v1192_v28  ;;  %1433 = vmatmul.bf16.vlgmr.msrb.gmra.mxu3 %v1192_v28  ;;  %v3951_v28 = vor.u32 %v4671_v26, %v3950_v23  ;;  %v4035_v23 = vor.u32 %v4690_v18, %v4032_v19  ;;  %v4688_v26 = vld [vmem:[%s7277_s2 + $0x24] sm:$0xf]  ;;  %v4014_v18 = vld [vmem:[%s7277_s2 + $0x10] sm:$0xf]  ;;  %v4687_v19 = vld [vmem:[%s7277_s2 + $0x14] sm:$0xf0] }
 0x30c   :  { %1644 = vmatpush.bf16.msrb.mxu0 %v3895_v56  ;;  %v4692_v56 = vld [vmem:[%s7277_s2 + $0x44] sm:$0xf]  ;;  %v4027_v52 = vor.u32 %v4688_v26, %v4024_v59 }
 0x30d   :  { %1658 = vmatpush.bf16.msra.mxu1 %v3951_v28  ;;  %1931 = vmatpush.bf16.msrb.mxu3 %v4131_v63  ;;  %v4043_v15 = vor.u32 %v4692_v56, %v4040_v8  ;;  %v4102_v56 = vld [vmem:[%s7277_s2 + $0xc0] sm:$0xf]  ;;  %v4708_v63 = vld [vmem:[%s7277_s2 + $0xc4] sm:$0xf]  ;;  %v4094_v8 = vld [vmem:[%s7277_s2 + $0xb0] sm:$0xf] }
 0x30e   :  { %1918 = vmatpush.bf16.msrb.mxu2 %v4067_v41  ;;  %v4038_v41 = vld [vmem:[%s7277_s2 + $0x40] sm:$0xf]  ;;  %v4107_v3 = vor.u32 %v4708_v63, %v4104_v0 }
 0x310   :  { %1645 = vmatpush.bf16.msrb.mxu0 %v3887_v10  ;;  %v4712_v10 = vld [vmem:[%s7277_s2 + $0xe4] sm:$0xf] }
 0x311   :  { %1659 = vmatpush.bf16.msra.mxu1 %v3943_v34  ;;  %v4123_v13 = vor.u32 %v4712_v10, %v4120_v12  ;;  %v4707_v10 = vld [vmem:[%s7277_s2 + $0xb4] sm:$0xf0]  ;;  %v4706_v12 = vld [vmem:[%s7277_s2 + $0xb4] sm:$0xf] }
 0x312   :  { %1919 = vmatpush.bf16.msrb.mxu2 %v4059_v44  ;;  %v4039_v44 = vor.u32 %v4693_v42, %v4038_v41  ;;  %v4071_v41 = vor.u32 %v4701_v39, %v4070_v38  ;;  %v4072_v42 = vld [vmem:[%s7277_s2 + $0x88] sm:$0xf0] }
 0x313   :  { %1932 = vmatpush.bf16.msrb.mxu3 %v4123_v13  ;;  %v4096_v13 = vld [vmem:[%s7277_s2 + $0xb8] sm:$0xf0] }
 0x314   :  { %1646 = vmatpush.bf16.msrb.mxu0 %v3879_v24 }
 0x315   :  { %1905 = vmatpush.bf16.msrb.mxu1 %v4127_v62  ;;  %v4709_v62 = vld [vmem:[%s7277_s2 + $0xc4] sm:$0xf0] }
 0x316   :  { %1920 = vmatpush.bf16.msrb.mxu2 %v4051_v2  ;;  %v4103_v2 = vor.u32 %v4709_v62, %v4102_v56 }
 0x317   :  { %1933 = vmatpush.bf16.msrb.mxu3 %v4115_v49 }
 0x318   :  { %1892 = vmatpush.bf16.msra.mxu0 %v4063_v48  ;;  %v4111_v48 = vor.u32 %v4711_v46, %v4110_v43  ;;  %v4735_v43 = vld [vmem:[%s7278_s1 + $0x18] sm:$0xff]  ;;  %v4734_v46 = vld [vmem:[%s7278_s1 + $0x10] sm:$0xff] }
 0x319   :  { %1906 = vmatpush.bf16.msrb.mxu1 %v4119_v9 }
 0x31a   :  { %1921 = vmatpush.bf16.msrb.mxu2 %v4043_v15  ;;  %v4099_v15 = vor.u32 %v4706_v12, %v4096_v13  ;;  %v4755_v13 = vld [vmem:[%s7277_s2 + $0x74] sm:$0xf0] }
 0x31b   :  { %1934 = vmatpush.bf16.msrb.mxu3 %v4107_v3 }
 0x31c   :  { %1893 = vmatpush.bf16.msra.mxu0 %v4055_v58  ;;  %v4031_v58 = vor.u32 %v4691_v55, %v4030_v54 }
 0x31d   :  { %1907 = vmatpush.bf16.msrb.mxu1 %v4111_v48 }
 0x31e   :  { %1922 = vmatpush.bf16.msrb.mxu2 %v4035_v23  ;;  %v4704_v23 = vld [vmem:[%s7277_s2 + $0xa4] sm:$0xf] }
 0x31f   :  { %1935 = vmatpush.bf16.msrb.mxu3 %v4099_v15  ;;  %v4731_v15 = vld [vmem:[%s7277_s2 + $0xf4] sm:$0xf] }
 0x320   :  { %1894 = vmatpush.bf16.msra.mxu0 %v4047_v14  ;;  %v4095_v14 = vor.u32 %v4707_v10, %v4094_v8  ;;  %v4723_v8 = vld [vmem:[%s7277_s2 + $0x74] sm:$0xf]  ;;  %v4258_v10 = vld [vmem:[%s7277_s2 + $0x70] sm:$0xf] }
 0x321   :  { %1908 = vmatpush.bf16.msrb.mxu1 %v4103_v2 }
 0x322   :  { %1923 = vmatpush.bf16.msrb.mxu2 %v4027_v52  ;;  %v4078_v52 = vld [vmem:[%s7277_s2 + $0x90] sm:$0xf] }
 0x324   :  { %1895 = vmatpush.bf16.msra.mxu0 %v4039_v44 }
 0x325   :  { %1909 = vmatpush.bf16.msrb.mxu1 %v4095_v14  ;;  %v6455_v14 = vor.u32 %v4755_v13, %v4258_v10  ;;  %v4132_v10 = vld [vmem:[%s7277_s2 + $0x8] sm:$0xf0] }
 0x326   :  { %1924 = vmatpush.bf16.msrb.mxu2 %v4019_v40  ;;  %v4700_v40 = vld [vmem:[%s7277_s2 + $0x84] sm:$0xf] }
 0x327   :  { %v4075_v44 = vor.u32 %v4700_v40, %v4072_v42  ;;  %v4719_v40 = vld [vmem:[%s7277_s2 + $0x34] sm:$0xf]  ;;  %v4728_v42 = vld [vmem:[%s7277_s2 + $0xc4] sm:$0xf] }
 0x328   :  { %1896 = vmatpush.bf16.msra.mxu0 %v4031_v58 }
 0x32a   :  { %1925 = vmatpush.bf16.msrb.mxu2 %v4011_v53 }
 0x384   :  { %v1395_v7 = vpop.f32.mrf.mxu0 }
 0x388   :  { %v1408_v17 = vpop.f32.mrf.mxu1 }
 0x389   :  { %v1409_v20 = vadd.f32 %v1408_v17, %v1395_v7  ;;  %v4689_v7 = vld [vmem:[%s7277_s2 + $0x24] sm:$0xf0]  ;;  %v4738_v17 = vld [vmem:[%s7278_s1 + $0x30] sm:$0xff] }
 0x38a   :  { %v1421_v21 = vpop.f32.mrf.mxu2  ;;  %v4023_v9 = vor.u32 %v4689_v7, %v4022_v5 }
 0x38b   :  { %v1438_v22 = vadd.f32 %v6063_v16, %v1409_v20  ;;  %v4086_v20 = vld [vmem:[%s7277_s2 + $0xa0] sm:$0xf] }
 0x38c   :  { %v1397_v24 = vpop.f32.mrf.mxu0  ;;  %1897 = vmatpush.bf16.msra.mxu0 %v4023_v9  ;;  %v4160_v9 = vld [vmem:[%s7277_s2 + $0x78] sm:$0xf0] }
 0x38d   :  { %v1440_v45 = vadd.f32 %v1438_v22, %v5434_v6  ;;  %v4705_v22 = vld [vmem:[%s7277_s2 + $0xa4] sm:$0xf0]  ;;  %v4088_v24 = vld [vmem:[%s7277_s2 + $0xa8] sm:$0xf0]  ;;  %v4163_v12 = vor.u32 %v4723_v8, %v4160_v9  ;;  %v4716_v9 = vld [vmem:[%s7277_s2 + $0x4] sm:$0xf] }
 0x38e   :  { %v1434_v28 = vpop.f32.mrf.mxu3  ;;  %v4087_v26 = vor.u32 %v4705_v22, %v4086_v20  ;;  %v4091_v59 = vor.u32 %v4704_v23, %v4088_v24  ;;  %v4721_v22 = vld [vmem:[%s7277_s2 + $0x54] sm:$0xf]  ;;  %v4152_v24 = vld [vmem:[%s7277_s2 + $0x58] sm:$0xf0]  ;;  %v4135_v13 = vor.u32 %v4716_v9, %v4132_v10  ;;  %v4316_v10 = vld [vmem:[%s7277_s2 + $0x68] sm:$0xf0] }
 0x38f   :  { %4826 = vtanh.f32 %v1440_v45  ;;  %v1435_v61 = vadd.f32 %v1434_v28, %v1421_v21  ;;  %v4015_v21 = vor.u32 %v4687_v19, %v4014_v18  ;;  %v4737_v45 = vld [vmem:[%s7278_s1 + $0x28] sm:$0xff]  ;;  %v4006_v28 = vld [vmem:[%s7277_s2] sm:$0xf] }
 0x390   :  { %v1410_v29 = vpop.f32.mrf.mxu1  ;;  %1910 = vmatpush.bf16.msrb.mxu1 %v4087_v26  ;;  %1936 = vmatpush.bf16.msrb.mxu3 %v4091_v59  ;;  %v4254_v18 = vld [vmem:[%s7277_s2 + $0x60] sm:$0xf]  ;;  %v4730_v26 = vld [vmem:[%s7277_s2 + $0xe4] sm:$0xf]  ;;  %v4188_v59 = vld [vmem:[%s7277_s2 + $0xe8] sm:$0xf0] }
 0x391   :  { %v1443_v31 = vadd.f32 %v6287_v30, %v1435_v61  ;;  %1898 = vmatpush.bf16.msra.mxu0 %v4015_v21  ;;  %v4685_v61 = vld [vmem:[%s7277_s2 + $0x4] sm:$0xf0] }
 0x392   :  { %v1423_v32 = vpop.f32.mrf.mxu2  ;;  %v4007_v29 = vor.u32 %v4685_v61, %v4006_v28  ;;  %v4753_v21 = vld [vmem:[%s7277_s2 + $0x64] sm:$0xf0]  ;;  %v4250_v28 = vld [vmem:[%s7277_s2 + $0x50] sm:$0xf]  ;;  %v4751_v61 = vld [vmem:[%s7277_s2 + $0x54] sm:$0xf0] }
 0x393   :  { %4828 = vtanh.f32 %v1443_v31  ;;  %v4703_v31 = vld [vmem:[%s7277_s2 + $0x94] sm:$0xf0]  ;;  %v4702_v32 = vld [vmem:[%s7277_s2 + $0x94] sm:$0xf]  ;;  %v6473_v23 = vor.u32 %v4753_v21, %v4254_v18 }
 0x395   :  { %v4827_v33 = vpop.eup %4826  ;;  %1899 = vmatpush.bf16.msra.mxu0 %v4007_v29  ;;  %v6492_v29 = vor.u32 %v4751_v61, %v4250_v28 }
 0x396   :  { %v1442_v34 = vpack.c.bf16 %v4827_v33, %v4827_v33  ;;  %v1436_v35 = vpop.f32.mrf.mxu3  ;;  %v4080_v33 = vld [vmem:[%s7277_s2 + $0x98] sm:$0xf0] }
 0x397   :  { %v4083_v35 = vor.u32 %v4702_v32, %v4080_v33  ;;  %v4720_v33 = vld [vmem:[%s7277_s2 + $0x44] sm:$0xf] }
 0x398   :  { %1647 = vmatmul.bf16.vlgmr.msrb.gmra.mxu0 %v1442_v34  ;;  %1673 = vmatmul.bf16.vlgmr.msra.gmra.mxu2 %v1442_v34  ;;  %v4079_v34 = vor.u32 %v4703_v31, %v4078_v52  ;;  %v4155_v52 = vor.u32 %v4721_v22, %v4152_v24  ;;  %v2120_v31 = vpack.c.bf16 %v6068_v60, %v5864_v27  ;;  %v4184_v27 = vld [vmem:[%s7277_s2 + $0xd8] sm:$0xf0]  ;;  %v4246_v60 = vld [vmem:[%s7277_s2 + $0x40] sm:$0xf] }
 0x399   :  { %v6290_v6 = vpop.eup %4828  ;;  %2187 = vmatpush.bf16.msra.mxu2 %v4739_v4  ;;  %1937 = vmatpush.bf16.msrb.mxu3 %v4083_v35  ;;  %v4729_v35 = vld [vmem:[%s7277_s2 + $0xd4] sm:$0xf] }
 0x39a   :  { %v1445_v37 = vpack.c.bf16 %v6290_v6, %v6290_v6  ;;  %1911 = vmatpush.bf16.msrb.mxu1 %v4079_v34  ;;  %2081 = vmatpush.bf16.msrb.mxu0 %v4163_v12  ;;  %v4148_v34 = vld [vmem:[%s7277_s2 + $0x48] sm:$0xf0]  ;;  %v4187_v38 = vor.u32 %v4729_v35, %v4184_v27  ;;  %v4725_v12 = vld [vmem:[%s7277_s2 + $0x94] sm:$0xf] }
 0x39c   :  { %1660 = vmatmul.bf16.vlgmr.msra.gmra.mxu1 %v1445_v37  ;;  %1686 = vmatmul.bf16.vlgmr.msra.gmra.mxu3 %v1445_v37  ;;  %v4736_v37 = vld [vmem:[%s7278_s1 + $0x20] sm:$0xff] }
 0x39d   :  { %2188 = vmatpush.bf16.msra.mxu2 %v4738_v17  ;;  %1938 = vmatpush.bf16.msrb.mxu3 %v4075_v44  ;;  %v4192_v17 = vld [vmem:[%s7277_s2 + $0xf8] sm:$0xf0]  ;;  %v4180_v44 = vld [vmem:[%s7277_s2 + $0xc8] sm:$0xf0] }
 0x39e   :  { %1912 = vmatpush.bf16.msrb.mxu1 %v4071_v41  ;;  %v4195_v20 = vor.u32 %v4731_v15, %v4192_v17  ;;  %v4144_v41 = vld [vmem:[%s7277_s2 + $0x38] sm:$0xf0]  ;;  %v4741_v15 = vld [vmem:[%s7277_s2 + $0x4] sm:$0xf0] }
 0x3a1   :  { %2189 = vmatpush.bf16.msra.mxu2 %v4737_v45  ;;  %2352 = vmatpush.bf16.msra.mxu3 %v6455_v14  ;;  %v4191_v45 = vor.u32 %v4730_v26, %v4188_v59 }
 0x3a2   :  { %2094 = vmatpush.bf16.msra.mxu1 %v4195_v20  ;;  %v4164_v20 = vld [vmem:[%s7277_s2 + $0x88] sm:$0xf0] }
 0x3a5   :  { %2190 = vmatpush.bf16.msra.mxu2 %v4736_v37  ;;  %2353 = vmatpush.bf16.msra.mxu3 %v6473_v23  ;;  %v4151_v37 = vor.u32 %v4720_v33, %v4148_v34 }
 0x3a6   :  { %2095 = vmatpush.bf16.msra.mxu1 %v4191_v45 }
 0x3a9   :  { %2191 = vmatpush.bf16.msra.mxu2 %v4735_v43  ;;  %2354 = vmatpush.bf16.msra.mxu3 %v6492_v29  ;;  %v4147_v43 = vor.u32 %v4719_v40, %v4144_v41  ;;  %v4769_v41 = vld [vmem:[%s7277_s2 + $0xe4] sm:$0xf0] }
 0x3aa   :  { %2096 = vmatpush.bf16.msra.mxu1 %v4187_v38  ;;  %v4286_v38 = vld [vmem:[%s7277_s2 + $0xe0] sm:$0xf] }
 0x3ad   :  { %2192 = vmatpush.bf16.msra.mxu2 %v4734_v46  ;;  %v4242_v46 = vld [vmem:[%s7277_s2 + $0x30] sm:$0xf] }
 0x3b1   :  { %2193 = vmatpush.bf16.msra.mxu2 %v4733_v36  ;;  %v4747_v36 = vld [vmem:[%s7277_s2 + $0x34] sm:$0xf0] }
 0x3b5   :  { %2194 = vmatpush.bf16.msra.mxu2 %v4732_v47  ;;  %v4183_v47 = vor.u32 %v4728_v42, %v4180_v44  ;;  %v6659_v42 = vor.u32 %v4769_v41, %v4286_v38  ;;  %v4767_v44 = vld [vmem:[%s7277_s2 + $0xd4] sm:$0xf0]  ;;  %v4348_v41 = vld [vmem:[%s7277_s2 + $0xe8] sm:$0xf0] }
 0x3b7   :  { %2097 = vmatpush.bf16.msra.mxu1 %v4183_v47  ;;  %v4765_v47 = vld [vmem:[%s7277_s2 + $0xc4] sm:$0xf0] }
 0x415   :  { %v1648_v48 = vpop.f32.mrf.mxu0 }
 0x419   :  { %v1661_v49 = vpop.f32.mrf.mxu1 }
 0x41a   :  { %v1662_v50 = vadd.f32 %v1661_v49, %v1648_v48  ;;  %v6540_v48 = vor.u32 %v4747_v36, %v4242_v46  ;;  %v4718_v49 = vld [vmem:[%s7277_s2 + $0x24] sm:$0xf]  ;;  %v4278_v36 = vld [vmem:[%s7277_s2 + $0xc0] sm:$0xf] }
 0x41b   :  { %v1674_v51 = vpop.f32.mrf.mxu2 }
 0x41c   :  { %v1691_v53 = vadd.f32 %v6063_v16, %v1662_v50  ;;  %v4140_v50 = vld [vmem:[%s7277_s2 + $0x28] sm:$0xf0] }
 0x41d   :  { %v1650_v54 = vpop.f32.mrf.mxu0 }
 0x41e   :  { %v1693_v55 = vadd.f32 %v1691_v53, %v5490_v1  ;;  %v2119_v1 = vpack.c.bf16 %v5665_v25, %v5406_v57  ;;  %v4722_v57 = vld [vmem:[%s7277_s2 + $0x64] sm:$0xf]  ;;  %v4156_v25 = vld [vmem:[%s7277_s2 + $0x68] sm:$0xf0]  ;;  %v4143_v53 = vor.u32 %v4718_v49, %v4140_v50  ;;  %v4176_v54 = vld [vmem:[%s7277_s2 + $0xb8] sm:$0xf0]  ;;  %v6679_v49 = vor.u32 %v4765_v47, %v4278_v36 }
 0x41f   :  { %v1687_v56 = vpop.f32.mrf.mxu3  ;;  %v4159_v19 = vor.u32 %v4722_v57, %v4156_v25  ;;  %v4168_v57 = vld [vmem:[%s7277_s2 + $0x98] sm:$0xf0]  ;;  %v4230_v25 = vld [vmem:[%s7277_s2] sm:$0xf]  ;;  %v4274_v50 = vld [vmem:[%s7277_s2 + $0xb0] sm:$0xf] }
 0x420   :  { %4830 = vtanh.f32 %v1693_v55  ;;  %v1688_v58 = vadd.f32 %v1687_v56, %v1674_v51  ;;  %v4727_v51 = vld [vmem:[%s7277_s2 + $0xb4] sm:$0xf]  ;;  %v4238_v55 = vld [vmem:[%s7277_s2 + $0x20] sm:$0xf]  ;;  %v4745_v56 = vld [vmem:[%s7277_s2 + $0x24] sm:$0xf0]  ;;  %v4171_v17 = vor.u32 %v4725_v12, %v4168_v57  ;;  %v6606_v18 = vor.u32 %v4741_v15, %v4230_v25 }
 0x421   :  { %v1663_v62 = vpop.f32.mrf.mxu1  ;;  %2082 = vmatpush.bf16.msrb.mxu0 %v4159_v19  ;;  %v4724_v19 = vld [vmem:[%s7277_s2 + $0x84] sm:$0xf]  ;;  %v4312_v57 = vld [vmem:[%s7277_s2 + $0x58] sm:$0xf0]  ;;  %v4766_v47 = vld [vmem:[%s7277_s2 + $0xd4] sm:$0xf] }
 0x422   :  { %v1696_v63 = vadd.f32 %v6287_v30, %v1688_v58  ;;  %v4179_v58 = vor.u32 %v4727_v51, %v4176_v54  ;;  %v6562_v62 = vor.u32 %v4745_v56, %v4238_v55  ;;  %v4167_v21 = vor.u32 %v4724_v19, %v4164_v20  ;;  %v4763_v51 = vld [vmem:[%s7277_s2 + $0xb4] sm:$0xf0]  ;;  %v4270_v54 = vld [vmem:[%s7277_s2 + $0xa0] sm:$0xf]  ;;  %v4761_v55 = vld [vmem:[%s7277_s2 + $0xa4] sm:$0xf0] }
 0x423   :  { %v1676_v0 = vpop.f32.mrf.mxu2  ;;  %v6699_v56 = vor.u32 %v4761_v55, %v4270_v54  ;;  %v4748_v15 = vld [vmem:[%s7277_s2 + $0x44] sm:$0xf]  ;;  %v4296_v36 = vld [vmem:[%s7277_s2 + $0x18] sm:$0xf0] }
 0x424   :  { %4832 = vtanh.f32 %v1696_v63  ;;  %2098 = vmatpush.bf16.msra.mxu1 %v4179_v58  ;;  %v4717_v63 = vld [vmem:[%s7277_s2 + $0x14] sm:$0xf]  ;;  %v4136_v0 = vld [vmem:[%s7277_s2 + $0x18] sm:$0xf0]  ;;  %v4266_v58 = vld [vmem:[%s7277_s2 + $0x90] sm:$0xf] }
 0x425   :  { %2083 = vmatpush.bf16.msrb.mxu0 %v4155_v52  ;;  %v4740_v55 = vld [vmem:[%s7277_s2 + $0x4] sm:$0xf] }
 0x426   :  { %v4831_v2 = vpop.eup %4830 }
 0x427   :  { %v1695_v3 = vpack.c.bf16 %v4831_v2, %v4831_v2  ;;  %v1689_v4 = vpop.f32.mrf.mxu3  ;;  %v4726_v2 = vld [vmem:[%s7277_s2 + $0xa4] sm:$0xf] }
 0x428   :  { %v4172_v4 = vld [vmem:[%s7277_s2 + $0xa8] sm:$0xf0] }
 0x429   :  { %1900 = vmatmul.bf16.vlgmr.msra.gmra.mxu0 %v1695_v3  ;;  %1926 = vmatmul.bf16.vlgmr.msrb.gmra.mxu2 %v1695_v3  ;;  %v4139_v3 = vor.u32 %v4717_v63, %v4136_v0  ;;  %v4759_v63 = vld [vmem:[%s7277_s2 + $0x94] sm:$0xf0] }
 0x42a   :  { %v4833_v5 = vpop.eup %4832  ;;  %2507 = vmatpush.bf16.msrb.mxu2 %v6455_v14  ;;  %2084 = vmatpush.bf16.msrb.mxu0 %v4151_v37  ;;  %v6709_v0 = vor.u32 %v4759_v63, %v4266_v58  ;;  %v4292_v58 = vld [vmem:[%s7277_s2 + $0x8] sm:$0xf0]  ;;  %v4764_v63 = vld [vmem:[%s7277_s2 + $0xc4] sm:$0xf] }
 0x42b   :  { %v1698_v7 = vpack.c.bf16 %v4833_v5, %v4833_v5  ;;  %v2121_v32 = vpack.c.bf16 %v4833_v5, %v6290_v6  ;;  %v4749_v6 = vld [vmem:[%s7277_s2 + $0x44] sm:$0xf0]  ;;  %v4234_v5 = vld [vmem:[%s7277_s2 + $0x10] sm:$0xf] }
 0x42c   :  { %v6518_v39 = vor.u32 %v4749_v6, %v4246_v60  ;;  %v4290_v60 = vld [vmem:[%s7277_s2 + $0xf0] sm:$0xf]  ;;  %v4771_v6 = vld [vmem:[%s7277_s2 + $0xf4] sm:$0xf0] }
 0x42d   :  { %1913 = vmatmul.bf16.vlgmr.msrb.gmra.mxu1 %v1698_v7  ;;  %1939 = vmatmul.bf16.vlgmr.msrb.gmra.mxu3 %v1698_v7  ;;  %v4743_v7 = vld [vmem:[%s7277_s2 + $0x14] sm:$0xf0]  ;;  %v6652_v40 = vor.u32 %v4771_v6, %v4290_v60  ;;  %v4300_v60 = vld [vmem:[%s7277_s2 + $0x28] sm:$0xf0]  ;;  %v4768_v6 = vld [vmem:[%s7277_s2 + $0xe4] sm:$0xf] }
 0x42e   :  { %2508 = vmatpush.bf16.msrb.mxu2 %v6473_v23  ;;  %2355 = vmatpush.bf16.msra.mxu3 %v6518_v39  ;;  %v6584_v8 = vor.u32 %v4743_v7, %v4234_v5  ;;  %v4754_v5 = vld [vmem:[%s7277_s2 + $0x74] sm:$0xf]  ;;  %v4320_v7 = vld [vmem:[%s7277_s2 + $0x78] sm:$0xf0] }
 0x42f   :  { %2085 = vmatpush.bf16.msrb.mxu0 %v4147_v43  ;;  %v4282_v43 = vld [vmem:[%s7277_s2 + $0xd0] sm:$0xf]  ;;  %v6733_v9 = vor.u32 %v4754_v5, %v4320_v7  ;;  %v4762_v7 = vld [vmem:[%s7277_s2 + $0xb4] sm:$0xf] }
 0x430   :  { %v6669_v46 = vor.u32 %v4767_v44, %v4282_v43  ;;  %v6820_v43 = vor.u32 %v4768_v6, %v4348_v41  ;;  %v4742_v44 = vld [vmem:[%s7277_s2 + $0x14] sm:$0xf] }
 0x432   :  { %2509 = vmatpush.bf16.msrb.mxu2 %v6492_v29  ;;  %2356 = vmatpush.bf16.msra.mxu3 %v6540_v48 }
 0x433   :  { %2086 = vmatpush.bf16.msrb.mxu0 %v4143_v53  ;;  %v6689_v53 = vor.u32 %v4763_v51, %v4274_v50  ;;  %v6833_v50 = vor.u32 %v4742_v44, %v4296_v36  ;;  %v4344_v51 = vld [vmem:[%s7277_s2 + $0xd8] sm:$0xf0] }
 0x434   :  { %v6838_v54 = vor.u32 %v4766_v47, %v4344_v51 }
 0x436   :  { %2510 = vmatpush.bf16.msrb.mxu2 %v6518_v39  ;;  %2357 = vmatpush.bf16.msra.mxu3 %v6562_v62 }
 0x437   :  { %2087 = vmatpush.bf16.msrb.mxu0 %v4139_v3  ;;  %v4757_v3 = vld [vmem:[%s7277_s2 + $0x84] sm:$0xf0] }
 0x439   :  { %2195 = vmatmul.bf16.vlgmr.msra.gmra.mxu2 %v2119_v1  ;;  %v4175_v1 = vor.u32 %v4726_v2, %v4172_v4  ;;  %v4262_v2 = vld [vmem:[%s7277_s2 + $0x80] sm:$0xf] }
 0x43a   :  { %2511 = vmatpush.bf16.msrb.mxu2 %v6540_v48  ;;  %2358 = vmatpush.bf16.msra.mxu3 %v6584_v8  ;;  %v6719_v4 = vor.u32 %v4757_v3, %v4262_v2  ;;  %v6851_v2 = vor.u32 %v4740_v55, %v4292_v58  ;;  %v4340_v3 = vld [vmem:[%s7277_s2 + $0xc8] sm:$0xf0] }
 0x43b   :  { %2099 = vmatpush.bf16.msra.mxu1 %v4175_v1  ;;  %2088 = vmatpush.bf16.msrb.mxu0 %v4135_v13  ;;  %v4752_v1 = vld [vmem:[%s7277_s2 + $0x64] sm:$0xf]  ;;  %v4750_v13 = vld [vmem:[%s7277_s2 + $0x54] sm:$0xf]  ;;  %v6856_v5 = vor.u32 %v4764_v63, %v4340_v3 }
 0x43c   :  { %v6740_v12 = vor.u32 %v4752_v1, %v4316_v10  ;;  %v6750_v25 = vor.u32 %v4750_v13, %v4312_v57  ;;  %v4336_v1 = vld [vmem:[%s7277_s2 + $0xb8] sm:$0xf0]  ;;  %v4760_v13 = vld [vmem:[%s7277_s2 + $0xa4] sm:$0xf]  ;;  %v4332_v57 = vld [vmem:[%s7277_s2 + $0xa8] sm:$0xf0] }
 0x43d   :  { %v6867_v10 = vor.u32 %v4762_v7, %v4336_v1 }
 0x43e   :  { %2512 = vmatpush.bf16.msrb.mxu2 %v6562_v62  ;;  %2359 = vmatpush.bf16.msra.mxu3 %v6606_v18 }
 0x43f   :  { %2100 = vmatpush.bf16.msra.mxu1 %v4171_v17  ;;  %2365 = vmatpush.bf16.msra.mxu0 %v6652_v40  ;;  %v4308_v17 = vld [vmem:[%s7277_s2 + $0x48] sm:$0xf0] }
 0x440   :  { %v6760_v19 = vor.u32 %v4748_v15, %v4308_v17  ;;  %v6876_v15 = vor.u32 %v4760_v13, %v4332_v57  ;;  %v4758_v17 = vld [vmem:[%s7277_s2 + $0x94] sm:$0xf] }
 0x442   :  { %2513 = vmatpush.bf16.msrb.mxu2 %v6584_v8  ;;  %2460 = vmatpush.bf16.msrb.mxu3 %v6652_v40 }
 0x443   :  { %2101 = vmatpush.bf16.msra.mxu1 %v4167_v21  ;;  %2366 = vmatpush.bf16.msra.mxu0 %v6659_v42 }
 0x446   :  { %2514 = vmatpush.bf16.msrb.mxu2 %v6606_v18  ;;  %2461 = vmatpush.bf16.msrb.mxu3 %v6659_v42 }
 0x447   :  { %2447 = vmatpush.bf16.msrb.mxu1 %v6455_v14  ;;  %2367 = vmatpush.bf16.msra.mxu0 %v6669_v46 }
 0x449   :  { %2200 = vmatmul.bf16.gmra.mxu2 %v2120_v31 }
 0x44a   :  { %2567 = vmatpush.bf16.msra.mxu2 %v6455_v14  ;;  %2462 = vmatpush.bf16.msrb.mxu3 %v6669_v46 }
 0x44b   :  { %2448 = vmatpush.bf16.msrb.mxu1 %v6473_v23  ;;  %2368 = vmatpush.bf16.msra.mxu0 %v6679_v49 }
 0x44e   :  { %2568 = vmatpush.bf16.msra.mxu2 %v6473_v23  ;;  %2463 = vmatpush.bf16.msrb.mxu3 %v6679_v49 }
 0x44f   :  { %2449 = vmatpush.bf16.msrb.mxu1 %v6492_v29  ;;  %2369 = vmatpush.bf16.msra.mxu0 %v6689_v53 }
 0x452   :  { %2569 = vmatpush.bf16.msra.mxu2 %v6492_v29  ;;  %2464 = vmatpush.bf16.msrb.mxu3 %v6689_v53 }
 0x453   :  { %2450 = vmatpush.bf16.msrb.mxu1 %v6518_v39  ;;  %2370 = vmatpush.bf16.msra.mxu0 %v6699_v56 }
 0x456   :  { %2570 = vmatpush.bf16.msra.mxu2 %v6518_v39  ;;  %2465 = vmatpush.bf16.msrb.mxu3 %v6699_v56 }
 0x457   :  { %2451 = vmatpush.bf16.msrb.mxu1 %v6540_v48  ;;  %2371 = vmatpush.bf16.msra.mxu0 %v6709_v0 }
 0x459   :  { %2205 = vmatmul.bf16.gmra.mxu2 %v2121_v32 }
 0x45a   :  { %2571 = vmatpush.bf16.msra.mxu2 %v6540_v48  ;;  %2466 = vmatpush.bf16.msrb.mxu3 %v6709_v0 }
 0x45b   :  { %2452 = vmatpush.bf16.msrb.mxu1 %v6562_v62  ;;  %2372 = vmatpush.bf16.msra.mxu0 %v6719_v4 }
 0x45e   :  { %2572 = vmatpush.bf16.msra.mxu2 %v6562_v62  ;;  %2467 = vmatpush.bf16.msrb.mxu3 %v6719_v4 }
 0x45f   :  { %2453 = vmatpush.bf16.msrb.mxu1 %v6584_v8 }
 0x462   :  { %2573 = vmatpush.bf16.msra.mxu2 %v6584_v8 }
 0x463   :  { %2454 = vmatpush.bf16.msrb.mxu1 %v6606_v18 }
 0x466   :  { %2574 = vmatpush.bf16.msra.mxu2 %v6606_v18 }
 0x4a6   :  { %v1901_v22 = vpop.f32.mrf.mxu0 }
 0x4aa   :  { %v1914_v24 = vpop.f32.mrf.mxu1 }
 0x4ab   :  { %v1915_v26 = vadd.f32 %v1914_v24, %v1901_v22 }
 0x4ac   :  { %v1927_v59 = vpop.f32.mrf.mxu2 }
 0x4ad   :  { %v1944_v45 = vadd.f32 %v6063_v16, %v1915_v26 }
 0x4ae   :  { %v1903_v28 = vpop.f32.mrf.mxu0 }
 0x4af   :  { %v1946_v61 = vadd.f32 %v1944_v45, %v5558_v11 }
 0x4b0   :  { %v1940_v52 = vpop.f32.mrf.mxu3 }
 0x4b1   :  { %4834 = vtanh.f32 %v1946_v61  ;;  %v1941_v31 = vadd.f32 %v1940_v52, %v1927_v59 }
 0x4b2   :  { %v1916_v32 = vpop.f32.mrf.mxu1 }
 0x4b3   :  { %v1949_v33 = vadd.f32 %v6287_v30, %v1941_v31  ;;  %v4746_v32 = vld [vmem:[%s7277_s2 + $0x34] sm:$0xf] }
 0x4b4   :  { %v1929_v34 = vpop.f32.mrf.mxu2 }
 0x4b5   :  { %4836 = vtanh.f32 %v1949_v33  ;;  %v4304_v33 = vld [vmem:[%s7277_s2 + $0x38] sm:$0xf0]  ;;  %v4770_v34 = vld [vmem:[%s7277_s2 + $0xf4] sm:$0xf] }
 0x4b7   :  { %v6634_v16 = vpop.eup %4834 }
 0x4b8   :  { %v1942_v35 = vpop.f32.mrf.mxu3  ;;  %v1948_v11 = vpack.c.bf16 %v6634_v16, %v6634_v16 }
 0x4b9   :  { %v6797_v35 = vor.u32 %v4746_v32, %v4304_v33 }
 0x4ba   :  { %2089 = vmatmul.bf16.vlgmr.msrb.gmra.mxu0 %v1948_v11  ;;  %2360 = vmatmul.bf16.vlgmr.msra.gmra.mxu3 %v1948_v11  ;;  %v4352_v11 = vld [vmem:[%s7277_s2 + $0xf8] sm:$0xf0] }
 0x4bb   :  { %v6639_v37 = vpop.eup %4836  ;;  %2520 = vmatpush.bf16.msra.mxu3 %v6652_v40  ;;  %2473 = vmatpush.bf16.msrb.mxu0 %v6733_v9 }
 0x4bc   :  { %v1951_v27 = vpack.c.bf16 %v6639_v37, %v6639_v37  ;;  %v2196_v33 = vpop.f32.mrf.mxu2 }
 0x4be   :  { %2102 = vmatmul.bf16.vlgmr.msra.gmra.mxu1 %v1951_v27  ;;  %v4744_v27 = vld [vmem:[%s7277_s2 + $0x24] sm:$0xf] }
 0x4bf   :  { %2521 = vmatpush.bf16.msra.mxu3 %v6659_v42  ;;  %2474 = vmatpush.bf16.msrb.mxu0 %v6740_v12  ;;  %v6815_v38 = vor.u32 %v4744_v27, %v4300_v60 }
 0x4c3   :  { %2522 = vmatpush.bf16.msra.mxu3 %v6669_v46  ;;  %2475 = vmatpush.bf16.msrb.mxu0 %v6750_v25 }
 0x4c4   :  { %v2198_v47 = vpop.f32.mrf.mxu2 }
 0x4c7   :  { %2523 = vmatpush.bf16.msra.mxu3 %v6679_v49  ;;  %2476 = vmatpush.bf16.msrb.mxu0 %v6760_v19 }
 0x4cb   :  { %2524 = vmatpush.bf16.msra.mxu3 %v6689_v53  ;;  %2477 = vmatpush.bf16.msrb.mxu0 %v6797_v35 }
 0x4cf   :  { %2525 = vmatpush.bf16.msra.mxu3 %v6699_v56  ;;  %2478 = vmatpush.bf16.msrb.mxu0 %v6815_v38 }
 0x4d3   :  { %2526 = vmatpush.bf16.msra.mxu3 %v6709_v0  ;;  %2479 = vmatpush.bf16.msrb.mxu0 %v6833_v50 }
 0x4d7   :  { %2527 = vmatpush.bf16.msra.mxu3 %v6719_v4  ;;  %2480 = vmatpush.bf16.msrb.mxu0 %v6851_v2 }
 0x537   :  { %v2090_v20 = vpop.f32.mrf.mxu0 }
 0x53b   :  { %v2103_v21 = vpop.f32.mrf.mxu1 }
 0x53c   :  { %v2104_v22 = vadd.f32 %v2103_v21, %v2090_v20  ;;  %v4328_v20 = vld [vmem:[%s7277_s2 + $0x98] sm:$0xf0] }
 0x53d   :  { %v6765_v24 = vpop.f32.mrf.mxu3  ;;  %v6886_v21 = vor.u32 %v4758_v17, %v4328_v20 }
 0x53e   :  { %v2107_v26 = vadd.f32 %v6287_v30, %v2104_v22  ;;  %v4756_v22 = vld [vmem:[%s7277_s2 + $0x84] sm:$0xf] }
 0x53f   :  { %v2092_v59 = vpop.f32.mrf.mxu0 }
 0x540   :  { %4838 = vtanh.f32 %v2107_v26  ;;  %v4324_v26 = vld [vmem:[%s7277_s2 + $0x88] sm:$0xf0] }
 0x541   :  { %v6896_v59 = vor.u32 %v4756_v22, %v4324_v26 }
 0x543   :  { %v2105_v45 = vpop.f32.mrf.mxu1 }
 0x545   :  { %v2363_v28 = vpop.f32.mrf.mxu3 }
 0x546   :  { %v6770_v61 = vpop.eup %4838 }
 0x547   :  { %v2122_v52 = vpack.c.bf16 %v6770_v61, %v6639_v37  ;;  %v6776_v31 = vpack.c.bf16 %v6770_v61, %v6770_v61  ;;  %v6802_v37 = vor.u32 %v4770_v34, %v4352_v11 }
 0x549   :  { %2210 = vmatmul.bf16.gmra.mxu2 %v2122_v52  ;;  %2373 = vmatmul.bf16.vlgmr.msra.gmra.mxu0 %v6776_v31  ;;  %v6905_v52 = vld [vmem:[%s7280_s3] ss:$0 sm:$0xff] }
 0x54a   :  { %2468 = vmatmul.bf16.vlgmr.msrb.gmra.mxu3 %v6776_v31  ;;  %2486 = vmatpush.bf16.msra.mxu1 %v6802_v37 }
 0x54b   :  { %2580 = vmatpush.bf16.msrb.mxu3 %v6652_v40  ;;  %2533 = vmatpush.bf16.msra.mxu0 %v6733_v9 }
 0x54e   :  { %2487 = vmatpush.bf16.msra.mxu1 %v6820_v43 }
 0x54f   :  { %2581 = vmatpush.bf16.msrb.mxu3 %v6659_v42  ;;  %2534 = vmatpush.bf16.msra.mxu0 %v6740_v12 }
 0x552   :  { %2488 = vmatpush.bf16.msra.mxu1 %v6838_v54 }
 0x553   :  { %2582 = vmatpush.bf16.msrb.mxu3 %v6669_v46  ;;  %2535 = vmatpush.bf16.msra.mxu0 %v6750_v25 }
 0x556   :  { %2489 = vmatpush.bf16.msra.mxu1 %v6856_v5 }
 0x557   :  { %2583 = vmatpush.bf16.msrb.mxu3 %v6679_v49  ;;  %2536 = vmatpush.bf16.msra.mxu0 %v6760_v19 }
 0x55a   :  { %2490 = vmatpush.bf16.msra.mxu1 %v6867_v10 }
 0x55b   :  { %2584 = vmatpush.bf16.msrb.mxu3 %v6689_v53  ;;  %2537 = vmatpush.bf16.msra.mxu0 %v6797_v35 }
 0x55e   :  { %2491 = vmatpush.bf16.msra.mxu1 %v6876_v15 }
 0x55f   :  { %2585 = vmatpush.bf16.msrb.mxu3 %v6699_v56  ;;  %2538 = vmatpush.bf16.msra.mxu0 %v6815_v38 }
 0x562   :  { %2492 = vmatpush.bf16.msra.mxu1 %v6886_v21 }
 0x563   :  { %2586 = vmatpush.bf16.msrb.mxu3 %v6709_v0  ;;  %2539 = vmatpush.bf16.msra.mxu0 %v6833_v50 }
 0x566   :  { %2493 = vmatpush.bf16.msra.mxu1 %v6896_v59 }
 0x567   :  { %2587 = vmatpush.bf16.msrb.mxu3 %v6719_v4  ;;  %2540 = vmatpush.bf16.msra.mxu0 %v6851_v2 }
 0x5c6   :  { %v2374_v45 = vpop.f32.mrf.mxu0 }
 0x5c7   :  { %v2375_v28 = vadd.f32 %v2374_v45, %v6765_v24 }
 0x5c9   :  { %v2378_v32 = vadd.f32 %v6905_v52, %v2375_v28 }
 0x5cb   :  { %v2380_v34 = vadd.f32 %v2378_v32, %v2196_v33 }
 0x5cd   :  { %4840 = vtanh.f32 %v2380_v34  ;;  %v2469_v11 = vpop.f32.mrf.mxu3 }
 0x5ce   :  { %v2376_v27 = vpop.f32.mrf.mxu0 }
 0x5d3   :  { %v4841_v60 = vpop.eup %4840 }
 0x5d4   :  { %v2382_v24 = vpack.c.bf16 %v4841_v60, %v4841_v60 }
 0x5d5   :  { %v2471_v6 = vpop.f32.mrf.mxu3 }
 0x5d6   :  { %2455 = vmatmul.bf16.vlgmr.msrb.gmra.mxu1 %v2382_v24  ;;  %2481 = vmatmul.bf16.vlgmr.msrb.gmra.mxu0 %v2382_v24  ;;  %v6983_v6 = vld [vmem:[%s7280_s3 + $0x1] ss:$0 sm:$0xff] }
 0x5d7   :  { %2546 = vmatpush.bf16.msrb.mxu1 %v6802_v37  ;;  %2593 = vmatpush.bf16.msrb.mxu0 %v6733_v9 }
 0x5db   :  { %2547 = vmatpush.bf16.msrb.mxu1 %v6820_v43  ;;  %2594 = vmatpush.bf16.msrb.mxu0 %v6740_v12 }
 0x5df   :  { %2548 = vmatpush.bf16.msrb.mxu1 %v6838_v54  ;;  %2595 = vmatpush.bf16.msrb.mxu0 %v6750_v25 }
 0x5e3   :  { %2549 = vmatpush.bf16.msrb.mxu1 %v6856_v5  ;;  %2596 = vmatpush.bf16.msrb.mxu0 %v6760_v19 }
 0x5e6   :  { %2494 = vmatmul.bf16.vlgmr.msra.gmra.mxu1 %v6776_v31 }
 0x5e7   :  { %2550 = vmatpush.bf16.msrb.mxu1 %v6867_v10  ;;  %2597 = vmatpush.bf16.msrb.mxu0 %v6797_v35 }
 0x5eb   :  { %2551 = vmatpush.bf16.msrb.mxu1 %v6876_v15  ;;  %2598 = vmatpush.bf16.msrb.mxu0 %v6815_v38 }
 0x5ef   :  { %2552 = vmatpush.bf16.msrb.mxu1 %v6886_v21  ;;  %2599 = vmatpush.bf16.msrb.mxu0 %v6833_v50 }
 0x5f3   :  { %2553 = vmatpush.bf16.msrb.mxu1 %v6896_v59  ;;  %2600 = vmatpush.bf16.msrb.mxu0 %v6851_v2 }
 0x5f7   :  { %2606 = vmatpush.bf16.msra.mxu1 %v6802_v37 }
 0x5fb   :  { %2607 = vmatpush.bf16.msra.mxu1 %v6820_v43 }
 0x5ff   :  { %2608 = vmatpush.bf16.msra.mxu1 %v6838_v54 }
 0x603   :  { %2609 = vmatpush.bf16.msra.mxu1 %v6856_v5 }
 0x607   :  { %2610 = vmatpush.bf16.msra.mxu1 %v6867_v10 }
 0x60b   :  { %2611 = vmatpush.bf16.msra.mxu1 %v6876_v15 }
 0x60f   :  { %2612 = vmatpush.bf16.msra.mxu1 %v6886_v21 }
 0x613   :  { %2613 = vmatpush.bf16.msra.mxu1 %v6896_v59 }
 0x653   :  { %v2456_v31 = vpop.f32.mrf.mxu1  ;;  %v2482_v41 = vpop.f32.mrf.mxu0 }
 0x654   :  { %v2470_v44 = vadd.f32 %v2469_v11, %v2456_v31 }
 0x656   :  { %v2499_v36 = vadd.f32 %v6905_v52, %v2470_v44 }
 0x658   :  { %v2501_v51 = vadd.f32 %v2499_v36, %v2198_v47 }
 0x65a   :  { %4842 = vtanh.f32 %v2501_v51 }
 0x65b   :  { %v2458_v55 = vpop.f32.mrf.mxu1  ;;  %v2484_v58 = vpop.f32.mrf.mxu0 }
 0x660   :  { %v4843_v63 = vpop.eup %4842 }
 0x661   :  { %v2503_v3 = vpack.c.bf16 %v4843_v63, %v4843_v63 }
 0x663   :  { %v2495_v7 = vpop.f32.mrf.mxu1  ;;  %2515 = vmatmul.bf16.vlgmr.msrb.gmra.mxu2 %v2503_v3  ;;  %2541 = vmatmul.bf16.vlgmr.msra.gmra.mxu0 %v2503_v3 }
 0x664   :  { %v2496_v1 = vadd.f32 %v2495_v7, %v2482_v41  ;;  %2627 = vmatpush.bf16.msrb.mxu2 %v6455_v14  ;;  %2653 = vmatpush.bf16.msra.mxu0 %v6733_v9 }
 0x666   :  { %v2504_v13 = vadd.f32 %v6287_v30, %v2496_v1  ;;  %v2201_v30 = vpop.f32.mrf.mxu2 }
 0x668   :  { %4844 = vtanh.f32 %v2504_v13  ;;  %2628 = vmatpush.bf16.msrb.mxu2 %v6473_v23  ;;  %2654 = vmatpush.bf16.msra.mxu0 %v6740_v12 }
 0x66b   :  { %v2497_v57 = vpop.f32.mrf.mxu1 }
 0x66c   :  { %2629 = vmatpush.bf16.msrb.mxu2 %v6492_v29  ;;  %2655 = vmatpush.bf16.msra.mxu0 %v6750_v25 }
 0x66e   :  { %v4845_v17 = vpop.eup %4844  ;;  %v6970_v22 = vpop.f32.mrf.mxu2 }
 0x66f   :  { %v2506_v20 = vpack.c.bf16 %v4845_v17, %v4845_v17 }
 0x670   :  { %2630 = vmatpush.bf16.msrb.mxu2 %v6518_v39  ;;  %2656 = vmatpush.bf16.msra.mxu0 %v6760_v19 }
 0x671   :  { %2528 = vmatmul.bf16.vlgmr.msra.gmra.mxu3 %v2506_v20  ;;  %2554 = vmatmul.bf16.vlgmr.msrb.gmra.mxu1 %v2506_v20 }
 0x672   :  { %2640 = vmatpush.bf16.msra.mxu3 %v6652_v40  ;;  %2666 = vmatpush.bf16.msrb.mxu1 %v6802_v37 }
 0x674   :  { %2631 = vmatpush.bf16.msrb.mxu2 %v6540_v48  ;;  %2657 = vmatpush.bf16.msra.mxu0 %v6797_v35 }
 0x676   :  { %2641 = vmatpush.bf16.msra.mxu3 %v6659_v42  ;;  %2667 = vmatpush.bf16.msrb.mxu1 %v6820_v43  ;;  %v6972_v26 = vpop.f32.mrf.mxu2 }
 0x678   :  { %2632 = vmatpush.bf16.msrb.mxu2 %v6562_v62  ;;  %2658 = vmatpush.bf16.msra.mxu0 %v6815_v38 }
 0x67a   :  { %2642 = vmatpush.bf16.msra.mxu3 %v6669_v46  ;;  %2668 = vmatpush.bf16.msrb.mxu1 %v6838_v54 }
 0x67c   :  { %2633 = vmatpush.bf16.msrb.mxu2 %v6584_v8  ;;  %2659 = vmatpush.bf16.msra.mxu0 %v6833_v50 }
 0x67e   :  { %2643 = vmatpush.bf16.msra.mxu3 %v6679_v49  ;;  %2669 = vmatpush.bf16.msrb.mxu1 %v6856_v5  ;;  %v6974_v45 = vpop.f32.mrf.mxu2 }
 0x680   :  { %2634 = vmatpush.bf16.msrb.mxu2 %v6606_v18  ;;  %2660 = vmatpush.bf16.msra.mxu0 %v6851_v2 }
 0x682   :  { %2644 = vmatpush.bf16.msra.mxu3 %v6689_v53  ;;  %2670 = vmatpush.bf16.msrb.mxu1 %v6867_v10 }
 0x686   :  { %2645 = vmatpush.bf16.msra.mxu3 %v6699_v56  ;;  %2671 = vmatpush.bf16.msrb.mxu1 %v6876_v15  ;;  %v6976_v28 = vpop.f32.mrf.mxu2 }
 0x68a   :  { %2646 = vmatpush.bf16.msra.mxu3 %v6709_v0  ;;  %2672 = vmatpush.bf16.msrb.mxu1 %v6886_v21 }
 0x68e   :  { %2647 = vmatpush.bf16.msra.mxu3 %v6719_v4  ;;  %2673 = vmatpush.bf16.msrb.mxu1 %v6896_v59  ;;  %v6978_v32 = vpop.f32.mrf.mxu2 }
 0x6e0   :  { %v2542_v33 = vpop.f32.mrf.mxu0 }
 0x6e6   :  { %v2516_v34 = vpop.f32.mrf.mxu2 }
 0x6e8   :  { %v2544_v11 = vpop.f32.mrf.mxu0 }
 0x6ee   :  { %v2518_v27 = vpop.f32.mrf.mxu2  ;;  %v2555_v60 = vpop.f32.mrf.mxu1 }
 0x6ef   :  { %v2556_v24 = vadd.f32 %v2555_v60, %v2542_v33 }
 0x6f1   :  { %v2564_v31 = vadd.f32 %v6983_v6, %v2556_v24 }
 0x6f3   :  { %4846 = vtanh.f32 %v2564_v31 }
 0x6f4   :  { %v2529_v41 = vpop.f32.mrf.mxu3 }
 0x6f5   :  { %v2530_v44 = vadd.f32 %v2529_v41, %v2516_v34 }
 0x6f6   :  { %v2557_v36 = vpop.f32.mrf.mxu1 }
 0x6f7   :  { %v2559_v47 = vadd.f32 %v6905_v52, %v2530_v44 }
 0x6f9   :  { %v4847_v51 = vpop.eup %4846  ;;  %v2561_v55 = vadd.f32 %v2559_v47, %v2201_v30 }
 0x6fa   :  { %v2566_v58 = vpack.c.bf16 %v4847_v51, %v4847_v51 }
 0x6fb   :  { %4848 = vtanh.f32 %v2561_v55 }
 0x6fc   :  { %v2531_v63 = vpop.f32.mrf.mxu3  ;;  %2588 = vmatmul.bf16.vlgmr.msrb.gmra.mxu3 %v2566_v58  ;;  %2614 = vmatmul.bf16.vlgmr.msra.gmra.mxu1 %v2566_v58 }
 0x6fd   :  { %2700 = vmatpush.bf16.msrb.mxu3 %v6652_v40  ;;  %2726 = vmatpush.bf16.msra.mxu1 %v6802_v37 }
 0x701   :  { %v4849_v3 = vpop.eup %4848  ;;  %2701 = vmatpush.bf16.msrb.mxu3 %v6659_v42  ;;  %2727 = vmatpush.bf16.msra.mxu1 %v6820_v43 }
 0x702   :  { %v2563_v7 = vpack.c.bf16 %v4849_v3, %v4849_v3 }
 0x704   :  { %2575 = vmatmul.bf16.vlgmr.msra.gmra.mxu2 %v2563_v7  ;;  %2601 = vmatmul.bf16.vlgmr.msrb.gmra.mxu0 %v2563_v7 }
 0x705   :  { %2687 = vmatpush.bf16.msra.mxu2 %v6455_v14  ;;  %2702 = vmatpush.bf16.msrb.mxu3 %v6669_v46 }
 0x706   :  { %2713 = vmatpush.bf16.msrb.mxu0 %v6733_v9  ;;  %2728 = vmatpush.bf16.msra.mxu1 %v6838_v54 }
 0x709   :  { %2688 = vmatpush.bf16.msra.mxu2 %v6473_v23  ;;  %2703 = vmatpush.bf16.msrb.mxu3 %v6679_v49 }
 0x70a   :  { %2714 = vmatpush.bf16.msrb.mxu0 %v6740_v12  ;;  %2729 = vmatpush.bf16.msra.mxu1 %v6856_v5 }
 0x70d   :  { %2689 = vmatpush.bf16.msra.mxu2 %v6492_v29  ;;  %2704 = vmatpush.bf16.msrb.mxu3 %v6689_v53 }
 0x70e   :  { %2715 = vmatpush.bf16.msrb.mxu0 %v6750_v25  ;;  %2730 = vmatpush.bf16.msra.mxu1 %v6867_v10 }
 0x711   :  { %2690 = vmatpush.bf16.msra.mxu2 %v6518_v39  ;;  %2705 = vmatpush.bf16.msrb.mxu3 %v6699_v56 }
 0x712   :  { %2716 = vmatpush.bf16.msrb.mxu0 %v6760_v19  ;;  %2731 = vmatpush.bf16.msra.mxu1 %v6876_v15 }
 0x715   :  { %2691 = vmatpush.bf16.msra.mxu2 %v6540_v48  ;;  %2706 = vmatpush.bf16.msrb.mxu3 %v6709_v0 }
 0x716   :  { %2717 = vmatpush.bf16.msrb.mxu0 %v6797_v35  ;;  %2732 = vmatpush.bf16.msra.mxu1 %v6886_v21 }
 0x719   :  { %2692 = vmatpush.bf16.msra.mxu2 %v6562_v62  ;;  %2707 = vmatpush.bf16.msrb.mxu3 %v6719_v4 }
 0x71a   :  { %2718 = vmatpush.bf16.msrb.mxu0 %v6815_v38  ;;  %2733 = vmatpush.bf16.msra.mxu1 %v6896_v59 }
 0x71d   :  { %2693 = vmatpush.bf16.msra.mxu2 %v6584_v8 }
 0x71e   :  { %2719 = vmatpush.bf16.msrb.mxu0 %v6833_v50 }
 0x721   :  { %2694 = vmatpush.bf16.msra.mxu2 %v6606_v18 }
 0x722   :  { %2720 = vmatpush.bf16.msrb.mxu0 %v6851_v2 }
 0x779   :  { %v2615_v1 = vpop.f32.mrf.mxu1 }
 0x77f   :  { %v2589_v13 = vpop.f32.mrf.mxu3 }
 0x781   :  { %v2602_v57 = vpop.f32.mrf.mxu0  ;;  %v2617_v17 = vpop.f32.mrf.mxu1 }
 0x782   :  { %v2616_v20 = vadd.f32 %v2615_v1, %v2602_v57 }
 0x784   :  { %v2624_v30 = vadd.f32 %v6983_v6, %v2616_v20 }
 0x786   :  { %4850 = vtanh.f32 %v2624_v30 }
 0x787   :  { %v2576_v33 = vpop.f32.mrf.mxu2  ;;  %v2591_v34 = vpop.f32.mrf.mxu3 }
 0x788   :  { %v2590_v11 = vadd.f32 %v2589_v13, %v2576_v33 }
 0x789   :  { %v2604_v27 = vpop.f32.mrf.mxu0 }
 0x78a   :  { %v2619_v60 = vadd.f32 %v6905_v52, %v2590_v11 }
 0x78c   :  { %v4851_v24 = vpop.eup %4850  ;;  %v2621_v31 = vadd.f32 %v2619_v60, %v6970_v22  ;;  %v4414_v60 = vld [vmem:[%s7281_s4 + $0x70] sm:$0xf] }
 0x78d   :  { %v2626_v41 = vpack.c.bf16 %v4851_v24, %v4851_v24  ;;  %v4787_v24 = vld [vmem:[%s7281_s4 + $0x74] sm:$0xf0] }
 0x78e   :  { %4852 = vtanh.f32 %v2621_v31  ;;  %v4415_v31 = vor.u32 %v4787_v24, %v4414_v60  ;;  %v4772_v60 = vld [vmem:[%s7281_s4 + $0x4] sm:$0xf] }
 0x78f   :  { %v2578_v44 = vpop.f32.mrf.mxu2  ;;  %2648 = vmatmul.bf16.vlgmr.msra.gmra.mxu3 %v2626_v41  ;;  %2674 = vmatmul.bf16.vlgmr.msrb.gmra.mxu1 %v2626_v41  ;;  %v4416_v41 = vld [vmem:[%s7281_s4 + $0x78] sm:$0xf0] }
 0x790   :  { %2760 = vmatpush.bf16.msra.mxu3 %v6652_v40  ;;  %2786 = vmatpush.bf16.msrb.mxu1 %v6802_v37 }
 0x794   :  { %v4853_v36 = vpop.eup %4852  ;;  %2761 = vmatpush.bf16.msra.mxu3 %v6659_v42  ;;  %2787 = vmatpush.bf16.msrb.mxu1 %v6820_v43 }
 0x795   :  { %v2623_v47 = vpack.c.bf16 %v4853_v36, %v4853_v36 }
 0x797   :  { %2635 = vmatmul.bf16.vlgmr.msrb.gmra.mxu2 %v2623_v47  ;;  %2661 = vmatmul.bf16.vlgmr.msra.gmra.mxu0 %v2623_v47 }
 0x798   :  { %2747 = vmatpush.bf16.msrb.mxu2 %v6455_v14  ;;  %2762 = vmatpush.bf16.msra.mxu3 %v6669_v46 }
 0x799   :  { %2773 = vmatpush.bf16.msra.mxu0 %v6733_v9  ;;  %2788 = vmatpush.bf16.msrb.mxu1 %v6838_v54 }
 0x79c   :  { %2748 = vmatpush.bf16.msrb.mxu2 %v6473_v23  ;;  %2763 = vmatpush.bf16.msra.mxu3 %v6679_v49 }
 0x79d   :  { %2774 = vmatpush.bf16.msra.mxu0 %v6740_v12  ;;  %2789 = vmatpush.bf16.msrb.mxu1 %v6856_v5 }
 0x7a0   :  { %2749 = vmatpush.bf16.msrb.mxu2 %v6492_v29  ;;  %2764 = vmatpush.bf16.msra.mxu3 %v6689_v53 }
 0x7a1   :  { %2775 = vmatpush.bf16.msra.mxu0 %v6750_v25  ;;  %2790 = vmatpush.bf16.msrb.mxu1 %v6867_v10 }
 0x7a4   :  { %2750 = vmatpush.bf16.msrb.mxu2 %v6518_v39  ;;  %2765 = vmatpush.bf16.msra.mxu3 %v6699_v56 }
 0x7a5   :  { %2776 = vmatpush.bf16.msra.mxu0 %v6760_v19  ;;  %2791 = vmatpush.bf16.msrb.mxu1 %v6876_v15 }
 0x7a8   :  { %2751 = vmatpush.bf16.msrb.mxu2 %v6540_v48  ;;  %2766 = vmatpush.bf16.msra.mxu3 %v6709_v0 }
 0x7a9   :  { %2777 = vmatpush.bf16.msra.mxu0 %v6797_v35  ;;  %2792 = vmatpush.bf16.msrb.mxu1 %v6886_v21 }
 0x7ac   :  { %2752 = vmatpush.bf16.msrb.mxu2 %v6562_v62  ;;  %2767 = vmatpush.bf16.msra.mxu3 %v6719_v4 }
 0x7ad   :  { %2778 = vmatpush.bf16.msra.mxu0 %v6815_v38  ;;  %2793 = vmatpush.bf16.msrb.mxu1 %v6896_v59 }
 0x7b0   :  { %2753 = vmatpush.bf16.msrb.mxu2 %v6584_v8 }
 0x7b1   :  { %2779 = vmatpush.bf16.msra.mxu0 %v6833_v50 }
 0x7b4   :  { %2754 = vmatpush.bf16.msrb.mxu2 %v6606_v18 }
 0x7b5   :  { %2780 = vmatpush.bf16.msra.mxu0 %v6851_v2 }
 0x80c   :  { %v2675_v22 = vpop.f32.mrf.mxu1 }
 0x812   :  { %v2649_v51 = vpop.f32.mrf.mxu3 }
 0x814   :  { %v2662_v55 = vpop.f32.mrf.mxu0  ;;  %v2677_v58 = vpop.f32.mrf.mxu1 }
 0x815   :  { %v2676_v63 = vadd.f32 %v2675_v22, %v2662_v55 }
 0x817   :  { %v2684_v3 = vadd.f32 %v6983_v6, %v2676_v63 }
 0x819   :  { %4854 = vtanh.f32 %v2684_v3 }
 0x81a   :  { %v2636_v7 = vpop.f32.mrf.mxu2  ;;  %v2651_v1 = vpop.f32.mrf.mxu3 }
 0x81b   :  { %v2650_v13 = vadd.f32 %v2649_v51, %v2636_v7 }
 0x81c   :  { %v2664_v57 = vpop.f32.mrf.mxu0 }
 0x81d   :  { %v2679_v17 = vadd.f32 %v6905_v52, %v2650_v13 }
 0x81f   :  { %v4855_v20 = vpop.eup %4854  ;;  %v2681_v30 = vadd.f32 %v2679_v17, %v6972_v26 }
 0x820   :  { %v2686_v33 = vpack.c.bf16 %v4855_v20, %v4855_v20 }
 0x821   :  { %4856 = vtanh.f32 %v2681_v30 }
 0x822   :  { %v2638_v34 = vpop.f32.mrf.mxu2  ;;  %2708 = vmatmul.bf16.vlgmr.msrb.gmra.mxu3 %v2686_v33  ;;  %2734 = vmatmul.bf16.vlgmr.msra.gmra.mxu1 %v2686_v33 }
 0x823   :  { %2820 = vmatpush.bf16.msrb.mxu3 %v6652_v40  ;;  %2846 = vmatpush.bf16.msra.mxu1 %v6802_v37 }
 0x827   :  { %v4857_v11 = vpop.eup %4856  ;;  %2821 = vmatpush.bf16.msrb.mxu3 %v6659_v42  ;;  %2847 = vmatpush.bf16.msra.mxu1 %v6820_v43 }
 0x828   :  { %v2683_v27 = vpack.c.bf16 %v4857_v11, %v4857_v11  ;;  %v4406_v11 = vld [vmem:[%s7281_s4 + $0x60] sm:$0xf] }
 0x82a   :  { %2695 = vmatmul.bf16.vlgmr.msra.gmra.mxu2 %v2683_v27  ;;  %2721 = vmatmul.bf16.vlgmr.msrb.gmra.mxu0 %v2683_v27 }
 0x82b   :  { %2807 = vmatpush.bf16.msra.mxu2 %v6455_v14  ;;  %2822 = vmatpush.bf16.msrb.mxu3 %v6669_v46 }
 0x82c   :  { %2833 = vmatpush.bf16.msrb.mxu0 %v6733_v9  ;;  %2848 = vmatpush.bf16.msra.mxu1 %v6838_v54 }
 0x82f   :  { %2808 = vmatpush.bf16.msra.mxu2 %v6473_v23  ;;  %2823 = vmatpush.bf16.msrb.mxu3 %v6679_v49 }
 0x830   :  { %2834 = vmatpush.bf16.msrb.mxu0 %v6740_v12  ;;  %2849 = vmatpush.bf16.msra.mxu1 %v6856_v5 }
 0x833   :  { %2809 = vmatpush.bf16.msra.mxu2 %v6492_v29  ;;  %2824 = vmatpush.bf16.msrb.mxu3 %v6689_v53 }
 0x834   :  { %2835 = vmatpush.bf16.msrb.mxu0 %v6750_v25  ;;  %2850 = vmatpush.bf16.msra.mxu1 %v6867_v10 }
 0x837   :  { %2810 = vmatpush.bf16.msra.mxu2 %v6518_v39  ;;  %2825 = vmatpush.bf16.msrb.mxu3 %v6699_v56 }
 0x838   :  { %2836 = vmatpush.bf16.msrb.mxu0 %v6760_v19  ;;  %2851 = vmatpush.bf16.msra.mxu1 %v6876_v15 }
 0x83b   :  { %2811 = vmatpush.bf16.msra.mxu2 %v6540_v48  ;;  %2826 = vmatpush.bf16.msrb.mxu3 %v6709_v0 }
 0x83c   :  { %2837 = vmatpush.bf16.msrb.mxu0 %v6797_v35  ;;  %2852 = vmatpush.bf16.msra.mxu1 %v6886_v21 }
 0x83f   :  { %2812 = vmatpush.bf16.msra.mxu2 %v6562_v62  ;;  %2827 = vmatpush.bf16.msrb.mxu3 %v6719_v4 }
 0x840   :  { %2838 = vmatpush.bf16.msrb.mxu0 %v6815_v38  ;;  %2853 = vmatpush.bf16.msra.mxu1 %v6896_v59 }
 0x843   :  { %2813 = vmatpush.bf16.msra.mxu2 %v6584_v8 }
 0x844   :  { %2839 = vmatpush.bf16.msrb.mxu0 %v6833_v50 }
 0x847   :  { %2814 = vmatpush.bf16.msra.mxu2 %v6606_v18 }
 0x848   :  { %2840 = vmatpush.bf16.msrb.mxu0 %v6851_v2 }
 0x89f   :  { %v2735_v14 = vpop.f32.mrf.mxu1 }
 0x8a5   :  { %v2709_v23 = vpop.f32.mrf.mxu3 }
 0x8a7   :  { %v2722_v29 = vpop.f32.mrf.mxu0  ;;  %v2737_v39 = vpop.f32.mrf.mxu1 }
 0x8a8   :  { %v2736_v48 = vadd.f32 %v2735_v14, %v2722_v29  ;;  %v4408_v14 = vld [vmem:[%s7281_s4 + $0x68] sm:$0xf0]  ;;  %v4398_v29 = vld [vmem:[%s7281_s4 + $0x50] sm:$0xf]  ;;  %v4783_v39 = vld [vmem:[%s7281_s4 + $0x54] sm:$0xf0] }
 0x8aa   :  { %v2744_v62 = vadd.f32 %v6983_v6, %v2736_v48  ;;  %v4782_v48 = vld [vmem:[%s7281_s4 + $0x54] sm:$0xf] }
 0x8ac   :  { %4858 = vtanh.f32 %v2744_v62  ;;  %v4399_v62 = vor.u32 %v4783_v39, %v4398_v29  ;;  %v4796_v29 = vld [vmem:[%s7282_s6 + $0x40] sm:$0xff] }
 0x8ad   :  { %v2696_v40 = vpop.f32.mrf.mxu2  ;;  %v2711_v42 = vpop.f32.mrf.mxu3 }
 0x8ae   :  { %v2710_v46 = vadd.f32 %v2709_v23, %v2696_v40  ;;  %v4400_v40 = vld [vmem:[%s7281_s4 + $0x58] sm:$0xf0] }
 0x8af   :  { %v2724_v49 = vpop.f32.mrf.mxu0  ;;  %v4403_v42 = vor.u32 %v4782_v48, %v4400_v40 }
 0x8b0   :  { %v2739_v8 = vadd.f32 %v6905_v52, %v2710_v46  ;;  %v4390_v46 = vld [vmem:[%s7281_s4 + $0x40] sm:$0xf]  ;;  %v4781_v49 = vld [vmem:[%s7281_s4 + $0x44] sm:$0xf0] }
 0x8b2   :  { %v4859_v53 = vpop.eup %4858  ;;  %v2741_v56 = vadd.f32 %v2739_v8, %v6974_v45  ;;  %v4780_v8 = vld [vmem:[%s7281_s4 + $0x44] sm:$0xf] }
 0x8b3   :  { %v2746_v18 = vpack.c.bf16 %v4859_v53, %v4859_v53  ;;  %v4391_v53 = vor.u32 %v4781_v49, %v4390_v46 }
 0x8b4   :  { %4860 = vtanh.f32 %v2741_v56  ;;  %v4392_v56 = vld [vmem:[%s7281_s4 + $0x48] sm:$0xf0] }
 0x8b5   :  { %v2698_v0 = vpop.f32.mrf.mxu2  ;;  %2768 = vmatmul.bf16.vlgmr.msra.gmra.mxu3 %v2746_v18  ;;  %2794 = vmatmul.bf16.vlgmr.msrb.gmra.mxu1 %v2746_v18  ;;  %v4395_v18 = vor.u32 %v4780_v8, %v4392_v56 }
 0x8b6   :  { %2880 = vmatpush.bf16.msra.mxu3 %v6802_v37  ;;  %v4382_v0 = vld [vmem:[%s7281_s4 + $0x30] sm:$0xf] }
 0x8ba   :  { %v4861_v4 = vpop.eup %4860  ;;  %2881 = vmatpush.bf16.msra.mxu3 %v6820_v43 }
 0x8bb   :  { %v2743_v26 = vpack.c.bf16 %v4861_v4, %v4861_v4  ;;  %v4779_v4 = vld [vmem:[%s7281_s4 + $0x34] sm:$0xf0] }
 0x8bd   :  { %2755 = vmatmul.bf16.vlgmr.msrb.gmra.mxu2 %v2743_v26  ;;  %2781 = vmatmul.bf16.vlgmr.msra.gmra.mxu0 %v2743_v26  ;;  %v4778_v26 = vld [vmem:[%s7281_s4 + $0x34] sm:$0xf] }
 0x8be   :  { %2867 = vmatpush.bf16.msrb.mxu2 %v6733_v9  ;;  %2882 = vmatpush.bf16.msra.mxu3 %v6838_v54 }
 0x8bf   :  { %3006 = vmatpush.bf16.msra.mxu0 %v4415_v31 }
 0x8c2   :  { %2868 = vmatpush.bf16.msrb.mxu2 %v6740_v12  ;;  %2883 = vmatpush.bf16.msra.mxu3 %v6856_v5 }
 0x8c6   :  { %2869 = vmatpush.bf16.msrb.mxu2 %v6750_v25  ;;  %2884 = vmatpush.bf16.msra.mxu3 %v6867_v10 }
 0x8ca   :  { %2870 = vmatpush.bf16.msrb.mxu2 %v6760_v19  ;;  %2885 = vmatpush.bf16.msra.mxu3 %v6876_v15 }
 0x8ce   :  { %2871 = vmatpush.bf16.msrb.mxu2 %v6797_v35  ;;  %2886 = vmatpush.bf16.msra.mxu3 %v6886_v21 }
 0x8d2   :  { %2872 = vmatpush.bf16.msrb.mxu2 %v6815_v38  ;;  %2887 = vmatpush.bf16.msra.mxu3 %v6896_v59 }
 0x8d6   :  { %2873 = vmatpush.bf16.msrb.mxu2 %v6833_v50 }
 0x8da   :  { %2874 = vmatpush.bf16.msrb.mxu2 %v6851_v2 }
 0x932   :  { %v2795_v9 = vpop.f32.mrf.mxu1 }
 0x938   :  { %v2769_v12 = vpop.f32.mrf.mxu3 }
 0x93a   :  { %v2782_v25 = vpop.f32.mrf.mxu0  ;;  %v2797_v37 = vpop.f32.mrf.mxu1 }
 0x93b   :  { %v2796_v43 = vadd.f32 %v2795_v9, %v2782_v25  ;;  %v4383_v9 = vor.u32 %v4779_v4, %v4382_v0  ;;  %v4374_v37 = vld [vmem:[%s7281_s4 + $0x20] sm:$0xf] }
 0x93d   :  { %v2804_v19 = vadd.f32 %v6983_v6, %v2796_v43  ;;  %v4777_v43 = vld [vmem:[%s7281_s4 + $0x24] sm:$0xf0] }
 0x93f   :  { %4862 = vtanh.f32 %v2804_v19  ;;  %v4776_v19 = vld [vmem:[%s7281_s4 + $0x24] sm:$0xf] }
 0x940   :  { %v2756_v54 = vpop.f32.mrf.mxu2  ;;  %v2771_v35 = vpop.f32.mrf.mxu3 }
 0x941   :  { %v2770_v5 = vadd.f32 %v2769_v12, %v2756_v54  ;;  %v4384_v12 = vld [vmem:[%s7281_s4 + $0x38] sm:$0xf0]  ;;  %v4375_v54 = vor.u32 %v4777_v43, %v4374_v37  ;;  %v4376_v35 = vld [vmem:[%s7281_s4 + $0x28] sm:$0xf0] }
 0x942   :  { %v2784_v10 = vpop.f32.mrf.mxu0  ;;  %v4387_v25 = vor.u32 %v4778_v26, %v4384_v12  ;;  %v4807_v26 = vld [vmem:[%s7283_s7] ss:$0 sm:$0xff] }
 0x943   :  { %v2799_v38 = vadd.f32 %v6905_v52, %v2770_v5  ;;  %v4379_v5 = vor.u32 %v4776_v19, %v4376_v35  ;;  %v4366_v10 = vld [vmem:[%s7281_s4 + $0x10] sm:$0xf] }
 0x945   :  { %v4863_v15 = vpop.eup %4862  ;;  %v2801_v21 = vadd.f32 %v2799_v38, %v6976_v28  ;;  %v4786_v28 = vld [vmem:[%s7281_s4 + $0x74] sm:$0xf]  ;;  %v4775_v38 = vld [vmem:[%s7281_s4 + $0x14] sm:$0xf0] }
 0x946   :  { %v2806_v50 = vpack.c.bf16 %v4863_v15, %v4863_v15  ;;  %v4419_v36 = vor.u32 %v4786_v28, %v4416_v41  ;;  %v4774_v15 = vld [vmem:[%s7281_s4 + $0x14] sm:$0xf]  ;;  %v4360_v28 = vld [vmem:[%s7281_s4 + $0x8] sm:$0xf0]  ;;  %v4795_v41 = vld [vmem:[%s7282_s6 + $0x38] sm:$0xff] }
 0x947   :  { %4864 = vtanh.f32 %v2801_v21  ;;  %v4367_v21 = vor.u32 %v4775_v38, %v4366_v10  ;;  %v4363_v31 = vor.u32 %v4772_v60, %v4360_v28 }
 0x948   :  { %v2758_v2 = vpop.f32.mrf.mxu2  ;;  %2828 = vmatmul.bf16.vlgmr.msrb.gmra.mxu3 %v2806_v50  ;;  %2854 = vmatmul.bf16.vlgmr.msra.gmra.mxu1 %v2806_v50  ;;  %v4368_v50 = vld [vmem:[%s7281_s4 + $0x18] sm:$0xf0] }
 0x949   :  { %3020 = vmatpush.bf16.msrb.mxu1 %v4419_v36  ;;  %v4371_v2 = vor.u32 %v4774_v15, %v4368_v50  ;;  %v4794_v36 = vld [vmem:[%s7282_s6 + $0x30] sm:$0xff] }
 0x94d   :  { %v4865_v59 = vpop.eup %4864 }
 0x94e   :  { %v2803_v45 = vpack.c.bf16 %v4865_v59, %v4865_v59  ;;  %v4358_v59 = vld [vmem:[%s7281_s4] sm:$0xf] }
 0x950   :  { %2815 = vmatmul.bf16.vlgmr.msra.gmra.mxu2 %v2803_v45  ;;  %2841 = vmatmul.bf16.vlgmr.msrb.gmra.mxu0 %v2803_v45  ;;  %v4773_v45 = vld [vmem:[%s7281_s4 + $0x4] sm:$0xf0] }
 0x951   :  { %v4359_v24 = vor.u32 %v4773_v45, %v4358_v59  ;;  %3168 = vmatpush.bf16.msra.mxu2 %v4795_v41 }
 0x955   :  { %3169 = vmatpush.bf16.msra.mxu2 %v4794_v36 }
 0x9c5   :  { %v2855_v44 = vpop.f32.mrf.mxu1 }
 0x9cb   :  { %v2829_v47 = vpop.f32.mrf.mxu3 }
 0x9cd   :  { %v2842_v22 = vpop.f32.mrf.mxu0  ;;  %v2857_v51 = vpop.f32.mrf.mxu1 }
 0x9ce   :  { %v2856_v55 = vadd.f32 %v2855_v44, %v2842_v22  ;;  %v4803_v44 = vld [vmem:[%s7282_s6 + $0x78] sm:$0xff]  ;;  %v4793_v51 = vld [vmem:[%s7282_s6 + $0x28] sm:$0xff] }
 0x9cf   :  { %3182 = vmatpush.bf16.msrb.mxu3 %v4803_v44  ;;  %3170 = vmatpush.bf16.msra.mxu2 %v4793_v51 }
 0x9d0   :  { %v2864_v58 = vadd.f32 %v6983_v6, %v2856_v55  ;;  %v4801_v55 = vld [vmem:[%s7282_s6 + $0x68] sm:$0xff] }
 0x9d2   :  { %4866 = vtanh.f32 %v2864_v58  ;;  %v4792_v58 = vld [vmem:[%s7282_s6 + $0x20] sm:$0xff] }
 0x9d3   :  { %v2816_v63 = vpop.f32.mrf.mxu2  ;;  %v2831_v3 = vpop.f32.mrf.mxu3  ;;  %3171 = vmatpush.bf16.msra.mxu2 %v4792_v58 }
 0x9d4   :  { %v2830_v7 = vadd.f32 %v2829_v47, %v2816_v63  ;;  %v4802_v47 = vld [vmem:[%s7282_s6 + $0x70] sm:$0xff]  ;;  %v4800_v63 = vld [vmem:[%s7282_s6 + $0x60] sm:$0xff] }
 0x9d5   :  { %v2844_v1 = vpop.f32.mrf.mxu0  ;;  %3183 = vmatpush.bf16.msrb.mxu3 %v4802_v47 }
 0x9d6   :  { %v2859_v13 = vadd.f32 %v6905_v52, %v2830_v7  ;;  %v4785_v52 = vld [vmem:[%s7281_s4 + $0x64] sm:$0xf0] }
 0x9d7   :  { %v4407_v27 = vor.u32 %v4785_v52, %v4406_v11 }
 0x9d8   :  { %v4867_v57 = vpop.eup %4866  ;;  %v2861_v17 = vadd.f32 %v2859_v13, %v6978_v32  ;;  %v4784_v32 = vld [vmem:[%s7281_s4 + $0x64] sm:$0xf]  ;;  %v4791_v13 = vld [vmem:[%s7282_s6 + $0x18] sm:$0xff] }
 0x9d9   :  { %v2866_v20 = vpack.c.bf16 %v4867_v57, %v4867_v57  ;;  %v4411_v23 = vor.u32 %v4784_v32, %v4408_v14  ;;  %3007 = vmatpush.bf16.msra.mxu0 %v4407_v27  ;;  %3184 = vmatpush.bf16.msrb.mxu3 %v4801_v55  ;;  %v4799_v57 = vld [vmem:[%s7282_s6 + $0x58] sm:$0xff]  ;;  %v4790_v27 = vld [vmem:[%s7282_s6 + $0x10] sm:$0xff]  ;;  %v4789_v14 = vld [vmem:[%s7282_s6 + $0x8] sm:$0xff] }
 0x9da   :  { %4868 = vtanh.f32 %v2861_v17  ;;  %3172 = vmatpush.bf16.msra.mxu2 %v4791_v13 }
 0x9db   :  { %v2818_v30 = vpop.f32.mrf.mxu2  ;;  %2888 = vmatmul.bf16.vlgmr.msra.gmra.mxu3 %v2866_v20  ;;  %3021 = vmatpush.bf16.msrb.mxu1 %v4411_v23  ;;  %v4788_v23 = vld [vmem:[%s7282_s6] sm:$0xff] }
 0x9dd   :  { %3008 = vmatpush.bf16.msra.mxu0 %v4399_v62  ;;  %3185 = vmatpush.bf16.msrb.mxu3 %v4800_v63  ;;  %v2920_v62 = vld [vmem:[%s7284_s5] sm:$0x3] }
 0x9de   :  { %3173 = vmatpush.bf16.msra.mxu2 %v4790_v27  ;;  %v2922_v40 = vperm.slane %v2920_v62, 0 }
 0x9df   :  { %3022 = vmatpush.bf16.msrb.mxu1 %v4403_v42  ;;  %v2923_v42 = vperm.slane %v2920_v62, 1 }
 0x9e0   :  { %v4869_v33 = vpop.eup %4868 }
 0x9e1   :  { %v7126_v34 = vpack.c.bf16 %v4869_v33, %v4869_v33  ;;  %3009 = vmatpush.bf16.msra.mxu0 %v4391_v53  ;;  %3186 = vmatpush.bf16.msrb.mxu3 %v4799_v57 }
 0x9e2   :  { %3174 = vmatpush.bf16.msra.mxu2 %v4789_v14 }
 0x9e3   :  { %2875 = vmatmul.bf16.vlgmr.msrb.gmra.mxu2 %v7126_v34  ;;  %3023 = vmatpush.bf16.msrb.mxu1 %v4395_v18 }
 0x9e5   :  { %3010 = vmatpush.bf16.msra.mxu0 %v4383_v9 }
 0x9e6   :  { %3175 = vmatpush.bf16.msra.mxu2 %v4788_v23 }
 0x9e7   :  { %3024 = vmatpush.bf16.msrb.mxu1 %v4387_v25 }
 0x9e9   :  { %3011 = vmatpush.bf16.msra.mxu0 %v4375_v54 }
 0x9eb   :  { %3025 = vmatpush.bf16.msrb.mxu1 %v4379_v5 }
 0x9ed   :  { %3012 = vmatpush.bf16.msra.mxu0 %v4367_v21 }
 0x9ef   :  { %3026 = vmatpush.bf16.msrb.mxu1 %v4371_v2 }
 0x9f1   :  { %3013 = vmatpush.bf16.msra.mxu0 %v4359_v24 }
 0x9f3   :  { %3027 = vmatpush.bf16.msrb.mxu1 %v4363_v31 }
 0xa5e   :  { %v2889_v22 = vpop.f32.mrf.mxu3 }
 0xa66   :  { %v2876_v3 = vpop.f32.mrf.mxu2  ;;  %v2891_v7 = vpop.f32.mrf.mxu3 }
 0xa67   :  { %v2890_v1 = vadd.f32 %v2889_v22, %v2876_v3 }
 0xa69   :  { %v2893_v17 = vadd.f32 %v6983_v6, %v2890_v1  ;;  %v4798_v6 = vld [vmem:[%s7282_s6 + $0x50] sm:$0xff] }
 0xa6a   :  { %3187 = vmatpush.bf16.msrb.mxu3 %v4798_v6 }
 0xa6b   :  { %4870 = vtanh.f32 %v2893_v17 }
 0xa6e   :  { %v2878_v20 = vpop.f32.mrf.mxu2 }
 0xa71   :  { %v4871_v30 = vpop.eup %4870 }
 0xa72   :  { %v2895_v33 = vpack.c.bf16 %v4871_v30, %v4871_v30 }
 0xa74   :  { %v2897_v11 = vunpack.c.l.b16 %v2895_v33 }
 0xa76   :  { %v2898_v52 = vpack.c.b16 %v2897_v11, %v2897_v11 }
 0xa78   :  { %v2902_v32 = vsel %vm2899_vm0, %v7126_v34, %v2898_v52  ;;  %v4797_v34 = vld [vmem:[%s7282_s6 + $0x48] sm:$0xff] }
 0xa79   :  { %3014 = vmatmul.bf16.vlgmr.msra.gmra.mxu0 %v2902_v32  ;;  %3028 = vmatmul.bf16.vlgmr.msrb.gmra.mxu1 %v2902_v32 }
 0xa7a   :  { %3188 = vmatpush.bf16.msrb.mxu3 %v4797_v34 }
 0xa7e   :  { %3189 = vmatpush.bf16.msrb.mxu3 %v4796_v29 }
 0xaf6   :  { %v3015_v39 = vpop.f32.mrf.mxu0  ;;  %v3029_v48 = vpop.f32.mrf.mxu1 }
 0xaf7   :  { %v3016_v8 = vadd.f32 %v3015_v39, %v2922_v40  ;;  %v3030_v53 = vadd.f32 %v3029_v48, %v2923_v42 }
 0xafe   :  { %v3017_v46 = vpop.f32.mrf.mxu0  ;;  %v3031_v49 = vpop.f32.mrf.mxu1 }
 0xaff   :  { %v3018_v56 = vadd.f32 %v3017_v46, %v2922_v40  ;;  %v3032_v18 = vadd.f32 %v3031_v49, %v2923_v42 }
 0xb01   :  { %v3034_v0 = vpack.c.bf16 %v3018_v56, %v3016_v8  ;;  %v3035_v4 = vpack.c.bf16 %v3032_v18, %v3030_v53 }
 0xb03   :  { %3176 = vmatmul.bf16.vlgmr.msra.gmra.mxu2 %v3034_v0  ;;  %3190 = vmatmul.bf16.vlgmr.msrb.gmra.mxu3 %v3035_v4 }
 0xb86   :  { %v3177_v9 = vpop.f32.mrf.mxu2  ;;  %v3191_v12 = vpop.f32.mrf.mxu3 }
 0xb87   :  { %v3178_v25 = vadd.f32 %v4807_v26, %v3177_v9 }
 0xb89   :  { %v3192_v37 = vadd.f32 %v3191_v12, %v3178_v25 }
 0xb8b   :  { %v3196_v43 = vadd.f32 %v6634_v16, %v3192_v37 }
 0xb8d   :  { %3198 = vst [vmem:[%s7285_s8] sm:$0xff] %v3196_v43 }
 0xb8e   :  { %v3179_v19 = vpop.f32.mrf.mxu2  ;;  %v3193_v35 = vpop.f32.mrf.mxu3 }
 0xb8f   :  { %v3180_v54 = vadd.f32 %v4807_v26, %v3179_v19 }
 0xb91   :  { %v3194_v5 = vadd.f32 %v3193_v35, %v3180_v54 }
 0xb93   :  { %v3197_v10 = vadd.f32 %v6770_v61, %v3194_v5 }
 0xb95   :  { %3199 = vst [vmem:[%s7285_s8 + $0x8] sm:$0xff] %v3197_v10 }

</bundles_post_ra>
